<compile_context>
chip_gen: v6e
topology: v6e:2x2x1
jax: 0.10.0
libtpu: 0.0.40
codegen_flags: <defaults>
</compile_context>

<pallas_src>
import jax
import jax.numpy as jnp
from jax import lax
from jax.experimental import pallas as pl
from jax.experimental.pallas import tpu as pltpu

C_TRUNK = 784      # regnet_y_800mf final width
D_EMB = 512        # embedding dim
BN_EPS = 1e-3
NORM_EPS = 1e-12   # F.normalize default eps


def _head_kernel(feat_ref, w_ref, shift_ref, out_ref):
    # feat_ref : [TB, C, HW]  trunk features, native NCHW layout (HW on lanes)
    # w_ref    : [C, D]       Linear weight^T with BN scale folded in (bf16)
    # shift_ref: [1, D]       folded BN shift = beta - mean * scale (f32)
    # out_ref  : [TB, D]      L2-normalized embeddings (f32)

    # AdaptiveAvgPool2d(1) + flatten: reduce the spatial lane axis (XLU),
    # accumulate in f32.  -> [TB, C]
    pooled = jnp.mean(feat_ref[...].astype(jnp.float32), axis=-1)

    # Dropout(0.5) is identity at inference; Linear(784, 512, bias=False)
    # with the BatchNorm1d scale pre-folded into the weight columns.
    y = jnp.dot(pooled.astype(jnp.bfloat16), w_ref[...],
                preferred_element_type=jnp.float32)
    y = y + shift_ref[...]

    # F.normalize: y / max(||y||_2, eps) == y * rsqrt(max(sum(y^2), eps^2))
    sumsq = jnp.sum(y * y, axis=-1, keepdims=True)
    out_ref[...] = y * lax.rsqrt(jnp.maximum(sumsq, NORM_EPS * NORM_EPS))


def identification_head(feat_nchw, w_t, bn_gamma, bn_beta, bn_mean, bn_var,
                        *, batch_tile=64):
    """feat_nchw: [B, 784, H, W] trunk feature map (NCHW, like PyTorch).

    For best bandwidth the trunk should hand off bf16 features; the kernel
    streams whatever dtype it is given and accumulates the pool in f32.
    """
    B, C, H, W = feat_nchw.shape
    assert C == C_TRUNK
    HW = H * W

    # Native NCHW layout: a reshape only (no HBM transpose pass); the spatial
    # axis lands on the TPU lane dimension and is reduced in-kernel.
    feat = feat_nchw.reshape(B, C, HW)

    # Fold eval-mode BatchNorm1d into the matmul weight + a per-feature shift.
    scale = bn_gamma.astype(jnp.float32) / jnp.sqrt(
        bn_var.astype(jnp.float32) + BN_EPS)                        # [D]
    shift = (bn_beta.astype(jnp.float32)
             - bn_mean.astype(jnp.float32) * scale).reshape(1, D_EMB)
    w_folded = (w_t.astype(jnp.float32) * scale[None, :]).astype(jnp.bfloat16)

    # Batch tiling: grid over batch -> double-buffered feature DMA overlapped
    # with compute, bounded per-step VMEM (tile sized for v7x's 64 MiB VMEM).
    if B <= batch_tile:
        tb = B                      # single grid step, block == full batch
    else:
        tb = batch_tile
        assert tb % 8 == 0, "batch_tile must be a multiple of 8"
    b_pad = pl.cdiv(B, tb) * tb
    if b_pad != B:
        feat = jnp.pad(feat, ((0, b_pad - B), (0, 0), (0, 0)))

    out = pl.pallas_call(
        _head_kernel,
        out_shape=jax.ShapeDtypeStruct((b_pad, D_EMB), jnp.float32),
        grid_spec=pltpu.PrefetchScalarGridSpec(
            num_scalar_prefetch=0,
            grid=(b_pad // tb,),
            in_specs=[
                pl.BlockSpec((tb, C_TRUNK, HW), lambda b: (b, 0, 0)),  # feat
                pl.BlockSpec((C_TRUNK, D_EMB), lambda b: (0, 0)),      # weight
                pl.BlockSpec((1, D_EMB), lambda b: (0, 0)),            # shift
            ],
            out_specs=pl.BlockSpec((tb, D_EMB), lambda b: (b, 0)),
        ),
        compiler_params=pltpu.CompilerParams(
            dimension_semantics=("parallel",),   # shard batch across TCs (v7x)
        ),
    )(feat, w_folded, shift)

    return out[:B]


def _reference(feat_nchw, w_t, bn_gamma, bn_beta, bn_mean, bn_var):
    pooled = jnp.mean(feat_nchw.astype(jnp.float32), axis=(2, 3))   # [B, C]
    y = pooled @ w_t.astype(jnp.float32)                            # [B, D]
    scale = bn_gamma / jnp.sqrt(bn_var + BN_EPS)
    y = (y - bn_mean) * scale + bn_beta
    n = jnp.sqrt(jnp.sum(y * y, axis=1, keepdims=True))
    return y / jnp.maximum(n, NORM_EPS)


if __name__ == "__main__":
    key = jax.random.PRNGKey(0)
    k_feat, k_w, k_g, k_b, k_m, k_v, k_feat2 = jax.random.split(key, 7)

    B, H, W = 2, 4, 4  # small trunk spatial output for the test

    # Synthetic trunk features, handed off in bf16 (native stream/MXU dtype).
    feat = jax.random.normal(
        k_feat, (B, C_TRUNK, H, W), dtype=jnp.float32).astype(jnp.bfloat16)

    # torch Linear weight is [512, 784]; we carry its transpose [784, 512].
    w_t = 0.02 * jax.random.normal(k_w, (C_TRUNK, D_EMB), dtype=jnp.float32)
    bn_gamma = 1.0 + 0.1 * jax.random.normal(k_g, (D_EMB,), dtype=jnp.float32)
    bn_beta = 0.1 * jax.random.normal(k_b, (D_EMB,), dtype=jnp.float32)
    bn_mean = 0.1 * jax.random.normal(k_m, (D_EMB,), dtype=jnp.float32)
    bn_var = jnp.abs(1.0 + 0.1 * jax.random.normal(k_v, (D_EMB,),
                                                   dtype=jnp.float32))

    out = identification_head(feat, w_t, bn_gamma, bn_beta, bn_mean, bn_var)
    out = jax.block_until_ready(out)
    ref = _reference(feat, w_t, bn_gamma, bn_beta, bn_mean, bn_var)
    assert out.shape == (B, D_EMB)
    # bf16 streamed operands: loosen tolerance vs the f32 reference.
    assert jnp.allclose(out, ref, atol=2e-2, rtol=2e-2), "mismatch vs reference"

    # Exercise the batch grid + padding path (B not a multiple of the tile).
    B2 = 9
    feat2 = jax.random.normal(
        k_feat2, (B2, C_TRUNK, H, W), dtype=jnp.float32).astype(jnp.bfloat16)
    out2 = identification_head(feat2, w_t, bn_gamma, bn_beta, bn_mean, bn_var,
                               batch_tile=8)
    out2 = jax.block_until_ready(out2)
    ref2 = _reference(feat2, w_t, bn_gamma, bn_beta, bn_mean, bn_var)
    assert out2.shape == (B2, D_EMB)
    assert jnp.allclose(out2, ref2, atol=2e-2, rtol=2e-2), "mismatch (grid)"

    print("KERNEL_OK")
</pallas_src>

<mosaic_0001>
module attributes {stable_mosaic.version = 11 : i64} {
  func.func @_head_kernel(%arg0: i32, %arg1: memref<2x784x16xbf16, #tpu.memory_space<vmem>>, %arg2: memref<784x512xbf16, #tpu.memory_space<vmem>>, %arg3: memref<1x512xf32, #tpu.memory_space<vmem>>, %arg4: memref<2x512xf32, #tpu.memory_space<vmem>>) attributes {dimension_semantics = [#tpu.dimension_semantics<parallel>], iteration_bounds = array<i64: 1>, scalar_prefetch = 0 : i64, scratch_operands = 0 : i64, tpu.core_type = #tpu.core_type<tc>, window_params = [{transform_indices = @transform_0, window_bounds = array<i64: 2, 784, 16>}, {pipeline_mode = #tpu.pipeline_mode<synchronous>, transform_indices = @transform_1, window_bounds = array<i64: 784, 512>}, {pipeline_mode = #tpu.pipeline_mode<synchronous>, transform_indices = @transform_2, window_bounds = array<i64: 1, 512>}, {transform_indices = @transform_3, window_bounds = array<i64: 2, 512>}]} {
    %c0 = arith.constant 0 : index
    %c0_0 = arith.constant 0 : index
    %c0_1 = arith.constant 0 : index
    %0 = vector.load %arg1[%c0, %c0_0, %c0_1] : memref<2x784x16xbf16, #tpu.memory_space<vmem>>, vector<2x784x16xbf16>
    %1 = arith.extf %0 : vector<2x784x16xbf16> to vector<2x784x16xf32>
    %cst = arith.constant dense<0.000000e+00> : vector<2x784xf32>
    %2 = vector.multi_reduction <add>, %1, %cst [2] : vector<2x784x16xf32> to vector<2x784xf32>
    %cst_2 = arith.constant 1.600000e+01 : f32
    %3 = vector.broadcast %cst_2 : f32 to vector<2x784xf32>
    %4 = arith.divf %2, %3 : vector<2x784xf32>
    %5 = arith.truncf %4 : vector<2x784xf32> to vector<2x784xbf16>
    %c0_3 = arith.constant 0 : index
    %c0_4 = arith.constant 0 : index
    %6 = vector.load %arg2[%c0_3, %c0_4] : memref<784x512xbf16, #tpu.memory_space<vmem>>, vector<784x512xbf16>
    %cst_5 = arith.constant dense<0.000000e+00> : vector<2x512xf32>
    %7 = tpu.matmul %5, %6, %cst_5 {dimension_numbers = #tpu.dot_dimension_numbers<[1], [0], [0], [1], [0, 0, 1, 1], [], []>} : vector<2x784xbf16>, vector<784x512xbf16>, vector<2x512xf32> -> vector<2x512xf32>
    %c0_6 = arith.constant 0 : index
    %c0_7 = arith.constant 0 : index
    %8 = vector.load %arg3[%c0_6, %c0_7] : memref<1x512xf32, #tpu.memory_space<vmem>>, vector<1x512xf32>
    %9 = vector.broadcast %8 : vector<1x512xf32> to vector<2x512xf32>
    %10 = arith.addf %7, %9 : vector<2x512xf32>
    %11 = arith.mulf %10, %10 : vector<2x512xf32>
    %cst_8 = arith.constant dense<0.000000e+00> : vector<2xf32>
    %12 = vector.multi_reduction <add>, %11, %cst_8 [1] : vector<2x512xf32> to vector<2xf32>
    %13 = vector.shape_cast %12 : vector<2xf32> to vector<2x1xf32>
    %cst_9 = arith.constant 1.000000e-24 : f32
    %14 = vector.broadcast %cst_9 : f32 to vector<2x1xf32>
    %15 = arith.maximumf %13, %14 : vector<2x1xf32>
    %16 = math.rsqrt %15 : vector<2x1xf32>
    %17 = vector.broadcast %16 : vector<2x1xf32> to vector<2x512xf32>
    %18 = arith.mulf %10, %17 : vector<2x512xf32>
    %c0_10 = arith.constant 0 : index
    %c0_11 = arith.constant 0 : index
    %19 = vector.load %arg4[%c0_10, %c0_11] : memref<2x512xf32, #tpu.memory_space<vmem>>, vector<2x512xf32>
    tpu.vector_store %arg4[%c0_10, %c0_11], %18 {strides = array<i32>} : memref<2x512xf32, #tpu.memory_space<vmem>>, vector<2x512xf32>,
    return
  }
  func.func @transform_0(%arg0: i32) -> (i32, i32, i32) {
    %c0_i32 = arith.constant 0 : i32
    %c0_i32_0 = arith.constant 0 : i32
    %c0_i32_1 = arith.constant 0 : i32
    return %arg0, %c0_i32, %c0_i32_0 : i32, i32, i32
  }
  func.func @transform_1(%arg0: i32) -> (i32, i32) {
    %c0_i32 = arith.constant 0 : i32
    %c0_i32_0 = arith.constant 0 : i32
    %c0_i32_1 = arith.constant 0 : i32
    return %c0_i32, %c0_i32_0 : i32, i32
  }
  func.func @transform_2(%arg0: i32) -> (i32, i32) {
    %c0_i32 = arith.constant 0 : i32
    %c0_i32_0 = arith.constant 0 : i32
    %c0_i32_1 = arith.constant 0 : i32
    return %c0_i32, %c0_i32_0 : i32, i32
  }
  func.func @transform_3(%arg0: i32) -> (i32, i32) {
    %c0_i32 = arith.constant 0 : i32
    %c0_i32_0 = arith.constant 0 : i32
    return %arg0, %c0_i32 : i32, i32
  }
}

</mosaic_0001>

<bundles_post_ra>
// kernel: tpu_custom_call.1
= control target key start
LH: loop header
LB: loop body
LE: loop exit
PB: predicated region body
PF: predicated region fallthrough
CT: control target
= control target key end

     0   :  { %8 = vsyncpa [#allocation3], 0  ;;  %s6616_s0 = inlined_call_operand.vmem [shape: bf16[2,784,16], index: 0, kind: input, shape index: {}]   ;;  %s6617_s1 = inlined_call_operand.hbm [shape: bf16[784,512], index: 1, kind: input, shape index: {}]   ;;  %s6618_s2 = inlined_call_operand.vmem [shape: f32[1,512], index: 2, kind: input, shape index: {}]   ;;  %s6619_s3 = inlined_call_operand.hbm [shape: f32[2,512], index: 3, kind: output, shape index: {}]  }
   0x1   :  { %9 = vsyncpa [#allocation4], 0  ;;  %s5239_s12 = smov [#allocation2]  }
   0x2   :  { %s17_s13 = sshll.u32 %s5239_s12, 4  ;;  %s18_s13 = int_to_ptr.vmem [resolvable:$true] %s17_s13 }
   0x3   :  { %s5203_s14 = scalar_lea.vmem %s18_s13, 25088  ;;  %p5208_p1 = scmp.lt.s32.totalorder %s18_s13, %s18_s13 }
   0x4   :  { %p5204_p0 = scmp.ne.s32.totalorder %s18_s13, %s5203_s14  ;;  %p5209_p2 = scmp.lt.s32.totalorder %s5203_s14, %s5203_s14 }
   0x6   :  { %p5210_p3 = por %p5209_p2, %p5208_p1 }
   0x8   :  { %p5211_p4 = pnand %p5210_p3, %p5204_p0 }
   0xa   :  { %5214 = shalt.err (!%p5211_p4)
}
   0xb   :  { %s5240_s15 = smov 256   ;;  %s5241_s16 = smov 16  }
   0xc   :  { %23 = dma.hbm_to_vmem [thread:$0]  %s6617_s1, 25088, %s18_s13, [#allocation3], %s5240_s15, %s5240_s15, %s5241_s16  }
   0xd   :  { %5235 = dma.done.wait [#allocation3], 25088  }
   0xe   :  { %5236 = vsyncadd [#allocation3], 4294942208  ;;  %v4868_v0 = vld [vmem:[%s6616_s0 + $0x248] sm:$0xff]   ;;  %vm422_vm0 = vcmask 130048   ;;  %v4819_v1 = vld [vmem:[%s6616_s0 + $0xc0] sm:$0xff]   ;;  %vm1829_vm1 = vcmask 130112  }
   0xf   :  { %v4698_v2 = vunpack.c.l.bf16 %v4868_v0  ;;  %v4502_v3 = vunpack.c.l.bf16 %v4819_v1  ;;  %v4699_v4 = vunpack.c.h.bf16 %v4868_v0  ;;  %v4503_v5 = vunpack.c.h.bf16 %v4819_v1  ;;  %v4811_v6 = vld [vmem:[%s6616_s0 + $0x80] sm:$0xff]   ;;  %v4820_v13 = vld [vmem:[%s6616_s0 + $0xc8] sm:$0xff]   ;;  %v4869_v23 = vld [vmem:[%s6616_s0 + $0x250] sm:$0xff]  }
  0x10   :  { %v4471_v11 = vunpack.c.h.bf16 %v4811_v6  ;;  %v4470_v12 = vunpack.c.l.bf16 %v4811_v6  ;;  %v4507_v16 = vunpack.c.h.bf16 %v4820_v13  ;;  %v4506_v17 = vunpack.c.l.bf16 %v4820_v13  ;;  %v4860_v18 = vld [vmem:[%s6616_s0 + $0x208] sm:$0xff]   ;;  %v4803_v24 = vld [vmem:[%s6616_s0 + $0x40] sm:$0xff]   ;;  %v4861_v43 = vld [vmem:[%s6616_s0 + $0x210] sm:$0xff]  }
  0x11   :  { %v861_v7 = vsel %vm422_vm0, %v4698_v2, 0.0  ;;  %v567_v8 = vsel %vm422_vm0, %v4502_v3, 0.0  ;;  %v864_v9 = vsel %vm422_vm0, %v4699_v4, 0.0  ;;  %v570_v10 = vsel %vm422_vm0, %v4503_v5, 0.0  ;;  %v4812_v33 = vld [vmem:[%s6616_s0 + $0x88] sm:$0xff]   ;;  %v4405_v48 = vld [vmem:[%s6616_s0] sm:$0xff]  }
  0x12   :  { %862 = vadd.xlane.f32.xlu1 %v861_v7  ;;  %568 = vadd.xlane.f32.xlu0 %v567_v8  ;;  %v522_v14 = vsel %vm422_vm0, %v4471_v11, 0.0  ;;  %v519_v15 = vsel %vm422_vm0, %v4470_v12, 0.0  ;;  %v576_v19 = vsel %vm422_vm0, %v4507_v16, 0.0  ;;  %v573_v20 = vsel %vm422_vm0, %v4506_v17, 0.0  ;;  %v4852_v38 = vld [vmem:[%s6616_s0 + $0x1c8] sm:$0xff]   ;;  %v4821_v58 = vld [vmem:[%s6616_s0 + $0xd0] sm:$0xff]  }
  0x13   :  { %v4667_v21 = vunpack.c.h.bf16 %v4860_v18  ;;  %v4666_v22 = vunpack.c.l.bf16 %v4860_v18  ;;  %v4703_v27 = vunpack.c.h.bf16 %v4869_v23  ;;  %v4702_v28 = vunpack.c.l.bf16 %v4869_v23  ;;  %v4804_v53 = vld [vmem:[%s6616_s0 + $0x48] sm:$0xff]   ;;  %v4853_v4 = vld [vmem:[%s6616_s0 + $0x1d0] sm:$0xff]  }
  0x14   :  { %v4439_v31 = vunpack.c.h.bf16 %v4803_v24  ;;  %v4438_v32 = vunpack.c.l.bf16 %v4803_v24  ;;  %v4475_v36 = vunpack.c.h.bf16 %v4812_v33  ;;  %v4474_v37 = vunpack.c.l.bf16 %v4812_v33  ;;  %v4844_v63 = vld [vmem:[%s6616_s0 + $0x188] sm:$0xff]   ;;  %v4845_v24 = vld [vmem:[%s6616_s0 + $0x190] sm:$0xff]  }
  0x15   :  { %v816_v25 = vsel %vm422_vm0, %v4667_v21, 0.0  ;;  %v813_v26 = vsel %vm422_vm0, %v4666_v22, 0.0  ;;  %v870_v29 = vsel %vm422_vm0, %v4703_v27, 0.0  ;;  %v867_v30 = vsel %vm422_vm0, %v4702_v28, 0.0 }
  0x16   :  { %865 = vadd.xlane.f32.xlu1 %v864_v9  ;;  %571 = vadd.xlane.f32.xlu0 %v570_v10  ;;  %v474_v34 = vsel %vm422_vm0, %v4439_v31, 0.0  ;;  %v471_v35 = vsel %vm422_vm0, %v4438_v32, 0.0  ;;  %v528_v39 = vsel %vm422_vm0, %v4475_v36, 0.0  ;;  %v525_v40 = vsel %vm422_vm0, %v4474_v37, 0.0  ;;  %v4870_v9 = vld [vmem:[%s6616_s0 + $0x258] sm:$0xff]  }
  0x17   :  { %v4635_v41 = vunpack.c.h.bf16 %v4852_v38  ;;  %v4634_v42 = vunpack.c.l.bf16 %v4852_v38  ;;  %v4671_v46 = vunpack.c.h.bf16 %v4861_v43  ;;  %v4670_v47 = vunpack.c.l.bf16 %v4861_v43 }
  0x18   :  { %v4407_v51 = vunpack.c.h.bf16 %v4405_v48  ;;  %v4406_v52 = vunpack.c.l.bf16 %v4405_v48  ;;  %v4443_v56 = vunpack.c.h.bf16 %v4804_v53  ;;  %v4442_v57 = vunpack.c.l.bf16 %v4804_v53 }
  0x19   :  { %v768_v44 = vsel %vm422_vm0, %v4635_v41, 0.0  ;;  %v765_v45 = vsel %vm422_vm0, %v4634_v42, 0.0  ;;  %v822_v49 = vsel %vm422_vm0, %v4671_v46, 0.0  ;;  %v819_v50 = vsel %vm422_vm0, %v4670_v47, 0.0 }
  0x1a   :  { %523 = vadd.xlane.f32.xlu1 %v522_v14  ;;  %520 = vadd.xlane.f32.xlu0 %v519_v15  ;;  %v426_v54 = vsel %vm422_vm0, %v4407_v51, 0.0  ;;  %v423_v55 = vsel %vm422_vm0, %v4406_v52, 0.0  ;;  %v480_v59 = vsel %vm422_vm0, %v4443_v56, 0.0  ;;  %v477_v60 = vsel %vm422_vm0, %v4442_v57, 0.0  ;;  %v4796_v14 = vld [vmem:[%s6616_s0 + $0x8] sm:$0xff]  }
  0x1b   :  { %v4511_v61 = vunpack.c.h.bf16 %v4821_v58  ;;  %v4510_v62 = vunpack.c.l.bf16 %v4821_v58  ;;  %v4603_v2 = vunpack.c.h.bf16 %v4844_v63  ;;  %v4602_v3 = vunpack.c.l.bf16 %v4844_v63 }
  0x1c   :  { %v4639_v7 = vunpack.c.h.bf16 %v4853_v4  ;;  %v4638_v8 = vunpack.c.l.bf16 %v4853_v4  ;;  %v4707_v12 = vunpack.c.h.bf16 %v4870_v9  ;;  %v4706_v13 = vunpack.c.l.bf16 %v4870_v9 }
  0x1d   :  { %v582_v0 = vsel %vm422_vm0, %v4511_v61, 0.0  ;;  %v579_v1 = vsel %vm422_vm0, %v4510_v62, 0.0  ;;  %v720_v5 = vsel %vm422_vm0, %v4603_v2, 0.0  ;;  %v717_v6 = vsel %vm422_vm0, %v4602_v3, 0.0 }
  0x1e   :  { %577 = vadd.xlane.f32.xlu1 %v576_v19  ;;  %574 = vadd.xlane.f32.xlu0 %v573_v20  ;;  %v774_v10 = vsel %vm422_vm0, %v4639_v7, 0.0  ;;  %v771_v11 = vsel %vm422_vm0, %v4638_v8, 0.0  ;;  %v876_v15 = vsel %vm422_vm0, %v4707_v12, 0.0  ;;  %v873_v16 = vsel %vm422_vm0, %v4706_v13, 0.0  ;;  %v4813_v19 = vld [vmem:[%s6616_s0 + $0x90] sm:$0xff]  }
  0x1f   :  { %v4411_v17 = vunpack.c.h.bf16 %v4796_v14  ;;  %v4410_v18 = vunpack.c.l.bf16 %v4796_v14  ;;  %v4479_v22 = vunpack.c.h.bf16 %v4813_v19  ;;  %v4478_v23 = vunpack.c.l.bf16 %v4813_v19 }
  0x20   :  { %v4607_v27 = vunpack.c.h.bf16 %v4845_v24  ;;  %v4606_v28 = vunpack.c.l.bf16 %v4845_v24  ;;  %vm1836_vm2 = vcmask 195712   ;;  %vm1843_vm3 = vcmask 261312  }
  0x21   :  { %v432_v20 = vsel %vm422_vm0, %v4411_v17, 0.0  ;;  %v429_v21 = vsel %vm422_vm0, %v4410_v18, 0.0  ;;  %vm1850_vm4 = vcmask 326912   ;;  %vm1857_vm5 = vcmask 392512  }
  0x22   :  { %817 = vadd.xlane.f32.xlu1 %v816_v25  ;;  %814 = vadd.xlane.f32.xlu0 %v813_v26  ;;  %v534_v25 = vsel %vm422_vm0, %v4479_v22, 0.0  ;;  %v531_v26 = vsel %vm422_vm0, %v4478_v23, 0.0  ;;  %v723_v31 = vsel %vm422_vm0, %v4606_v28, 0.0  ;;  %vm1864_vm6 = vcmask 458112  }
  0x23   :  { %vm1871_vm7 = vcmask 523712   ;;  %vm1878_vm8 = vcmask 589312   ;;  %vm6642_vm9 = vcmask 654912   ;;  %vm1892_vm10 = vcmask 720512  }
  0x24   :  { %vm1899_vm11 = vcmask 786112   ;;  %vm1906_vm12 = vcmask 851712   ;;  %vm1913_vm13 = vcmask 917312   ;;  %vm1920_vm14 = vcmask 982912  }
  0x25   :  { %vm1927_vm15 = vcmask 1048512  }
  0x26   :  { %871 = vadd.xlane.f32.xlu1 %v870_v29  ;;  %868 = vadd.xlane.f32.xlu0 %v867_v30  ;;  %v4862_v29 = vld [vmem:[%s6616_s0 + $0x218] sm:$0xff]   ;;  %v726_v30 = vsel %vm422_vm0, %v4607_v27, 0.0 }
  0x27   :  { %v4675_v32 = vunpack.c.h.bf16 %v4862_v29  ;;  %v4674_v33 = vunpack.c.l.bf16 %v4862_v29 }
  0x29   :  { %v825_v36 = vsel %vm422_vm0, %v4674_v33, 0.0 }
  0x2a   :  { %475 = vadd.xlane.f32.xlu1 %v474_v34  ;;  %472 = vadd.xlane.f32.xlu0 %v471_v35  ;;  %v4805_v34 = vld [vmem:[%s6616_s0 + $0x50] sm:$0xff]   ;;  %v828_v35 = vsel %vm422_vm0, %v4675_v32, 0.0 }
  0x2b   :  { %v4447_v37 = vunpack.c.h.bf16 %v4805_v34  ;;  %v4446_v38 = vunpack.c.l.bf16 %v4805_v34 }
  0x2d   :  { %v483_v41 = vsel %vm422_vm0, %v4446_v38, 0.0 }
  0x2e   :  { %529 = vadd.xlane.f32.xlu1 %v528_v39  ;;  %526 = vadd.xlane.f32.xlu0 %v525_v40  ;;  %v4822_v39 = vld [vmem:[%s6616_s0 + $0xd8] sm:$0xff]   ;;  %v486_v40 = vsel %vm422_vm0, %v4447_v37, 0.0 }
  0x2f   :  { %v4515_v42 = vunpack.c.h.bf16 %v4822_v39  ;;  %v4514_v43 = vunpack.c.l.bf16 %v4822_v39 }
  0x31   :  { %v585_v46 = vsel %vm422_vm0, %v4514_v43, 0.0 }
  0x32   :  { %769 = vadd.xlane.f32.xlu1 %v768_v44  ;;  %766 = vadd.xlane.f32.xlu0 %v765_v45  ;;  %v4854_v44 = vld [vmem:[%s6616_s0 + $0x1d8] sm:$0xff]   ;;  %v588_v45 = vsel %vm422_vm0, %v4515_v42, 0.0 }
  0x33   :  { %v4643_v47 = vunpack.c.h.bf16 %v4854_v44  ;;  %v4642_v48 = vunpack.c.l.bf16 %v4854_v44 }
  0x35   :  { %v777_v51 = vsel %vm422_vm0, %v4642_v48, 0.0 }
  0x36   :  { %823 = vadd.xlane.f32.xlu1 %v822_v49  ;;  %820 = vadd.xlane.f32.xlu0 %v819_v50  ;;  %v4871_v49 = vld [vmem:[%s6616_s0 + $0x260] sm:$0xff]   ;;  %v780_v50 = vsel %vm422_vm0, %v4643_v47, 0.0 }
  0x37   :  { %v4711_v52 = vunpack.c.h.bf16 %v4871_v49  ;;  %v4710_v53 = vunpack.c.l.bf16 %v4871_v49 }
  0x39   :  { %v879_v56 = vsel %vm422_vm0, %v4710_v53, 0.0 }
  0x3a   :  { %427 = vadd.xlane.f32.xlu1 %v426_v54  ;;  %424 = vadd.xlane.f32.xlu0 %v423_v55  ;;  %v4797_v54 = vld [vmem:[%s6616_s0 + $0x10] sm:$0xff]   ;;  %v882_v55 = vsel %vm422_vm0, %v4711_v52, 0.0 }
  0x3b   :  { %v4415_v57 = vunpack.c.h.bf16 %v4797_v54  ;;  %v4414_v58 = vunpack.c.l.bf16 %v4797_v54 }
  0x3d   :  { %v435_v61 = vsel %vm422_vm0, %v4414_v58, 0.0  ;;  %v4824_v58 = vld [vmem:[%s6616_s0 + $0xe8] sm:$0xff]  }
  0x3e   :  { %481 = vadd.xlane.f32.xlu1 %v480_v59  ;;  %478 = vadd.xlane.f32.xlu0 %v477_v60  ;;  %v4814_v59 = vld [vmem:[%s6616_s0 + $0x98] sm:$0xff]   ;;  %v438_v60 = vsel %vm422_vm0, %v4415_v57, 0.0 }
  0x3f   :  { %v4483_v62 = vunpack.c.h.bf16 %v4814_v59  ;;  %v4482_v63 = vunpack.c.l.bf16 %v4814_v59  ;;  %v4523_v59 = vunpack.c.h.bf16 %v4824_v58 }
  0x41   :  { %v537_v2 = vsel %vm422_vm0, %v4482_v63, 0.0 }
  0x42   :  { %583 = vadd.xlane.f32.xlu1 %v582_v0  ;;  %580 = vadd.xlane.f32.xlu0 %v579_v1  ;;  %v4846_v0 = vld [vmem:[%s6616_s0 + $0x198] sm:$0xff]   ;;  %v540_v1 = vsel %vm422_vm0, %v4483_v62, 0.0 }
  0x43   :  { %v4611_v3 = vunpack.c.h.bf16 %v4846_v0  ;;  %v4610_v4 = vunpack.c.l.bf16 %v4846_v0 }
  0x45   :  { %v729_v7 = vsel %vm422_vm0, %v4610_v4, 0.0 }
  0x46   :  { %721 = vadd.xlane.f32.xlu1 %v720_v5  ;;  %718 = vadd.xlane.f32.xlu0 %v717_v6  ;;  %v4863_v5 = vld [vmem:[%s6616_s0 + $0x220] sm:$0xff]   ;;  %v732_v6 = vsel %vm422_vm0, %v4611_v3, 0.0 }
  0x47   :  { %v4679_v8 = vunpack.c.h.bf16 %v4863_v5  ;;  %v4678_v9 = vunpack.c.l.bf16 %v4863_v5 }
  0x49   :  { %v831_v12 = vsel %vm422_vm0, %v4678_v9, 0.0 }
  0x4a   :  { %775 = vadd.xlane.f32.xlu1 %v774_v10  ;;  %772 = vadd.xlane.f32.xlu0 %v771_v11  ;;  %v4806_v10 = vld [vmem:[%s6616_s0 + $0x58] sm:$0xff]   ;;  %v834_v11 = vsel %vm422_vm0, %v4679_v8, 0.0 }
  0x4b   :  { %v4451_v13 = vunpack.c.h.bf16 %v4806_v10  ;;  %v4450_v14 = vunpack.c.l.bf16 %v4806_v10 }
  0x4d   :  { %v489_v17 = vsel %vm422_vm0, %v4450_v14, 0.0  ;;  %v600_v14 = vsel %vm422_vm0, %v4523_v59, 0.0 }
  0x4e   :  { %877 = vadd.xlane.f32.xlu1 %v876_v15  ;;  %874 = vadd.xlane.f32.xlu0 %v873_v16  ;;  %v4823_v15 = vld [vmem:[%s6616_s0 + $0xe0] sm:$0xff]   ;;  %v492_v16 = vsel %vm422_vm0, %v4451_v13, 0.0 }
  0x4f   :  { %v4519_v18 = vunpack.c.h.bf16 %v4823_v15  ;;  %v4518_v19 = vunpack.c.l.bf16 %v4823_v15  ;;  %v4873_v15 = vld [vmem:[%s6616_s0 + $0x270] sm:$0xff]  }
  0x51   :  { %v591_v22 = vsel %vm422_vm0, %v4518_v19, 0.0 }
  0x52   :  { %433 = vadd.xlane.f32.xlu1 %v432_v20  ;;  %430 = vadd.xlane.f32.xlu0 %v429_v21  ;;  %v4855_v20 = vld [vmem:[%s6616_s0 + $0x1e0] sm:$0xff]   ;;  %v594_v21 = vsel %vm422_vm0, %v4519_v18, 0.0 }
  0x53   :  { %v4647_v23 = vunpack.c.h.bf16 %v4855_v20  ;;  %v4646_v24 = vunpack.c.l.bf16 %v4855_v20 }
  0x55   :  { %v783_v27 = vsel %vm422_vm0, %v4646_v24, 0.0  ;;  %v4719_v24 = vunpack.c.h.bf16 %v4873_v15 }
  0x56   :  { %535 = vadd.xlane.f32.xlu1 %v534_v25  ;;  %532 = vadd.xlane.f32.xlu0 %v531_v26  ;;  %v4872_v25 = vld [vmem:[%s6616_s0 + $0x268] sm:$0xff]   ;;  %v786_v26 = vsel %vm422_vm0, %v4647_v23, 0.0 }
  0x57   :  { %v4715_v28 = vunpack.c.h.bf16 %v4872_v25  ;;  %v4714_v29 = vunpack.c.l.bf16 %v4872_v25  ;;  %v4718_v25 = vunpack.c.l.bf16 %v4873_v15 }
  0x59   :  { %v885_v32 = vsel %vm422_vm0, %v4714_v29, 0.0 }
  0x5a   :  { %727 = vadd.xlane.f32.xlu1 %v726_v30  ;;  %724 = vadd.xlane.f32.xlu0 %v723_v31  ;;  %v4798_v30 = vld [vmem:[%s6616_s0 + $0x18] sm:$0xff]   ;;  %v888_v31 = vsel %vm422_vm0, %v4715_v28, 0.0 }
  0x5b   :  { %v4419_v33 = vunpack.c.h.bf16 %v4798_v30  ;;  %v4418_v34 = vunpack.c.l.bf16 %v4798_v30 }
  0x5d   :  { %v441_v37 = vsel %vm422_vm0, %v4418_v34, 0.0 }
  0x5e   :  { %829 = vadd.xlane.f32.xlu1 %v828_v35  ;;  %826 = vadd.xlane.f32.xlu0 %v825_v36  ;;  %v4815_v35 = vld [vmem:[%s6616_s0 + $0xa0] sm:$0xff]   ;;  %v444_v36 = vsel %vm422_vm0, %v4419_v33, 0.0 }
  0x5f   :  { %v4487_v38 = vunpack.c.h.bf16 %v4815_v35  ;;  %v4486_v39 = vunpack.c.l.bf16 %v4815_v35 }
  0x61   :  { %v543_v42 = vsel %vm422_vm0, %v4486_v39, 0.0  ;;  %v894_v39 = vsel %vm422_vm0, %v4719_v24, 0.0 }
  0x62   :  { %487 = vadd.xlane.f32.xlu1 %v486_v40  ;;  %484 = vadd.xlane.f32.xlu0 %v483_v41  ;;  %v4847_v40 = vld [vmem:[%s6616_s0 + $0x1a0] sm:$0xff]   ;;  %v546_v41 = vsel %vm422_vm0, %v4487_v38, 0.0 }
  0x63   :  { %v4615_v43 = vunpack.c.h.bf16 %v4847_v40  ;;  %v4614_v44 = vunpack.c.l.bf16 %v4847_v40 }
  0x65   :  { %v738_v47 = vsel %vm422_vm0, %v4615_v43, 0.0  ;;  %v735_v48 = vsel %vm422_vm0, %v4614_v44, 0.0 }
  0x66   :  { %589 = vadd.xlane.f32.xlu1 %v588_v45  ;;  %586 = vadd.xlane.f32.xlu0 %v585_v46  ;;  %v4864_v45 = vld [vmem:[%s6616_s0 + $0x228] sm:$0xff]  }
  0x67   :  { %v4683_v46 = vunpack.c.h.bf16 %v4864_v45  ;;  %v4682_v49 = vunpack.c.l.bf16 %v4864_v45  ;;  %v891_v45 = vsel %vm422_vm0, %v4718_v25, 0.0 }
  0x69   :  { %v837_v54 = vsel %vm422_vm0, %v4682_v49, 0.0 }
  0x6a   :  { %781 = vadd.xlane.f32.xlu1 %v780_v50  ;;  %778 = vadd.xlane.f32.xlu0 %v777_v51  ;;  %v4807_v50 = vld [vmem:[%s6616_s0 + $0x60] sm:$0xff]   ;;  %v840_v51 = vsel %vm422_vm0, %v4683_v46, 0.0 }
  0x6b   :  { %v4454_v57 = vunpack.c.l.bf16 %v4807_v50 }
  0x6d   :  { %v495_v0 = vsel %vm422_vm0, %v4454_v57, 0.0 }
  0x6e   :  { %883 = vadd.xlane.f32.xlu1 %v882_v55  ;;  %880 = vadd.xlane.f32.xlu0 %v879_v56  ;;  %v1504_v55 = vlaneseq  ;;  %v4455_v56 = vunpack.c.h.bf16 %v4807_v50 }
  0x70   :  { %v498_v63 = vsel %vm422_vm0, %v4455_v56, 0.0 }
  0x72   :  { %439 = vadd.xlane.f32.xlu1 %v438_v60  ;;  %436 = vadd.xlane.f32.xlu0 %v435_v61  ;;  %v5454_v60 = vand.u32 127, %v1504_v55 }
  0x76   :  { %541 = vadd.xlane.f32.xlu1 %v540_v1  ;;  %538 = vadd.xlane.f32.xlu0 %v537_v2  ;;  %v4522_v1 = vunpack.c.l.bf16 %v4824_v58  ;;  %v4856_v2 = vld [vmem:[%s6616_s0 + $0x1e8] sm:$0xff]  }
  0x77   :  { %v4651_v10 = vunpack.c.h.bf16 %v4856_v2 }
  0x79   :  { %v792_v23 = vsel %vm422_vm0, %v4651_v10, 0.0 }
  0x7a   :  { %733 = vadd.xlane.f32.xlu1 %v732_v6  ;;  %730 = vadd.xlane.f32.xlu0 %v729_v7  ;;  %v5461_v7 = vshrl.u32 %v1504_v55, 7 }
  0x7c   :  { %6643 = vst [vmem:[#allocation8_spill] sm:$0xff] %v5461_v7  ;;  %v5473_v18 = vsub.s32 %v5454_v60, %v5461_v7 }
  0x7e   :  { %835 = vadd.xlane.f32.xlu1 %v834_v11  ;;  %832 = vadd.xlane.f32.xlu0 %v831_v12  ;;  %v1824_v11 = vadd.s32 4294967288, %v5454_v60  ;;  %6644 = vst [vmem:[#allocation9_spill] sm:$0xff] %v5473_v18 }
  0x82   :  { %493 = vadd.xlane.f32.xlu1 %v492_v16  ;;  %490 = vadd.xlane.f32.xlu0 %v489_v17  ;;  %v597_v16 = vsel %vm422_vm0, %v4522_v1, 0.0  ;;  %v4650_v17 = vunpack.c.l.bf16 %v4856_v2 }
  0x84   :  { %v789_v35 = vsel %vm422_vm0, %v4650_v17, 0.0 }
  0x86   :  { %595 = vadd.xlane.f32.xlu1 %v594_v21  ;;  %592 = vadd.xlane.f32.xlu0 %v591_v22  ;;  %v1831_v21 = vadd.s32 4294967280, %v5454_v60  ;;  %v1838_v22 = vadd.s32 4294967272, %v5454_v60 }
  0x8a   :  { %787 = vadd.xlane.f32.xlu1 %v786_v26  ;;  %784 = vadd.xlane.f32.xlu0 %v783_v27  ;;  %v5479_v26 = vsub.s32 %v1824_v11, %v5461_v7 }
  0x8c   :  { %6645 = vst [vmem:[#allocation10_spill] sm:$0xff] %v5479_v26 }
  0x8e   :  { %889 = vadd.xlane.f32.xlu1 %v888_v31  ;;  %886 = vadd.xlane.f32.xlu0 %v885_v32  ;;  %v4799_v32 = vld [vmem:[%s6616_s0 + $0x20] sm:$0xff]  }
  0x8f   :  { %v4423_v40 = vunpack.c.h.bf16 %v4799_v32  ;;  %v4422_v46 = vunpack.c.l.bf16 %v4799_v32 }
  0x91   :  { %v450_v59 = vsel %vm422_vm0, %v4423_v40, 0.0 }
  0x92   :  { %445 = vadd.xlane.f32.xlu1 %v444_v36  ;;  %442 = vadd.xlane.f32.xlu0 %v441_v37  ;;  %v5488_v36 = vsub.s32 %v1831_v21, %v5461_v7  ;;  %v5491_v37 = vsub.s32 %v1838_v22, %v5461_v7 }
  0x94   :  { %6646 = vst [vmem:[#allocation11_spill] sm:$0xff] %v5488_v36  ;;  %6647 = vst [vmem:[#allocation12_spill] sm:$0xff] %v5491_v37 }
  0x96   :  { %547 = vadd.xlane.f32.xlu1 %v546_v41  ;;  %544 = vadd.xlane.f32.xlu0 %v543_v42 }
  0x9a   :  { %739 = vadd.xlane.f32.xlu1 %v738_v47  ;;  %736 = vadd.xlane.f32.xlu0 %v735_v48  ;;  %v4816_v47 = vld [vmem:[%s6616_s0 + $0xa8] sm:$0xff]  }
  0x9b   :  { %v863_v52 = vpop.xlane.xlu1 %862  ;;  %v569_v53 = vpop.xlane.xlu0 %568  ;;  %v4491_v55 = vunpack.c.h.bf16 %v4816_v47 }
  0x9c   :  { %v1158_v3 = vmul.f32 0.0625, %v863_v52  ;;  %v1060_v4 = vmul.f32 0.0625, %v569_v53 }
  0x9e   :  { %841 = vadd.xlane.f32.xlu1 %v840_v51  ;;  %838 = vadd.xlane.f32.xlu0 %v837_v54 }
  0x9f   :  { %v866_v61 = vpop.xlane.xlu1 %865  ;;  %v572_v62 = vpop.xlane.xlu0 %571 }
  0xa0   :  { %v1159_v5 = vmul.f32 0.0625, %v866_v61  ;;  %v1061_v6 = vmul.f32 0.0625, %v572_v62  ;;  %v447_v61 = vsel %vm422_vm0, %v4422_v46, 0.0  ;;  %v4490_v62 = vunpack.c.l.bf16 %v4816_v47 }
  0xa2   :  { %v5463_v8 = vpack.c.bf16 %v1159_v5, %v1158_v3  ;;  %v1232_v9 = vpack.c.bf16 %v1061_v6, %v1060_v4  ;;  %499 = vadd.xlane.f32.xlu1 %v498_v63  ;;  %496 = vadd.xlane.f32.xlu0 %v495_v0  ;;  %v4848_v63 = vld [vmem:[%s6616_s0 + $0x1a8] sm:$0xff]  }
  0xa3   :  { %v524_v12 = vpop.xlane.xlu1 %523  ;;  %v521_v13 = vpop.xlane.xlu0 %520  ;;  %v4619_v6 = vunpack.c.h.bf16 %v4848_v63 }
  0xa4   :  { %v1045_v19 = vmul.f32 0.0625, %v524_v12  ;;  %v1044_v20 = vmul.f32 0.0625, %v521_v13  ;;  %v1670_v27 = vunpack.c.l.b16 %v1232_v9  ;;  %v1671_v28 = vunpack.c.h.b16 %v1232_v9 }
  0xa5   :  { %v1768_v0 = vunpack.c.l.b16 %v5463_v8  ;;  %v1769_v1 = vunpack.c.h.b16 %v5463_v8  ;;  %v552_v12 = vsel %vm422_vm0, %v4491_v55, 0.0  ;;  %v549_v13 = vsel %vm422_vm0, %v4490_v62, 0.0  ;;  %v4865_v8 = vld [vmem:[%s6616_s0 + $0x230] sm:$0xff]  }
  0xa6   :  { %601 = vadd.xlane.f32.xlu1 %v600_v14  ;;  %v5481_v29 = vpack.c.bf16 %v1045_v19, %v1044_v20  ;;  %598 = vadd.xlane.f32.xlu0 %v597_v16  ;;  %v2090_v41 = vrot.slane %v1670_v27, %v5473_v18  ;;  %v2094_v42 = vrot.slane %v1671_v28, %v5479_v26  ;;  %v4618_v14 = vunpack.c.l.bf16 %v4848_v63  ;;  %v4808_v27 = vld [vmem:[%s6616_s0 + $0x68] sm:$0xff]   ;;  %v4857_v63 = vld [vmem:[%s6616_s0 + $0x1f0] sm:$0xff]  }
  0xa7   :  { %v578_v30 = vpop.xlane.xlu1 %577  ;;  %v575_v31 = vpop.xlane.xlu0 %574  ;;  %v2573_v15 = vrot.slane %v1768_v0, %v5473_v18  ;;  %v2577_v16 = vrot.slane %v1769_v1, %v5479_v26  ;;  %v4687_v24 = vunpack.c.h.bf16 %v4865_v8  ;;  %v4686_v25 = vunpack.c.l.bf16 %v4865_v8 }
  0xa8   :  { %v1063_v33 = vmul.f32 0.0625, %v578_v30  ;;  %v1062_v34 = vmul.f32 0.0625, %v575_v31  ;;  %v2095_v56 = vsel %vm1829_vm1, %v2094_v42, %v2090_v41  ;;  %v1654_v28 = vunpack.c.l.b16 %v5481_v29 }
  0xa9   :  { %v1655_v30 = vunpack.c.h.b16 %v5481_v29  ;;  %v741_v40 = vsel %vm422_vm0, %v4618_v14, 0.0  ;;  %v4459_v42 = vunpack.c.h.bf16 %v4808_v27  ;;  %v4458_v55 = vunpack.c.l.bf16 %v4808_v27 }
  0xaa   :  { %v1233_v38 = vpack.c.bf16 %v1063_v33, %v1062_v34  ;;  %793 = vadd.xlane.f32.xlu1 %v792_v23  ;;  %790 = vadd.xlane.f32.xlu0 %v789_v35  ;;  %v744_v23 = vsel %vm422_vm0, %v4619_v6, 0.0  ;;  %v2578_v35 = vsel %vm1829_vm1, %v2577_v16, %v2573_v15  ;;  %v4655_v14 = vunpack.c.h.bf16 %v4857_v63 }
  0xab   :  { %v818_v43 = vpop.xlane.xlu1 %817  ;;  %v815_v44 = vpop.xlane.xlu0 %814  ;;  %v4654_v15 = vunpack.c.l.bf16 %v4857_v63 }
  0xac   :  { %v1672_v48 = vunpack.c.l.b16 %v1233_v38  ;;  %v1673_v49 = vunpack.c.h.b16 %v1233_v38  ;;  %v1143_v50 = vmul.f32 0.0625, %v818_v43  ;;  %v1142_v51 = vmul.f32 0.0625, %v815_v44 }
  0xad   :  { %v2011_v44 = vrot.slane %v1654_v28, %v5473_v18  ;;  %v4874_v28 = vld [vmem:[%s6616_s0 + $0x278] sm:$0xff]  }
  0xae   :  { %v2099_v52 = vrot.slane %v1672_v48, %v5488_v36  ;;  %v2104_v53 = vrot.slane %v1673_v49, %v5491_v37  ;;  %v5502_v54 = vpack.c.bf16 %v1143_v50, %v1142_v51  ;;  %895 = vadd.xlane.f32.xlu1 %v894_v39  ;;  %892 = vadd.xlane.f32.xlu0 %v891_v45  ;;  %v846_v48 = vsel %vm422_vm0, %v4687_v24, 0.0  ;;  %v4825_v50 = vld [vmem:[%s6616_s0 + $0xf0] sm:$0xff]  }
  0xaf   :  { %v872_v57 = vpop.xlane.xlu1 %871  ;;  %v869_v58 = vpop.xlane.xlu0 %868  ;;  %v2015_v45 = vrot.slane %v1655_v30, %v5479_v26  ;;  %v843_v49 = vsel %vm422_vm0, %v4686_v25, 0.0  ;;  %v4526_v62 = vunpack.c.l.bf16 %v4825_v50  ;;  %v798_v30 = vsel %vm422_vm0, %v4655_v14, 0.0 }
  0xb0   :  { %v2100_v2 = vsel %vm1836_vm2, %v2099_v52, %v2095_v56  ;;  %v1161_v3 = vmul.f32 0.0625, %v872_v57  ;;  %v1160_v5 = vmul.f32 0.0625, %v869_v58  ;;  %v504_v57 = vsel %vm422_vm0, %v4459_v42, 0.0 }
  0xb1   :  { %v5514_v4 = vsel %vm1843_vm3, %v2104_v53, %v2100_v2  ;;  %v2016_v0 = vsel %vm1829_vm1, %v2015_v45, %v2011_v44  ;;  %v1752_v1 = vunpack.c.l.b16 %v5502_v54  ;;  %v1753_v2 = vunpack.c.h.b16 %v5502_v54 }
  0xb2   :  { %451 = vadd.xlane.f32.xlu1 %v450_v59  ;;  %v1282_v9 = vpack.c.bf16 %v1161_v3, %v1160_v5  ;;  %448 = vadd.xlane.f32.xlu0 %v447_v61  ;;  %v4527_v61 = vunpack.c.h.bf16 %v4825_v50  ;;  %v4723_v42 = vunpack.c.h.bf16 %v4874_v28 }
  0xb3   :  { %v476_v10 = vpop.xlane.xlu1 %475  ;;  %v473_v11 = vpop.xlane.xlu0 %472  ;;  %v2494_v54 = vrot.slane %v1752_v1, %v5473_v18  ;;  %v2498_v16 = vrot.slane %v1753_v2, %v5479_v26 }
  0xb4   :  { %v1029_v17 = vmul.f32 0.0625, %v476_v10  ;;  %v1028_v19 = vmul.f32 0.0625, %v473_v11  ;;  %v1770_v20 = vunpack.c.l.b16 %v1282_v9  ;;  %v1771_v21 = vunpack.c.h.b16 %v1282_v9 }
  0xb6   :  { %v5523_v22 = vpack.c.bf16 %v1029_v17, %v1028_v19  ;;  %553 = vadd.xlane.f32.xlu1 %v552_v12  ;;  %v2582_v31 = vrot.slane %v1770_v20, %v5488_v36  ;;  %v2587_v32 = vrot.slane %v1771_v21, %v5491_v37  ;;  %550 = vadd.xlane.f32.xlu0 %v549_v13  ;;  %v501_v12 = vsel %vm422_vm0, %v4458_v55, 0.0 }
  0xb7   :  { %v530_v33 = vpop.xlane.xlu1 %529  ;;  %v527_v34 = vpop.xlane.xlu0 %526  ;;  %v606_v20 = vsel %vm422_vm0, %v4527_v61, 0.0  ;;  %v603_v21 = vsel %vm422_vm0, %v4526_v62, 0.0 }
  0xb8   :  { %v1047_v38 = vmul.f32 0.0625, %v530_v33  ;;  %v1046_v39 = vmul.f32 0.0625, %v527_v34  ;;  %v2583_v41 = vsel %vm1836_vm2, %v2582_v31, %v2578_v35  ;;  %v795_v34 = vsel %vm422_vm0, %v4654_v15, 0.0 }
  0xb9   :  { %v5537_v43 = vsel %vm1843_vm3, %v2587_v32, %v2583_v41  ;;  %v2499_v35 = vsel %vm1829_vm1, %v2498_v16, %v2494_v54 }
  0xba   :  { %v1225_v29 = vpack.c.bf16 %v1047_v38, %v1046_v39  ;;  %745 = vadd.xlane.f32.xlu1 %v744_v23  ;;  %742 = vadd.xlane.f32.xlu0 %v741_v40  ;;  %v1638_v38 = vunpack.c.l.b16 %v5523_v22  ;;  %v1639_v39 = vunpack.c.h.b16 %v5523_v22  ;;  %v1852_v22 = vadd.s32 4294967256, %v5454_v60 }
  0xbb   :  { %v770_v46 = vpop.xlane.xlu1 %769  ;;  %v767_v47 = vpop.xlane.xlu0 %766 }
  0xbc   :  { %v1656_v51 = vunpack.c.l.b16 %v1225_v29  ;;  %v1657_v52 = vunpack.c.h.b16 %v1225_v29  ;;  %v1127_v53 = vmul.f32 0.0625, %v770_v46  ;;  %v1126_v56 = vmul.f32 0.0625, %v767_v47  ;;  %v4800_v29 = vld [vmem:[%s6616_s0 + $0x28] sm:$0xff]  }
  0xbd   :  { %v1845_v46 = vadd.s32 4294967264, %v5454_v60  ;;  %v4722_v47 = vunpack.c.l.bf16 %v4874_v28  ;;  %v4427_v50 = vunpack.c.h.bf16 %v4800_v29 }
  0xbe   :  { %v2020_v58 = vrot.slane %v1656_v51, %v5488_v36  ;;  %v2025_v59 = vrot.slane %v1657_v52, %v5491_v37  ;;  %847 = vadd.xlane.f32.xlu1 %v846_v48  ;;  %v5555_v3 = vpack.c.bf16 %v1127_v53, %v1126_v56  ;;  %844 = vadd.xlane.f32.xlu0 %v843_v49  ;;  %v4426_v51 = vunpack.c.l.bf16 %v4800_v29 }
  0xbf   :  { %v824_v5 = vpop.xlane.xlu1 %823  ;;  %v821_v6 = vpop.xlane.xlu0 %820  ;;  %v1932_v52 = vrot.slane %v1638_v38, %v5473_v18  ;;  %v1936_v53 = vrot.slane %v1639_v39, %v5479_v26  ;;  %v5594_v62 = vsub.s32 %v1845_v46, %v5461_v7 }
  0xc0   :  { %v2021_v9 = vsel %vm1836_vm2, %v2020_v58, %v2016_v0  ;;  %v1145_v10 = vmul.f32 0.0625, %v824_v5  ;;  %v1144_v11 = vmul.f32 0.0625, %v821_v6  ;;  %v900_v58 = vsel %vm422_vm0, %v4723_v42, 0.0 }
  0xc1   :  { %v5560_v13 = vsel %vm1843_vm3, %v2025_v59, %v2021_v9  ;;  %v4817_v59 = vld [vmem:[%s6616_s0 + $0xb0] sm:$0xff]   ;;  %6648 = vst [vmem:[#allocation13_spill] sm:$0xff] %v5594_v62  ;;  %v897_v0 = vsel %vm422_vm0, %v4722_v47, 0.0  ;;  %v5598_v5 = vsub.s32 %v1852_v22, %v5461_v7  ;;  %v456_v9 = vsel %vm422_vm0, %v4427_v50, 0.0 }
  0xc2   :  { %v1274_v8 = vpack.c.bf16 %v1145_v10, %v1144_v11  ;;  %505 = vadd.xlane.f32.xlu1 %v504_v57  ;;  %502 = vadd.xlane.f32.xlu0 %v501_v12  ;;  %v453_v10 = vsel %vm422_vm0, %v4426_v51, 0.0  ;;  %v4495_v11 = vunpack.c.h.bf16 %v4817_v59  ;;  %v1937_v12 = vsel %vm1829_vm1, %v1936_v53, %v1932_v52  ;;  %v4901_v22 = vld [vmem:[#allocation2 + $0x2e0] ss:$16 sps:$4 sm:$0xff]  }
  0xc3   :  { %v428_v17 = vpop.xlane.xlu1 %427  ;;  %v425_v19 = vpop.xlane.xlu0 %424  ;;  %6649 = vst [vmem:[#allocation14_spill] sm:$0xff] %v5598_v5  ;;  %v4494_v16 = vunpack.c.l.bf16 %v4817_v59 }
  0xc4   :  { %v1754_v23 = vunpack.c.l.b16 %v1274_v8  ;;  %v1755_v24 = vunpack.c.h.b16 %v1274_v8  ;;  %v1013_v25 = vmul.f32 0.0625, %v428_v17  ;;  %v1012_v27 = vmul.f32 0.0625, %v425_v19 }
  0xc5   :  { %v558_v38 = vsel %vm422_vm0, %v4495_v11, 0.0  ;;  %v555_v42 = vsel %vm422_vm0, %v4494_v16, 0.0 }
  0xc6   :  { %v2503_v31 = vrot.slane %v1754_v23, %v5488_v36  ;;  %v2508_v32 = vrot.slane %v1755_v24, %v5491_v37  ;;  %v5572_v33 = vpack.c.bf16 %v1013_v25, %v1012_v27  ;;  %607 = vadd.xlane.f32.xlu1 %v606_v20  ;;  %604 = vadd.xlane.f32.xlu0 %v603_v21  ;;  %v4849_v23 = vld [vmem:[%s6616_s0 + $0x1b0] sm:$0xff]   ;;  %v1736_v24 = vunpack.c.l.b16 %v5555_v3 }
  0xc7   :  { %v482_v40 = vpop.xlane.xlu1 %481  ;;  %v479_v41 = vpop.xlane.xlu0 %478  ;;  %v1737_v25 = vunpack.c.h.b16 %v5555_v3  ;;  %v4623_v39 = vunpack.c.h.bf16 %v4849_v23  ;;  %v4622_v29 = vunpack.c.l.bf16 %v4849_v23 }
  0xc8   :  { %v2504_v44 = vsel %vm1836_vm2, %v2503_v31, %v2499_v35  ;;  %v1031_v45 = vmul.f32 0.0625, %v482_v40  ;;  %v1030_v49 = vmul.f32 0.0625, %v479_v41  ;;  %v2415_v50 = vrot.slane %v1736_v24, %v5473_v18 }
  0xc9   :  { %v5584_v48 = vsel %vm1843_vm3, %v2508_v32, %v2504_v44  ;;  %v4899_v44 = vld [vmem:[#allocation2 + $0x2e4] ss:$16 sps:$4 sm:$0xff]   ;;  %v2419_v51 = vrot.slane %v1737_v25, %v5479_v26  ;;  %v747_v59 = vsel %vm422_vm0, %v4622_v29, 0.0 }
  0xca   :  { %799 = vadd.xlane.f32.xlu1 %v798_v30  ;;  %v1217_v55 = vpack.c.bf16 %v1031_v45, %v1030_v49  ;;  %796 = vadd.xlane.f32.xlu0 %v795_v34  ;;  %v4866_v34 = vld [vmem:[%s6616_s0 + $0x238] sm:$0xff]   ;;  %v4905_v25 = vld [vmem:[#allocation2 + $0x2a4] ss:$16 sps:$4 sm:$0xff]  }
  0xcb   :  { %v584_v56 = vpop.xlane.xlu1 %583  ;;  %v581_v57 = vpop.xlane.xlu0 %580  ;;  %v4691_v47 = vunpack.c.h.bf16 %v4866_v34  ;;  %v4690_v49 = vunpack.c.l.bf16 %v4866_v34  ;;  %3861 = vmatprep.subr.bf16.mxu1 %v4899_v44  ;;  %v4907_v34 = vld [vmem:[#allocation2 + $0x2a0] ss:$16 sps:$4 sm:$0xff]  }
  0xcc   :  { %v1065_v61 = vmul.f32 0.0625, %v584_v56  ;;  %v1064_v63 = vmul.f32 0.0625, %v581_v57  ;;  %v1640_v1 = vunpack.c.l.b16 %v1217_v55  ;;  %v1641_v2 = vunpack.c.h.b16 %v1217_v55  ;;  %v4809_v56 = vld [vmem:[%s6616_s0 + $0x70] sm:$0xff]   ;;  %3862 = vmatpush1.bf16.msra.mxu1 %v4901_v22 }
  0xcd   :  { %v750_v55 = vsel %vm422_vm0, %v4623_v39, 0.0  ;;  %v4463_v11 = vunpack.c.h.bf16 %v4809_v56 }
  0xce   :  { %v1234_v6 = vpack.c.bf16 %v1065_v61, %v1064_v63  ;;  %901 = vadd.xlane.f32.xlu1 %v900_v58  ;;  %v1941_v14 = vrot.slane %v1640_v1, %v5488_v36  ;;  %v1946_v8 = vrot.slane %v1641_v2, %v5491_v37  ;;  %898 = vadd.xlane.f32.xlu0 %v897_v0  ;;  %v4902_v61 = vld [vmem:[#allocation2 + $0x2c4] ss:$16 sps:$4 sm:$0xff]   ;;  %v852_v1 = vsel %vm422_vm0, %v4691_v47, 0.0 }
  0xcf   :  { %v722_v15 = vpop.xlane.xlu1 %721  ;;  %v719_v54 = vpop.xlane.xlu0 %718  ;;  %v849_v2 = vsel %vm422_vm0, %v4690_v49, 0.0  ;;  %3863 = vmatprep.subr.bf16.mxu1 %v4902_v61  ;;  %v510_v29 = vsel %vm422_vm0, %v4463_v11, 0.0 }
  0xd0   :  { %v1674_v17 = vunpack.c.l.b16 %v1234_v6  ;;  %v1675_v19 = vunpack.c.h.b16 %v1234_v6  ;;  %v1111_v20 = vmul.f32 0.0625, %v722_v15  ;;  %v1110_v21 = vmul.f32 0.0625, %v719_v54  ;;  %v4904_v6 = vld [vmem:[#allocation2 + $0x2c0] ss:$16 sps:$4 sm:$0xff]  }
  0xd1   :  { %v1942_v27 = vsel %vm1836_vm2, %v1941_v14, %v1937_v12  ;;  %v4462_v12 = vunpack.c.l.bf16 %v4809_v56  ;;  %v4826_v14 = vld [vmem:[%s6616_s0 + $0xf8] sm:$0xff]   ;;  %v1623_v15 = vunpack.c.h.b16 %v5572_v33  ;;  %3864 = vmatpush1.bf16.msra.mxu1 %v4904_v6  ;;  %v4875_v56 = vld [vmem:[%s6616_s0 + $0x280] sm:$0xff]  }
  0xd2   :  { %v5612_v28 = vsel %vm1843_vm3, %v1946_v8, %v1942_v27  ;;  %v2109_v30 = vrot.slane %v1674_v17, %v5594_v62  ;;  %v2114_v31 = vrot.slane %v1675_v19, %v5598_v5  ;;  %v5616_v32 = vpack.c.bf16 %v1111_v20, %v1110_v21  ;;  %457 = vadd.xlane.f32.xlu1 %v456_v9 }
  0xd3   :  { %454 = vadd.xlane.f32.xlu0 %v453_v10  ;;  %v776_v35 = vpop.xlane.xlu1 %775  ;;  %v773_v3 = vpop.xlane.xlu0 %772  ;;  %v2420_v9 = vsel %vm1829_vm1, %v2419_v51, %v2415_v50  ;;  %v1622_v8 = vunpack.c.l.b16 %v5572_v33  ;;  %v507_v44 = vsel %vm422_vm0, %v4462_v12, 0.0  ;;  %3865 = vmatprep.subr.bf16.mxu1 %v4905_v25  ;;  %v4908_v51 = vld [vmem:[#allocation2 + $0x284] ss:$16 sps:$4 sm:$0xff]  }
  0xd4   :  { %v2110_v40 = vsel %vm1850_vm4, %v2109_v30, %v5514_v4  ;;  %v1129_v41 = vmul.f32 0.0625, %v776_v35  ;;  %v1128_v46 = vmul.f32 0.0625, %v773_v3  ;;  %v4531_v30 = vunpack.c.h.bf16 %v4826_v14 }
  0xd5   :  { %v5626_v45 = vsel %vm1857_vm5, %v2114_v31, %v2110_v40  ;;  %v4530_v31 = vunpack.c.l.bf16 %v4826_v14  ;;  %v1823_v39 = vrot.slane %v1622_v8, %v5473_v18  ;;  %v1828_v40 = vrot.slane %v1623_v15, %v5479_v26  ;;  %3866 = vmatpush1.bf16.msra.mxu1 %v4907_v34  ;;  %v4911_v8 = vld [vmem:[#allocation2 + $0xe4] ss:$16 sps:$4 sm:$0xff]  }
  0xd6   :  { %559 = vadd.xlane.f32.xlu1 %v558_v38  ;;  %v1266_v52 = vpack.c.bf16 %v1129_v41, %v1128_v46  ;;  %v4858_v46 = vld [vmem:[%s6616_s0 + $0x1f8] sm:$0xff]   ;;  %3867 = vmatprep.subr.bf16.mxu1 %v4908_v51  ;;  %v4727_v14 = vunpack.c.h.bf16 %v4875_v56  ;;  %v4913_v15 = vld [vmem:[#allocation2 + $0x264] ss:$16 sps:$4 sm:$0xff]  }
  0xd7   :  { %556 = vadd.xlane.f32.xlu0 %v555_v42  ;;  %v878_v4 = vpop.xlane.xlu1 %877  ;;  %v875_v53 = vpop.xlane.xlu0 %874  ;;  %v4659_v61 = vunpack.c.h.bf16 %v4858_v46  ;;  %3820 = vmatprep.subr.bf16.mxu0 %v4911_v8 }
  0xd8   :  { %v1163_v57 = vmul.f32 0.0625, %v878_v4  ;;  %v1162_v58 = vmul.f32 0.0625, %v875_v53  ;;  %v1738_v63 = vunpack.c.l.b16 %v1266_v52  ;;  %v1739_v0 = vunpack.c.h.b16 %v1266_v52 }
  0xd9   :  { %v612_v53 = vsel %vm422_vm0, %v4531_v30, 0.0 }
  0xda   :  { %v1283_v10 = vpack.c.bf16 %v1163_v57, %v1162_v58  ;;  %751 = vadd.xlane.f32.xlu1 %v750_v55  ;;  %v2424_v54 = vrot.slane %v1738_v63, %v5488_v36  ;;  %v2429_v16 = vrot.slane %v1739_v0, %v5491_v37  ;;  %v609_v55 = vsel %vm422_vm0, %v4530_v31, 0.0  ;;  %v4910_v57 = vld [vmem:[#allocation2 + $0x280] ss:$16 sps:$4 sm:$0xff]  }
  0xdb   :  { %748 = vadd.xlane.f32.xlu0 %v747_v59  ;;  %v434_v17 = vpop.xlane.xlu1 %433  ;;  %v431_v19 = vpop.xlane.xlu0 %430  ;;  %v1830_v63 = vsel %vm1829_vm1, %v1828_v40, %v1823_v39  ;;  %v1721_v0 = vunpack.c.h.b16 %v5616_v32  ;;  %3868 = vmatpush1.bf16.msra.mxu1 %v4910_v57  ;;  %v1859_v57 = vadd.s32 4294967248, %v5454_v60 }
  0xdc   :  { %v1772_v20 = vunpack.c.l.b16 %v1283_v10  ;;  %v1773_v21 = vunpack.c.h.b16 %v1283_v10  ;;  %v1015_v23 = vmul.f32 0.0625, %v434_v17  ;;  %v1014_v24 = vmul.f32 0.0625, %v431_v19  ;;  %3869 = vmatprep.subr.bf16.mxu1 %v4913_v15 }
  0xdd   :  { %v2425_v27 = vsel %vm1836_vm2, %v2424_v54, %v2420_v9  ;;  %v4658_v9 = vunpack.c.l.bf16 %v4858_v46  ;;  %v4726_v19 = vunpack.c.l.bf16 %v4875_v56  ;;  %v2340_v25 = vrot.slane %v1721_v0, %v5479_v26 }
  0xde   :  { %v5647_v33 = vsel %vm1843_vm3, %v2429_v16, %v2425_v27  ;;  %v2592_v35 = vrot.slane %v1772_v20, %v5594_v62  ;;  %v2597_v3 = vrot.slane %v1773_v21, %v5598_v5  ;;  %v1209_v38 = vpack.c.bf16 %v1015_v23, %v1014_v24  ;;  %853 = vadd.xlane.f32.xlu1 %v852_v1  ;;  %v4916_v20 = vld [vmem:[#allocation2 + $0x260] ss:$16 sps:$4 sm:$0xff]  }
  0xdf   :  { %850 = vadd.xlane.f32.xlu0 %v849_v2  ;;  %v536_v41 = vpop.xlane.xlu1 %535  ;;  %v533_v42 = vpop.xlane.xlu0 %532  ;;  %v804_v24 = vsel %vm422_vm0, %v4659_v61, 0.0  ;;  %3870 = vmatpush1.bf16.msra.mxu1 %v4916_v20  ;;  %v906_v46 = vsel %vm422_vm0, %v4727_v14, 0.0  ;;  %v4928_v14 = vld [vmem:[#allocation2 + $0x220] ss:$16 sps:$4 sm:$0xff]  }
  0xe0   :  { %v2593_v47 = vsel %vm1850_vm4, %v2592_v35, %v5537_v43  ;;  %v1624_v49 = vunpack.c.l.b16 %v1209_v38  ;;  %v1625_v22 = vunpack.c.h.b16 %v1209_v38  ;;  %v1049_v50 = vmul.f32 0.0625, %v536_v41 }
  0xe1   :  { %v5661_v52 = vsel %vm1857_vm5, %v2597_v3, %v2593_v47  ;;  %v1048_v4 = vmul.f32 0.0625, %v533_v42  ;;  %v1720_v43 = vunpack.c.l.b16 %v5616_v32  ;;  %v4915_v32 = vld [vmem:[#allocation2 + $0xe0] ss:$16 sps:$4 sm:$0xff]   ;;  %v801_v35 = vsel %vm422_vm0, %v4658_v9, 0.0  ;;  %v4917_v42 = vld [vmem:[#allocation2 + $0xc4] ss:$16 sps:$4 sm:$0xff]  }
  0xe2   :  { %v1835_v58 = vrot.slane %v1624_v49, %v5488_v36  ;;  %v1842_v59 = vrot.slane %v1625_v22, %v5491_v37  ;;  %511 = vadd.xlane.f32.xlu1 %v510_v29  ;;  %v4801_v3 = vld [vmem:[%s6616_s0 + $0x30] sm:$0xff]   ;;  %3821 = vmatpush1.bf16.msra.mxu0 %v4915_v32  ;;  %v903_v47 = vsel %vm422_vm0, %v4726_v19, 0.0 }
  0xe3   :  { %v1226_v1 = vpack.c.bf16 %v1049_v50, %v1048_v4  ;;  %508 = vadd.xlane.f32.xlu0 %v507_v44  ;;  %v728_v2 = vpop.xlane.xlu1 %727  ;;  %v725_v6 = vpop.xlane.xlu0 %724  ;;  %v2336_v21 = vrot.slane %v1720_v43, %v5473_v18  ;;  %v4919_v29 = vld [vmem:[#allocation2 + $0x244] ss:$16 sps:$4 sm:$0xff]   ;;  %v4921_v49 = vld [vmem:[#allocation2 + $0xc0] ss:$16 sps:$4 sm:$0xff]   ;;  %v4431_v43 = vunpack.c.h.bf16 %v4801_v3  ;;  %3822 = vmatprep.subr.bf16.mxu0 %v4917_v42 }
  0xe4   :  { %v1837_v10 = vsel %vm1836_vm2, %v1835_v58, %v1830_v63  ;;  %v1113_v11 = vmul.f32 0.0625, %v728_v2  ;;  %v1112_v12 = vmul.f32 0.0625, %v725_v6  ;;  %v4922_v22 = vld [vmem:[#allocation2 + $0x240] ss:$16 sps:$4 sm:$0xff]   ;;  %v4430_v58 = vunpack.c.l.bf16 %v4801_v3  ;;  %3871 = vmatprep.subr.bf16.mxu1 %v4919_v29  ;;  %v4923_v2 = vld [vmem:[#allocation2 + $0xa4] ss:$16 sps:$4 sm:$0xff]  }
  0xe5   :  { %v5675_v54 = vsel %vm1843_vm3, %v1842_v59, %v1837_v10  ;;  %v1658_v16 = vunpack.c.l.b16 %v1226_v1  ;;  %v1659_v17 = vunpack.c.h.b16 %v1226_v1  ;;  %v4818_v59 = vld [vmem:[%s6616_s0 + $0xb8] sm:$0xff]   ;;  %v4925_v6 = vld [vmem:[#allocation2 + $0x224] ss:$16 sps:$4 sm:$0xff]   ;;  %3872 = vmatpush1.bf16.msra.mxu1 %v4922_v22 }
  0xe6   :  { %v1258_v23 = vpack.c.bf16 %v1113_v11, %v1112_v12  ;;  %613 = vadd.xlane.f32.xlu1 %v612_v53  ;;  %3823 = vmatpush1.bf16.msra.mxu0 %v4921_v49  ;;  %v1866_v11 = vadd.s32 4294967240, %v5454_v60  ;;  %v4927_v12 = vld [vmem:[#allocation2 + $0xa0] ss:$16 sps:$4 sm:$0xff]  }
  0xe7   :  { %v2030_v27 = vrot.slane %v1658_v16, %v5594_v62  ;;  %v2035_v30 = vrot.slane %v1659_v17, %v5598_v5  ;;  %610 = vadd.xlane.f32.xlu0 %v609_v55  ;;  %v830_v31 = vpop.xlane.xlu1 %829  ;;  %v827_v34 = vpop.xlane.xlu0 %826  ;;  %v2341_v55 = vsel %vm1829_vm1, %v2340_v25, %v2336_v21  ;;  %v4499_v16 = vunpack.c.h.bf16 %v4818_v59  ;;  %3824 = vmatprep.subr.bf16.mxu0 %v4923_v2 }
  0xe8   :  { %v1722_v38 = vunpack.c.l.b16 %v1258_v23  ;;  %v1723_v39 = vunpack.c.h.b16 %v1258_v23  ;;  %v1147_v40 = vmul.f32 0.0625, %v830_v31  ;;  %v1146_v41 = vmul.f32 0.0625, %v827_v34  ;;  %3873 = vmatprep.subr.bf16.mxu1 %v4925_v6  ;;  %v4929_v31 = vld [vmem:[#allocation2 + $0x84] ss:$16 sps:$4 sm:$0xff]  }
  0xe9   :  { %v2031_v44 = vsel %vm1850_vm4, %v2030_v27, %v5560_v13  ;;  %v4498_v17 = vunpack.c.l.bf16 %v4818_v59  ;;  %v462_v21 = vsel %vm422_vm0, %v4431_v43, 0.0  ;;  %v459_v23 = vsel %vm422_vm0, %v4430_v58, 0.0  ;;  %v4931_v34 = vld [vmem:[#allocation2 + $0x204] ss:$16 sps:$4 sm:$0xff]   ;;  %3874 = vmatpush1.bf16.msra.mxu1 %v4928_v14 }
  0xea   :  { %v5691_v50 = vsel %vm1857_vm5, %v2035_v30, %v2031_v44  ;;  %v2345_v51 = vrot.slane %v1722_v38, %v5488_v36  ;;  %v2350_v4 = vrot.slane %v1723_v39, %v5491_v37  ;;  %v1275_v53 = vpack.c.bf16 %v1147_v40, %v1146_v41  ;;  %805 = vadd.xlane.f32.xlu1 %v804_v24  ;;  %v4850_v24 = vld [vmem:[%s6616_s0 + $0x1b8] sm:$0xff]   ;;  %v4933_v40 = vld [vmem:[#allocation2 + $0x80] ss:$16 sps:$4 sm:$0xff]   ;;  %v4935_v43 = vld [vmem:[#allocation2 + $0x64] ss:$16 sps:$4 sm:$0xff]  }
  0xeb   :  { %802 = vadd.xlane.f32.xlu0 %v801_v35  ;;  %v488_v56 = vpop.xlane.xlu1 %487  ;;  %v485_v13 = vpop.xlane.xlu0 %484  ;;  %3825 = vmatpush1.bf16.msra.mxu0 %v4927_v12  ;;  %v5718_v39 = vsub.s32 %v1859_v57, %v5461_v7  ;;  %v4934_v41 = vld [vmem:[#allocation2 + $0x200] ss:$16 sps:$4 sm:$0xff]   ;;  %v5721_v42 = vsub.s32 %v1866_v11, %v5461_v7  ;;  %v564_v29 = vsel %vm422_vm0, %v4499_v16, 0.0  ;;  %v561_v44 = vsel %vm422_vm0, %v4498_v17, 0.0  ;;  %v4937_v58 = vld [vmem:[#allocation2 + $0x3e4] ss:$16 sps:$4 sm:$0xff]  }
  0xec   :  { %v2346_v61 = vsel %vm1836_vm2, %v2345_v51, %v2341_v55  ;;  %v1756_v63 = vunpack.c.l.b16 %v1275_v53  ;;  %v1757_v0 = vunpack.c.h.b16 %v1275_v53  ;;  %v1033_v1 = vmul.f32 0.0625, %v488_v56  ;;  %3826 = vmatprep.subr.bf16.mxu0 %v4929_v31  ;;  %v4867_v53 = vld [vmem:[%s6616_s0 + $0x240] sm:$0xff]   ;;  %3875 = vmatprep.subr.bf16.mxu1 %v4931_v34 }
  0xed   :  { %v5702_v9 = vsel %vm1843_vm3, %v2350_v4, %v2346_v61  ;;  %v1032_v10 = vmul.f32 0.0625, %v485_v13  ;;  %6650 = vst [vmem:[#allocation15_spill] sm:$0xff] %v5718_v39  ;;  %6651 = vst [vmem:[#allocation16_spill] sm:$0xff] %v5721_v42  ;;  %v4627_v51 = vunpack.c.h.bf16 %v4850_v24  ;;  %v4626_v4 = vunpack.c.l.bf16 %v4850_v24  ;;  %3876 = vmatpush1.bf16.msra.mxu1 %v4934_v41  ;;  %v4939_v61 = vld [vmem:[#allocation2 + $0x60] ss:$16 sps:$4 sm:$0xff]  }
  0xee   :  { %v2513_v8 = vrot.slane %v1756_v63, %v5594_v62  ;;  %v2518_v15 = vrot.slane %v1757_v0, %v5598_v5  ;;  %907 = vadd.xlane.f32.xlu1 %v906_v46  ;;  %v4940_v63 = vld [vmem:[#allocation2 + $0x3e0] ss:$16 sps:$4 sm:$0xff]   ;;  %v4695_v14 = vunpack.c.h.bf16 %v4867_v53  ;;  %3877 = vmatprep.subr.bf16.mxu1 %v4937_v58 }
  0xef   :  { %v1218_v19 = vpack.c.bf16 %v1033_v1, %v1032_v10  ;;  %904 = vadd.xlane.f32.xlu0 %v903_v47  ;;  %v590_v32 = vpop.xlane.xlu1 %589  ;;  %v587_v20 = vpop.xlane.xlu0 %586  ;;  %3827 = vmatpush1.bf16.msra.mxu0 %v4933_v40  ;;  %v756_v12 = vsel %vm422_vm0, %v4627_v51, 0.0  ;;  %v4946_v34 = vld [vmem:[#allocation2 + $0x3c0] ss:$16 sps:$4 sm:$0xff]  }
  0xf0   :  { %v2514_v25 = vsel %vm1850_vm4, %v2513_v8, %v5584_v48  ;;  %v1067_v27 = vmul.f32 0.0625, %v590_v32  ;;  %v1066_v30 = vmul.f32 0.0625, %v587_v20  ;;  %v4694_v8 = vunpack.c.l.bf16 %v4867_v53  ;;  %3828 = vmatprep.subr.bf16.mxu0 %v4935_v43  ;;  %v4941_v20 = vld [vmem:[#allocation2 + $0x44] ss:$16 sps:$4 sm:$0xff]   ;;  %v4952_v43 = vld [vmem:[#allocation2 + $0x3a0] ss:$16 sps:$4 sm:$0xff]  }
  0xf1   :  { %v5715_v35 = vsel %vm1857_vm5, %v2518_v15, %v2514_v25  ;;  %v1642_v3 = vunpack.c.l.b16 %v1218_v19  ;;  %v1643_v38 = vunpack.c.h.b16 %v1218_v19  ;;  %v4810_v15 = vld [vmem:[%s6616_s0 + $0x78] sm:$0xff]   ;;  %3878 = vmatpush2.bf16.msra.mxu1 %v4940_v63  ;;  %v4945_v25 = vld [vmem:[#allocation2 + $0x40] ss:$16 sps:$4 sm:$0xff]   ;;  %v858_v41 = vsel %vm422_vm0, %v4695_v14, 0.0  ;;  %v4949_v53 = vld [vmem:[#allocation2 + $0x3a4] ss:$16 sps:$4 sm:$0xff]  }
  0xf2   :  { %v1235_v48 = vpack.c.bf16 %v1067_v27, %v1066_v30  ;;  %463 = vadd.xlane.f32.xlu1 %v462_v21  ;;  %v4943_v21 = vld [vmem:[#allocation2 + $0x3c4] ss:$16 sps:$4 sm:$0xff]   ;;  %v4467_v31 = vunpack.c.h.bf16 %v4810_v15 }
  0xf3   :  { %v1951_v46 = vrot.slane %v1642_v3, %v5594_v62  ;;  %v1956_v47 = vrot.slane %v1643_v38, %v5598_v5  ;;  %460 = vadd.xlane.f32.xlu0 %v459_v23  ;;  %v782_v49 = vpop.xlane.xlu1 %781  ;;  %v779_v22 = vpop.xlane.xlu0 %778  ;;  %3829 = vmatpush1.bf16.msra.mxu0 %v4939_v61  ;;  %v4955_v14 = vld [vmem:[#allocation2 + $0x384] ss:$16 sps:$4 sm:$0xff]  }
  0xf4   :  { %v1676_v55 = vunpack.c.l.b16 %v1235_v48  ;;  %v1677_v56 = vunpack.c.h.b16 %v1235_v48  ;;  %v1131_v13 = vmul.f32 0.0625, %v782_v49  ;;  %v1130_v57 = vmul.f32 0.0625, %v779_v22  ;;  %3830 = vmatprep.subr.bf16.mxu0 %v4941_v20  ;;  %3879 = vmatprep.subr.bf16.mxu1 %v4943_v21  ;;  %v4947_v49 = vld [vmem:[#allocation2 + $0x24] ss:$16 sps:$4 sm:$0xff]  }
  0xf5   :  { %v1952_v59 = vsel %vm1850_vm4, %v1951_v46, %v5612_v28  ;;  %v753_v28 = vsel %vm422_vm0, %v4626_v4, 0.0  ;;  %v855_v46 = vsel %vm422_vm0, %v4694_v8, 0.0  ;;  %3880 = vmatpush2.bf16.msra.mxu1 %v4946_v34 }
  0xf6   :  { %v5733_v0 = vsel %vm1857_vm5, %v1956_v47, %v1952_v59  ;;  %v2119_v1 = vrot.slane %v1676_v55, %v5718_v39  ;;  %v2124_v2 = vrot.slane %v1677_v56, %v5721_v42  ;;  %v1267_v6 = vpack.c.bf16 %v1131_v13, %v1130_v57  ;;  %565 = vadd.xlane.f32.xlu1 %v564_v29  ;;  %v4859_v47 = vld [vmem:[%s6616_s0 + $0x200] sm:$0xff]   ;;  %v4802_v57 = vld [vmem:[%s6616_s0 + $0x38] sm:$0xff]  }
  0xf7   :  { %562 = vadd.xlane.f32.xlu0 %v561_v44  ;;  %v884_v10 = vpop.xlane.xlu1 %883  ;;  %v881_v11 = vpop.xlane.xlu0 %880  ;;  %3831 = vmatpush1.bf16.msra.mxu0 %v4945_v25  ;;  %v4951_v55 = vld [vmem:[#allocation2 + $0x20] ss:$16 sps:$4 sm:$0xff]  }
  0xf8   :  { %v2120_v16 = vsel %vm1864_vm6, %v2119_v1, %v5626_v45  ;;  %v1740_v17 = vunpack.c.l.b16 %v1267_v6  ;;  %v1741_v19 = vunpack.c.h.b16 %v1267_v6  ;;  %v1165_v32 = vmul.f32 0.0625, %v884_v10  ;;  %3832 = vmatprep.subr.bf16.mxu0 %v4947_v49  ;;  %3881 = vmatprep.subr.bf16.mxu1 %v4949_v53 }
  0xf9   :  { %v5745_v23 = vsel %vm1871_vm7, %v2124_v2, %v2120_v16  ;;  %v1164_v24 = vmul.f32 0.0625, %v881_v11  ;;  %v4466_v45 = vunpack.c.l.bf16 %v4810_v15  ;;  %v4663_v1 = vunpack.c.h.bf16 %v4859_v47  ;;  %3882 = vmatpush2.bf16.msra.mxu1 %v4952_v43  ;;  %v4957_v16 = vld [vmem:[#allocation2] ss:$16 sps:$4 sm:$0xff]  }
  0xfa   :  { %v2434_v27 = vrot.slane %v1740_v17, %v5594_v62  ;;  %v2439_v30 = vrot.slane %v1741_v19, %v5598_v5  ;;  %757 = vadd.xlane.f32.xlu1 %v756_v12  ;;  %v4662_v2 = vunpack.c.l.bf16 %v4859_v47  ;;  %v4435_v15 = vunpack.c.h.bf16 %v4802_v57  ;;  %v4958_v17 = vld [vmem:[#allocation2 + $0x380] ss:$16 sps:$4 sm:$0xff]   ;;  %3883 = vmatprep.subr.bf16.mxu1 %v4955_v14 }
  0xfb   :  { %v1284_v3 = vpack.c.bf16 %v1165_v32, %v1164_v24  ;;  %754 = vadd.xlane.f32.xlu0 %v753_v28  ;;  %v440_v38 = vpop.xlane.xlu1 %439  ;;  %v437_v40 = vpop.xlane.xlu0 %436  ;;  %v513_v13 = vsel %vm422_vm0, %v4466_v45, 0.0  ;;  %3833 = vmatpush1.bf16.msra.mxu0 %v4951_v55  ;;  %v4953_v28 = vld [vmem:[#allocation2 + $0x4] ss:$16 sps:$4 sm:$0xff]  }
  0xfc   :  { %v2435_v48 = vsel %vm1850_vm4, %v2434_v27, %v5647_v33  ;;  %v1017_v29 = vmul.f32 0.0625, %v440_v38  ;;  %v1016_v44 = vmul.f32 0.0625, %v437_v40  ;;  %v516_v33 = vsel %vm422_vm0, %v4467_v31, 0.0  ;;  %3834 = vmatprep.subr.bf16.mxu0 %v4953_v28  ;;  %v4851_v38 = vld [vmem:[%s6616_s0 + $0x1c0] sm:$0xff]  }
  0xfd   :  { %v5757_v22 = vsel %vm1857_vm5, %v2439_v30, %v2435_v48  ;;  %v1774_v51 = vunpack.c.l.b16 %v1284_v3  ;;  %v1775_v4 = vunpack.c.h.b16 %v1284_v3  ;;  %v810_v27 = vsel %vm422_vm0, %v4663_v1, 0.0  ;;  %v4959_v40 = vld [vmem:[#allocation2 + $0x1e4] ss:$16 sps:$4 sm:$0xff]   ;;  %3884 = vmatpush2.bf16.msra.mxu1 %v4958_v17 }
  0xfe   :  { %v1210_v56 = vpack.c.bf16 %v1017_v29, %v1016_v44  ;;  %859 = vadd.xlane.f32.xlu1 %v858_v41  ;;  %v4434_v30 = vunpack.c.l.bf16 %v4802_v57  ;;  %v4961_v41 = vld [vmem:[#allocation2 + $0x364] ss:$16 sps:$4 sm:$0xff]  }
  0xff   :  { %v2602_v58 = vrot.slane %v1774_v51, %v5718_v39  ;;  %v2607_v59 = vrot.slane %v1775_v4, %v5721_v42  ;;  %856 = vadd.xlane.f32.xlu0 %v855_v46  ;;  %v542_v61 = vpop.xlane.xlu1 %541  ;;  %v539_v63 = vpop.xlane.xlu0 %538  ;;  %3835 = vmatpush1.bf16.msra.mxu0 %v4957_v16  ;;  %v4843_v44 = vld [vmem:[%s6616_s0 + $0x180] sm:$0xff]   ;;  %v468_v51 = vsel %vm422_vm0, %v4435_v15, 0.0 }
 0x100   :  { %v1626_v6 = vunpack.c.l.b16 %v1210_v56  ;;  %v1627_v10 = vunpack.c.h.b16 %v1210_v56  ;;  %v1051_v11 = vmul.f32 0.0625, %v542_v61  ;;  %v1050_v12 = vmul.f32 0.0625, %v539_v63  ;;  %v4964_v46 = vld [vmem:[#allocation2 + $0x360] ss:$16 sps:$4 sm:$0xff]   ;;  %3836 = vmatprep.subr.bf16.mxu0 %v4959_v40  ;;  %3885 = vmatprep.subr.bf16.mxu1 %v4961_v41  ;;  %v4965_v61 = vld [vmem:[#allocation2 + $0x1c4] ss:$16 sps:$4 sm:$0xff]  }
 0x101   :  { %v2603_v8 = vsel %vm1864_vm6, %v2602_v58, %v5661_v52  ;;  %v807_v52 = vsel %vm422_vm0, %v4662_v2, 0.0  ;;  %v465_v56 = vsel %vm422_vm0, %v4434_v30, 0.0  ;;  %3886 = vmatpush2.bf16.msra.mxu1 %v4964_v46 }
 0x102   :  { %v5769_v19 = vsel %vm1871_vm7, %v2607_v59, %v2603_v8  ;;  %v1849_v32 = vrot.slane %v1626_v6, %v5594_v62  ;;  %v1856_v20 = vrot.slane %v1627_v10, %v5598_v5  ;;  %v1227_v21 = vpack.c.bf16 %v1051_v11, %v1050_v12  ;;  %517 = vadd.xlane.f32.xlu1 %v516_v33  ;;  %v4967_v10 = vld [vmem:[#allocation2 + $0x344] ss:$16 sps:$4 sm:$0xff]   ;;  %v4969_v11 = vld [vmem:[#allocation2 + $0x1c0] ss:$16 sps:$4 sm:$0xff]  }
 0x103   :  { %514 = vadd.xlane.f32.xlu0 %v513_v13  ;;  %v734_v24 = vpop.xlane.xlu1 %733  ;;  %v731_v25 = vpop.xlane.xlu0 %730  ;;  %v4631_v33 = vunpack.c.h.bf16 %v4851_v38  ;;  %v4630_v13 = vunpack.c.l.bf16 %v4851_v38  ;;  %v4599_v59 = vunpack.c.h.bf16 %v4843_v44  ;;  %v4598_v6 = vunpack.c.l.bf16 %v4843_v44  ;;  %v4970_v12 = vld [vmem:[#allocation2 + $0x340] ss:$16 sps:$4 sm:$0xff]   ;;  %3887 = vmatprep.subr.bf16.mxu1 %v4967_v10 }
 0x104   :  { %v1851_v31 = vsel %vm1850_vm4, %v1849_v32, %v5675_v54  ;;  %v1660_v45 = vunpack.c.l.b16 %v1227_v21  ;;  %v1661_v34 = vunpack.c.h.b16 %v1227_v21  ;;  %v1115_v3 = vmul.f32 0.0625, %v734_v24  ;;  %v4963_v54 = vld [vmem:[#allocation2 + $0x1e0] ss:$16 sps:$4 sm:$0xff]   ;;  %v4892_v32 = vld [vmem:[%s6616_s0 + $0x308] sm:$0xff]  }
 0x105   :  { %v5781_v48 = vsel %vm1857_vm5, %v1856_v20, %v1851_v31  ;;  %v1114_v29 = vmul.f32 0.0625, %v731_v25  ;;  %3837 = vmatpush2.bf16.msra.mxu0 %v4963_v54  ;;  %v762_v16 = vsel %vm422_vm0, %v4631_v33, 0.0  ;;  %v759_v17 = vsel %vm422_vm0, %v4630_v13, 0.0  ;;  %3888 = vmatpush2.bf16.msra.mxu1 %v4970_v12  ;;  %v4977_v33 = vld [vmem:[#allocation2 + $0x184] ss:$16 sps:$4 sm:$0xff]  }
 0x106   :  { %v2040_v47 = vrot.slane %v1660_v45, %v5718_v39  ;;  %v2045_v49 = vrot.slane %v1661_v34, %v5721_v42  ;;  %811 = vadd.xlane.f32.xlu1 %v810_v27  ;;  %3838 = vmatprep.subr.bf16.mxu0 %v4965_v61  ;;  %v4971_v27 = vld [vmem:[#allocation2 + $0x1a4] ss:$16 sps:$4 sm:$0xff]   ;;  %v714_v31 = vsel %vm422_vm0, %v4599_v59, 0.0  ;;  %v711_v45 = vsel %vm422_vm0, %v4598_v6, 0.0  ;;  %v4975_v34 = vld [vmem:[#allocation2 + $0x1a0] ss:$16 sps:$4 sm:$0xff]  }
 0x107   :  { %v1259_v4 = vpack.c.bf16 %v1115_v3, %v1114_v29  ;;  %808 = vadd.xlane.f32.xlu0 %v807_v52  ;;  %v836_v53 = vpop.xlane.xlu1 %835  ;;  %v833_v55 = vpop.xlane.xlu0 %832  ;;  %v4973_v52 = vld [vmem:[#allocation2 + $0x324] ss:$16 sps:$4 sm:$0xff]   ;;  %v4976_v3 = vld [vmem:[#allocation2 + $0x320] ss:$16 sps:$4 sm:$0xff]   ;;  %v1880_v54 = vadd.s32 4294967224, %v5454_v60 }
 0x108   :  { %v2041_v57 = vsel %vm1864_vm6, %v2040_v47, %v5691_v50  ;;  %v1149_v43 = vmul.f32 0.0625, %v836_v53  ;;  %v1148_v58 = vmul.f32 0.0625, %v833_v55  ;;  %v4795_v47 = vunpack.c.h.bf16 %v4892_v32  ;;  %3889 = vmatprep.subr.bf16.mxu1 %v4973_v52  ;;  %v4979_v13 = vld [vmem:[#allocation2 + $0x304] ss:$16 sps:$4 sm:$0xff]   ;;  %v4982_v59 = vld [vmem:[#allocation2 + $0x300] ss:$16 sps:$4 sm:$0xff]  }
 0x109   :  { %v5793_v63 = vsel %vm1871_vm7, %v2045_v49, %v2041_v57  ;;  %v1724_v1 = vunpack.c.l.b16 %v1259_v4  ;;  %v1725_v2 = vunpack.c.h.b16 %v1259_v4  ;;  %3839 = vmatpush2.bf16.msra.mxu0 %v4969_v11  ;;  %v4794_v49 = vunpack.c.l.bf16 %v4892_v32  ;;  %3890 = vmatpush2.bf16.msra.mxu1 %v4976_v3  ;;  %v4983_v32 = vld [vmem:[#allocation2 + $0x164] ss:$16 sps:$4 sm:$0xff]  }
 0x10a   :  { %v1276_v28 = vpack.c.bf16 %v1149_v43, %v1148_v58  ;;  %469 = vadd.xlane.f32.xlu1 %v468_v51  ;;  %v4835_v51 = vld [vmem:[%s6616_s0 + $0x140] sm:$0xff]   ;;  %3840 = vmatprep.subr.bf16.mxu0 %v4971_v27  ;;  %v5827_v10 = vsub.s32 %v1880_v54, %v5461_v7 }
 0x10b   :  { %v2355_v50 = vrot.slane %v1724_v1, %v5594_v62  ;;  %v2360_v14 = vrot.slane %v1725_v2, %v5598_v5  ;;  %466 = vadd.xlane.f32.xlu0 %v465_v56  ;;  %v494_v8 = vpop.xlane.xlu1 %493  ;;  %v491_v15 = vpop.xlane.xlu0 %490  ;;  %v4981_v58 = vld [vmem:[#allocation2 + $0x180] ss:$16 sps:$4 sm:$0xff]   ;;  %v4566_v2 = vunpack.c.l.bf16 %v4835_v51  ;;  %3891 = vmatprep.subr.bf16.mxu1 %v4979_v13 }
 0x10c   :  { %v1758_v20 = vunpack.c.l.b16 %v1276_v28  ;;  %v1759_v21 = vunpack.c.h.b16 %v1276_v28  ;;  %v1035_v24 = vmul.f32 0.0625, %v494_v8  ;;  %v1034_v25 = vmul.f32 0.0625, %v491_v15  ;;  %6653 = vst [vmem:[#allocation18_spill] sm:$0xff] %v5827_v10  ;;  %v4827_v54 = vld [vmem:[%s6616_s0 + $0x100] sm:$0xff]  }
 0x10d   :  { %v2356_v30 = vsel %vm1850_vm4, %v2355_v50, %v5702_v9  ;;  %v1873_v9 = vadd.s32 4294967232, %v5454_v60  ;;  %3841 = vmatpush2.bf16.msra.mxu0 %v4975_v34  ;;  %v1008_v50 = vsel %vm422_vm0, %v4795_v47, 0.0  ;;  %3892 = vmatpush2.bf16.msra.mxu1 %v4982_v59  ;;  %v663_v52 = vsel %vm422_vm0, %v4566_v2, 0.0 }
 0x10e   :  { %v5807_v38 = vsel %vm1857_vm5, %v2360_v14, %v2356_v30  ;;  %v2523_v40 = vrot.slane %v1758_v20, %v5718_v39  ;;  %v2528_v41 = vrot.slane %v1759_v21, %v5721_v42  ;;  %v1219_v29 = vpack.c.bf16 %v1035_v24, %v1034_v25  ;;  %763 = vadd.xlane.f32.xlu1 %v762_v16  ;;  %v4985_v25 = vld [vmem:[#allocation2 + $0x160] ss:$16 sps:$4 sm:$0xff]  }
 0x10f   :  { %760 = vadd.xlane.f32.xlu0 %v759_v17  ;;  %v596_v44 = vpop.xlane.xlu1 %595  ;;  %v593_v46 = vpop.xlane.xlu0 %592  ;;  %3842 = vmatprep.subr.bf16.mxu0 %v4977_v33  ;;  %v5824_v6 = vsub.s32 %v1873_v9, %v5461_v7  ;;  %v1005_v16 = vsel %vm422_vm0, %v4794_v49, 0.0  ;;  %v4884_v17 = vld [vmem:[%s6616_s0 + $0x2c8] sm:$0xff]   ;;  %v4988_v49 = vld [vmem:[#allocation2 + $0x140] ss:$16 sps:$4 sm:$0xff]   ;;  %v4534_v59 = vunpack.c.l.bf16 %v4827_v54 }
 0x110   :  { %v2524_v4 = vsel %vm1864_vm6, %v2523_v40, %v5715_v35  ;;  %v1644_v53 = vunpack.c.l.b16 %v1219_v29  ;;  %v1645_v55 = vunpack.c.h.b16 %v1219_v29  ;;  %v1069_v56 = vmul.f32 0.0625, %v596_v44 }
 0x111   :  { %v5819_v57 = vsel %vm1871_vm7, %v2528_v41, %v2524_v4  ;;  %v1068_v43 = vmul.f32 0.0625, %v593_v46  ;;  %v4567_v35 = vunpack.c.h.bf16 %v4835_v51  ;;  %6652 = vst [vmem:[#allocation17_spill] sm:$0xff] %v5824_v6  ;;  %3843 = vmatpush2.bf16.msra.mxu0 %v4981_v58  ;;  %v4763_v3 = vunpack.c.h.bf16 %v4884_v17  ;;  %v4986_v46 = vld [vmem:[#allocation2 + $0x144] ss:$16 sps:$4 sm:$0xff]  }
 0x112   :  { %v1961_v61 = vrot.slane %v1644_v53, %v5718_v39  ;;  %v1966_v1 = vrot.slane %v1645_v55, %v5721_v42  ;;  %715 = vadd.xlane.f32.xlu1 %v714_v31  ;;  %3844 = vmatprep.subr.bf16.mxu0 %v4983_v32  ;;  %v4762_v40 = vunpack.c.l.bf16 %v4884_v17  ;;  %v4535_v58 = vunpack.c.h.bf16 %v4827_v54 }
 0x113   :  { %v1236_v11 = vpack.c.bf16 %v1069_v56, %v1068_v43  ;;  %712 = vadd.xlane.f32.xlu0 %v711_v45  ;;  %v788_v12 = vpop.xlane.xlu1 %787  ;;  %v785_v28 = vpop.xlane.xlu0 %784  ;;  %v666_v27 = vsel %vm422_vm0, %v4567_v35, 0.0  ;;  %v960_v13 = vsel %vm422_vm0, %v4763_v3, 0.0  ;;  %v4994_v3 = vld [vmem:[#allocation2 + $0x100] ss:$16 sps:$4 sm:$0xff]  }
 0x114   :  { %v1962_v14 = vsel %vm1864_vm6, %v1961_v61, %v5733_v0  ;;  %v1133_v8 = vmul.f32 0.0625, %v788_v12  ;;  %v1132_v15 = vmul.f32 0.0625, %v785_v28  ;;  %v957_v43 = vsel %vm422_vm0, %v4762_v40, 0.0 }
 0x115   :  { %v5837_v20 = vsel %vm1871_vm7, %v1966_v1, %v1962_v14  ;;  %v1678_v21 = vunpack.c.l.b16 %v1236_v11  ;;  %v1679_v24 = vunpack.c.h.b16 %v1236_v11  ;;  %3845 = vmatpush2.bf16.msra.mxu0 %v4985_v25  ;;  %v4989_v11 = vld [vmem:[#allocation2 + $0x124] ss:$16 sps:$4 sm:$0xff]  }
 0x116   :  { %v1268_v0 = vpack.c.bf16 %v1133_v8, %v1132_v15  ;;  %1009 = vadd.xlane.f32.xlu1 %v1008_v50  ;;  %3846 = vmatprep.subr.bf16.mxu0 %v4986_v46  ;;  %v4991_v50 = vld [vmem:[#allocation2 + $0x120] ss:$16 sps:$4 sm:$0xff]  }
 0x117   :  { %v2129_v30 = vrot.slane %v1678_v21, %v5824_v6  ;;  %v2134_v31 = vrot.slane %v1679_v24, %v5827_v10  ;;  %1006 = vadd.xlane.f32.xlu0 %v1005_v16  ;;  %v890_v45 = vpop.xlane.xlu1 %889  ;;  %v887_v34 = vpop.xlane.xlu0 %886  ;;  %v618_v21 = vsel %vm422_vm0, %v4535_v58, 0.0 }
 0x118   :  { %v1742_v41 = vunpack.c.l.b16 %v1268_v0  ;;  %v1743_v29 = vunpack.c.h.b16 %v1268_v0  ;;  %v1167_v44 = vmul.f32 0.0625, %v890_v45  ;;  %v1166_v9 = vmul.f32 0.0625, %v887_v34 }
 0x119   :  { %v2130_v47 = vsel %vm1878_vm8, %v2129_v30, %v5745_v23  ;;  %v4836_v23 = vld [vmem:[%s6616_s0 + $0x148] sm:$0xff]   ;;  %3847 = vmatpush2.bf16.msra.mxu0 %v4988_v49  ;;  %v4992_v30 = vld [vmem:[#allocation2 + $0x104] ss:$16 sps:$4 sm:$0xff]  }
 0x11a   :  { %v5849_v51 = vsel %vm6642_vm9, %v2134_v31, %v2130_v47  ;;  %v2444_v4 = vrot.slane %v1742_v41, %v5718_v39  ;;  %v2449_v53 = vrot.slane %v1743_v29, %v5721_v42  ;;  %v1285_v55 = vpack.c.bf16 %v1167_v44, %v1166_v9  ;;  %667 = vadd.xlane.f32.xlu1 %v666_v27 }
 0x11b   :  { %664 = vadd.xlane.f32.xlu0 %v663_v52  ;;  %v446_v56 = vpop.xlane.xlu1 %445  ;;  %v443_v33 = vpop.xlane.xlu0 %442  ;;  %v4571_v15 = vunpack.c.h.bf16 %v4836_v23  ;;  %v4570_v16 = vunpack.c.l.bf16 %v4836_v23  ;;  %3848 = vmatprep.subr.bf16.mxu0 %v4989_v11  ;;  %v615_v27 = vsel %vm422_vm0, %v4534_v59, 0.0  ;;  %v4876_v52 = vld [vmem:[%s6616_s0 + $0x288] sm:$0xff]   ;;  %v4997_v23 = vld [vmem:[#allocation2 + $0x604] ss:$16 sps:$4 sm:$0xff]  }
 0x11c   :  { %v2445_v61 = vsel %vm1864_vm6, %v2444_v4, %v5757_v22  ;;  %v1776_v1 = vunpack.c.l.b16 %v1285_v55  ;;  %v1777_v35 = vunpack.c.h.b16 %v1285_v55  ;;  %v1019_v2 = vmul.f32 0.0625, %v446_v56  ;;  %v4885_v56 = vld [vmem:[%s6616_s0 + $0x2d0] sm:$0xff]   ;;  %3957 = vmatprep.subr.bf16.mxu1 %v4997_v23 }
 0x11d   :  { %v5861_v12 = vsel %vm1871_vm7, %v2449_v53, %v2445_v61  ;;  %v1018_v28 = vmul.f32 0.0625, %v443_v33  ;;  %3849 = vmatpush2.bf16.msra.mxu0 %v4991_v50  ;;  %v669_v41 = vsel %vm422_vm0, %v4570_v16, 0.0  ;;  %v4731_v46 = vunpack.c.h.bf16 %v4876_v52 }
 0x11e   :  { %v2612_v14 = vrot.slane %v1776_v1, %v5824_v6  ;;  %v2617_v8 = vrot.slane %v1777_v35, %v5827_v10  ;;  %961 = vadd.xlane.f32.xlu1 %v960_v13  ;;  %3850 = vmatprep.subr.bf16.mxu0 %v4992_v30  ;;  %v4730_v47 = vunpack.c.l.bf16 %v4876_v52  ;;  %v4767_v11 = vunpack.c.h.bf16 %v4885_v56 }
 0x11f   :  { %v1211_v17 = vpack.c.bf16 %v1019_v2, %v1018_v28  ;;  %958 = vadd.xlane.f32.xlu0 %v957_v43  ;;  %v548_v22 = vpop.xlane.xlu1 %547  ;;  %v545_v32 = vpop.xlane.xlu0 %544  ;;  %v912_v35 = vsel %vm422_vm0, %v4731_v46, 0.0  ;;  %v4766_v28 = vunpack.c.l.bf16 %v4885_v56 }
 0x120   :  { %v2613_v24 = vsel %vm1878_vm8, %v2612_v14, %v5769_v19  ;;  %v1053_v25 = vmul.f32 0.0625, %v548_v22  ;;  %v1052_v0 = vmul.f32 0.0625, %v545_v32  ;;  %v672_v19 = vsel %vm422_vm0, %v4571_v15, 0.0 }
 0x121   :  { %v5873_v31 = vsel %vm6642_vm9, %v2617_v8, %v2613_v24  ;;  %v1628_v45 = vunpack.c.l.b16 %v1211_v17  ;;  %v1629_v34 = vunpack.c.h.b16 %v1211_v17  ;;  %3851 = vmatpush2.bf16.msra.mxu0 %v4994_v3  ;;  %v909_v2 = vsel %vm422_vm0, %v4730_v47, 0.0  ;;  %v4877_v3 = vld [vmem:[%s6616_s0 + $0x290] sm:$0xff]  }
 0x122   :  { %v1228_v40 = vpack.c.bf16 %v1053_v25, %v1052_v0  ;;  %619 = vadd.xlane.f32.xlu1 %v618_v21 }
 0x123   :  { %v1863_v29 = vrot.slane %v1628_v45, %v5718_v39  ;;  %v1870_v44 = vrot.slane %v1629_v34, %v5721_v42  ;;  %616 = vadd.xlane.f32.xlu0 %v615_v27  ;;  %v740_v9 = vpop.xlane.xlu1 %739  ;;  %v737_v54 = vpop.xlane.xlu0 %736  ;;  %v963_v34 = vsel %vm422_vm0, %v4766_v28, 0.0 }
 0x124   :  { %v1662_v49 = vunpack.c.l.b16 %v1228_v40  ;;  %v1663_v4 = vunpack.c.h.b16 %v1228_v40  ;;  %v1117_v53 = vmul.f32 0.0625, %v740_v9  ;;  %v1116_v55 = vmul.f32 0.0625, %v737_v54 }
 0x125   :  { %v1865_v33 = vsel %vm1864_vm6, %v1863_v29, %v5781_v48  ;;  %v4828_v48 = vld [vmem:[%s6616_s0 + $0x108] sm:$0xff]   ;;  %v1894_v9 = vadd.s32 4294967208, %v5454_v60 }
 0x126   :  { %v5885_v13 = vsel %vm1871_vm7, %v1870_v44, %v1865_v33  ;;  %v2050_v43 = vrot.slane %v1662_v49, %v5824_v6  ;;  %v2055_v58 = vrot.slane %v1663_v4, %v5827_v10  ;;  %v1260_v59 = vpack.c.bf16 %v1117_v53, %v1116_v55  ;;  %673 = vadd.xlane.f32.xlu1 %v672_v19  ;;  %v4837_v53 = vld [vmem:[%s6616_s0 + $0x150] sm:$0xff]  }
 0x127   :  { %670 = vadd.xlane.f32.xlu0 %v669_v41  ;;  %v842_v61 = vpop.xlane.xlu1 %841  ;;  %v839_v1 = vpop.xlane.xlu0 %838  ;;  %v4539_v21 = vunpack.c.h.bf16 %v4828_v48  ;;  %v4538_v27 = vunpack.c.l.bf16 %v4828_v48  ;;  %v1887_v44 = vadd.s32 4294967216, %v5454_v60  ;;  %v4735_v4 = vunpack.c.h.bf16 %v4877_v3 }
 0x128   :  { %v2051_v50 = vsel %vm1878_vm8, %v2050_v43, %v5793_v63  ;;  %v1726_v14 = vunpack.c.l.b16 %v1260_v59  ;;  %v1727_v8 = vunpack.c.h.b16 %v1260_v59  ;;  %v1151_v15 = vmul.f32 0.0625, %v842_v61 }
 0x129   :  { %v5897_v16 = vsel %vm6642_vm9, %v2055_v58, %v2051_v50  ;;  %v1150_v17 = vmul.f32 0.0625, %v839_v1  ;;  %v966_v63 = vsel %vm422_vm0, %v4767_v11, 0.0  ;;  %v621_v49 = vsel %vm422_vm0, %v4538_v27, 0.0 }
 0x12a   :  { %v2365_v22 = vrot.slane %v1726_v14, %v5718_v39  ;;  %v2370_v32 = vrot.slane %v1727_v8, %v5721_v42  ;;  %913 = vadd.xlane.f32.xlu1 %v912_v35  ;;  %v4734_v58 = vunpack.c.l.bf16 %v4877_v3  ;;  %v5928_v11 = vsub.s32 %v1887_v44, %v5461_v7 }
 0x12b   :  { %v1277_v24 = vpack.c.bf16 %v1151_v15, %v1150_v17  ;;  %910 = vadd.xlane.f32.xlu0 %v909_v2  ;;  %v500_v25 = vpop.xlane.xlu1 %499  ;;  %v497_v0 = vpop.xlane.xlu0 %496  ;;  %v4575_v2 = vunpack.c.h.bf16 %v4837_v53  ;;  %v5931_v28 = vsub.s32 %v1894_v9, %v5461_v7 }
 0x12c   :  { %v2366_v52 = vsel %vm1864_vm6, %v2365_v22, %v5807_v38  ;;  %v1037_v30 = vmul.f32 0.0625, %v500_v25  ;;  %v1036_v45 = vmul.f32 0.0625, %v497_v0  ;;  %v624_v38 = vsel %vm422_vm0, %v4539_v21, 0.0 }
 0x12d   :  { %v5909_v40 = vsel %vm1871_vm7, %v2370_v32, %v2366_v52  ;;  %v1760_v19 = vunpack.c.l.b16 %v1277_v24  ;;  %v1761_v41 = vunpack.c.h.b16 %v1277_v24  ;;  %v915_v17 = vsel %vm422_vm0, %v4734_v58, 0.0  ;;  %v4886_v32 = vld [vmem:[%s6616_s0 + $0x2d8] sm:$0xff]  }
 0x12e   :  { %v1220_v29 = vpack.c.bf16 %v1037_v30, %v1036_v45  ;;  %967 = vadd.xlane.f32.xlu1 %v966_v63  ;;  %v4574_v22 = vunpack.c.l.bf16 %v4837_v53  ;;  %v4771_v45 = vunpack.c.h.bf16 %v4886_v32 }
 0x12f   :  { %v2533_v54 = vrot.slane %v1760_v19, %v5824_v6  ;;  %v2538_v46 = vrot.slane %v1761_v41, %v5827_v10  ;;  %964 = vadd.xlane.f32.xlu0 %v963_v34  ;;  %v602_v47 = vpop.xlane.xlu1 %601  ;;  %v599_v43 = vpop.xlane.xlu0 %598  ;;  %v4770_v19 = vunpack.c.l.bf16 %v4886_v32  ;;  %v4829_v41 = vld [vmem:[%s6616_s0 + $0x110] sm:$0xff]  }
 0x130   :  { %v1646_v55 = vunpack.c.l.b16 %v1220_v29  ;;  %v1647_v56 = vunpack.c.h.b16 %v1220_v29  ;;  %v1071_v33 = vmul.f32 0.0625, %v602_v47  ;;  %v1070_v23 = vmul.f32 0.0625, %v599_v43 }
 0x131   :  { %v2534_v59 = vsel %vm1878_vm8, %v2533_v54, %v5819_v57  ;;  %v918_v57 = vsel %vm422_vm0, %v4735_v4, 0.0  ;;  %v675_v3 = vsel %vm422_vm0, %v4574_v22, 0.0  ;;  %v4543_v4 = vunpack.c.h.bf16 %v4829_v41 }
 0x132   :  { %v5923_v61 = vsel %vm6642_vm9, %v2538_v46, %v2534_v59  ;;  %v1971_v1 = vrot.slane %v1646_v55, %v5824_v6  ;;  %v1976_v35 = vrot.slane %v1647_v56, %v5827_v10  ;;  %625 = vadd.xlane.f32.xlu1 %v624_v38  ;;  %v1237_v48 = vpack.c.bf16 %v1071_v33, %v1070_v23  ;;  %v4878_v33 = vld [vmem:[%s6616_s0 + $0x298] sm:$0xff]  }
 0x133   :  { %622 = vadd.xlane.f32.xlu0 %v621_v49  ;;  %v794_v50 = vpop.xlane.xlu1 %793  ;;  %v791_v15 = vpop.xlane.xlu0 %790  ;;  %v972_v49 = vsel %vm422_vm0, %v4771_v45, 0.0  ;;  %v969_v56 = vsel %vm422_vm0, %v4770_v19, 0.0 }
 0x134   :  { %v1972_v14 = vsel %vm1878_vm8, %v1971_v1, %v5837_v20  ;;  %v1135_v8 = vmul.f32 0.0625, %v794_v50  ;;  %v1680_v24 = vunpack.c.l.b16 %v1237_v48  ;;  %v1681_v25 = vunpack.c.h.b16 %v1237_v48  ;;  %v4838_v48 = vld [vmem:[%s6616_s0 + $0x158] sm:$0xff]  }
 0x135   :  { %v5941_v21 = vsel %vm6642_vm9, %v1976_v35, %v1972_v14  ;;  %v1134_v0 = vmul.f32 0.0625, %v791_v15  ;;  %v678_v20 = vsel %vm422_vm0, %v4575_v2, 0.0  ;;  %v630_v35 = vsel %vm422_vm0, %v4543_v4, 0.0 }
 0x136   :  { %919 = vadd.xlane.f32.xlu1 %v918_v57  ;;  %v2139_v63 = vrot.slane %v1680_v24, %v5928_v11  ;;  %v2144_v27 = vrot.slane %v1681_v25, %v5931_v28  ;;  %v4739_v2 = vunpack.c.h.bf16 %v4878_v33  ;;  %v4579_v22 = vunpack.c.h.bf16 %v4838_v48 }
 0x137   :  { %v1269_v52 = vpack.c.bf16 %v1135_v8, %v1134_v0  ;;  %916 = vadd.xlane.f32.xlu0 %v915_v17  ;;  %v5946_v30 = vpop.xlane.xlu1 %895  ;;  %v5948_v34 = vpop.xlane.xlu0 %892  ;;  %v4578_v45 = vunpack.c.l.bf16 %v4838_v48 }
 0x138   :  { %v2140_v29 = vsel %vm1892_vm10, %v2139_v63, %v5849_v51  ;;  %v4542_v51 = vunpack.c.l.bf16 %v4829_v41 }
 0x139   :  { %v1744_v44 = vunpack.c.l.b16 %v1269_v52  ;;  %v1745_v9 = vunpack.c.h.b16 %v1269_v52  ;;  %v5957_v38 = vsel %vm1899_vm11, %v2144_v27, %v2140_v29 }
 0x13a   :  { %679 = vadd.xlane.f32.xlu1 %v678_v20  ;;  %v627_v14 = vsel %vm422_vm0, %v4542_v51, 0.0  ;;  %v924_v20 = vsel %vm422_vm0, %v4739_v2, 0.0  ;;  %v4830_v51 = vld [vmem:[%s6616_s0 + $0x118] sm:$0xff]  }
 0x13b   :  { %v2454_v54 = vrot.slane %v1744_v44, %v5824_v6  ;;  %v2459_v46 = vrot.slane %v1745_v9, %v5827_v10  ;;  %676 = vadd.xlane.f32.xlu0 %v675_v3  ;;  %v452_v47 = vpop.xlane.xlu1 %451  ;;  %v449_v55 = vpop.xlane.xlu0 %448  ;;  %v4887_v3 = vld [vmem:[%s6616_s0 + $0x2e0] sm:$0xff]  }
 0x13c   :  { %v1021_v53 = vmul.f32 0.0625, %v452_v47  ;;  %v1020_v58 = vmul.f32 0.0625, %v449_v55 }
 0x13d   :  { %v2455_v43 = vsel %vm1878_vm8, %v2454_v54, %v5861_v12  ;;  %v4738_v12 = vunpack.c.l.bf16 %v4878_v33  ;;  %v684_v54 = vsel %vm422_vm0, %v4579_v22, 0.0 }
 0x13e   :  { %v5969_v59 = vsel %vm6642_vm9, %v2459_v46, %v2455_v43  ;;  %973 = vadd.xlane.f32.xlu1 %v972_v49  ;;  %v1212_v23 = vpack.c.bf16 %v1021_v53, %v1020_v58  ;;  %v4775_v53 = vunpack.c.h.bf16 %v4887_v3 }
 0x13f   :  { %970 = vadd.xlane.f32.xlu0 %v969_v56  ;;  %v554_v1 = vpop.xlane.xlu1 %553  ;;  %v551_v57 = vpop.xlane.xlu0 %550  ;;  %v921_v52 = vsel %vm422_vm0, %v4738_v12, 0.0  ;;  %v4774_v56 = vunpack.c.l.bf16 %v4887_v3 }
 0x140   :  { %v1055_v50 = vmul.f32 0.0625, %v554_v1  ;;  %v1630_v8 = vunpack.c.l.b16 %v1212_v23  ;;  %v1631_v15 = vunpack.c.h.b16 %v1212_v23  ;;  %v1054_v17 = vmul.f32 0.0625, %v551_v57 }
 0x141   :  { %v978_v48 = vsel %vm422_vm0, %v4775_v53, 0.0  ;;  %v975_v12 = vsel %vm422_vm0, %v4774_v56, 0.0 }
 0x142   :  { %631 = vadd.xlane.f32.xlu1 %v630_v35  ;;  %v1877_v32 = vrot.slane %v1630_v8, %v5824_v6  ;;  %v1884_v24 = vrot.slane %v1631_v15, %v5827_v10  ;;  %v1229_v25 = vpack.c.bf16 %v1055_v50, %v1054_v17  ;;  %v4547_v50 = vunpack.c.h.bf16 %v4830_v51  ;;  %v4879_v8 = vld [vmem:[%s6616_s0 + $0x2a0] sm:$0xff]  }
 0x143   :  { %628 = vadd.xlane.f32.xlu0 %v627_v14  ;;  %v746_v0 = vpop.xlane.xlu1 %745  ;;  %v743_v27 = vpop.xlane.xlu0 %742 }
 0x144   :  { %v1119_v63 = vmul.f32 0.0625, %v746_v0  ;;  %v1879_v19 = vsel %vm1878_vm8, %v1877_v32, %v5885_v13  ;;  %v1664_v41 = vunpack.c.l.b16 %v1229_v25  ;;  %v1665_v29 = vunpack.c.h.b16 %v1229_v25 }
 0x145   :  { %v1118_v44 = vmul.f32 0.0625, %v743_v27  ;;  %v5986_v9 = vsel %vm6642_vm9, %v1884_v24, %v1879_v19  ;;  %v681_v13 = vsel %vm422_vm0, %v4578_v45, 0.0  ;;  %v636_v25 = vsel %vm422_vm0, %v4547_v50, 0.0 }
 0x146   :  { %925 = vadd.xlane.f32.xlu1 %v924_v20  ;;  %v2060_v46 = vrot.slane %v1664_v41, %v5928_v11  ;;  %v2065_v47 = vrot.slane %v1665_v29, %v5931_v28  ;;  %v4743_v0 = vunpack.c.h.bf16 %v4879_v8  ;;  %v4742_v27 = vunpack.c.l.bf16 %v4879_v8 }
 0x147   :  { %v1261_v49 = vpack.c.bf16 %v1119_v63, %v1118_v44  ;;  %922 = vadd.xlane.f32.xlu0 %v921_v52  ;;  %v5991_v4 = vpop.xlane.xlu1 %847  ;;  %v5993_v55 = vpop.xlane.xlu0 %844  ;;  %v1901_v8 = vadd.s32 4294967200, %v5454_v60 }
 0x148   :  { %v2061_v33 = vsel %vm1892_vm10, %v2060_v46, %v5897_v16  ;;  %v4546_v16 = vunpack.c.l.bf16 %v4830_v51  ;;  %v930_v29 = vsel %vm422_vm0, %v4743_v0, 0.0  ;;  %v927_v46 = vsel %vm422_vm0, %v4742_v27, 0.0 }
 0x149   :  { %v1728_v43 = vunpack.c.l.b16 %v1261_v49  ;;  %v1729_v58 = vunpack.c.h.b16 %v1261_v49  ;;  %v6002_v23 = vsel %vm1899_vm11, %v2065_v47, %v2061_v33  ;;  %v4888_v49 = vld [vmem:[%s6616_s0 + $0x2e8] sm:$0xff]  }
 0x14a   :  { %685 = vadd.xlane.f32.xlu1 %v684_v54  ;;  %v633_v63 = vsel %vm422_vm0, %v4546_v16, 0.0  ;;  %v4779_v33 = vunpack.c.h.bf16 %v4888_v49  ;;  %v4840_v16 = vld [vmem:[%s6616_s0 + $0x168] sm:$0xff]  }
 0x14b   :  { %v2375_v1 = vrot.slane %v1728_v43, %v5824_v6  ;;  %v2380_v35 = vrot.slane %v1729_v58, %v5827_v10  ;;  %682 = vadd.xlane.f32.xlu0 %v681_v13  ;;  %v506_v2 = vpop.xlane.xlu1 %505  ;;  %v503_v14 = vpop.xlane.xlu0 %502 }
 0x14c   :  { %v1039_v57 = vmul.f32 0.0625, %v506_v2  ;;  %v1038_v17 = vmul.f32 0.0625, %v503_v14  ;;  %v984_v2 = vsel %vm422_vm0, %v4779_v33, 0.0 }
 0x14d   :  { %v2376_v15 = vsel %vm1878_vm8, %v2375_v1, %v5909_v40  ;;  %v4839_v40 = vld [vmem:[%s6616_s0 + $0x160] sm:$0xff]   ;;  %v4778_v1 = vunpack.c.l.bf16 %v4888_v49  ;;  %v6081_v49 = vsub.s32 %v1901_v8, %v5461_v7 }
 0x14e   :  { %v6014_v22 = vsel %vm6642_vm9, %v2380_v35, %v2376_v15  ;;  %979 = vadd.xlane.f32.xlu1 %v978_v48  ;;  %v1221_v32 = vpack.c.bf16 %v1039_v57, %v1038_v17  ;;  %v4583_v44 = vunpack.c.h.bf16 %v4839_v40  ;;  %v4582_v47 = vunpack.c.l.bf16 %v4839_v40  ;;  %v4831_v35 = vld [vmem:[%s6616_s0 + $0x120] sm:$0xff]   ;;  %v4889_v17 = vld [vmem:[%s6616_s0 + $0x2f0] sm:$0xff]  }
 0x14f   :  { %976 = vadd.xlane.f32.xlu0 %v975_v12  ;;  %v6016_v24 = vpop.xlane.xlu1 %607  ;;  %v6019_v20 = vpop.xlane.xlu0 %604  ;;  %v4551_v48 = vunpack.c.h.bf16 %v4831_v35  ;;  %v981_v57 = vsel %vm422_vm0, %v4778_v1, 0.0  ;;  %v4550_v14 = vunpack.c.l.bf16 %v4831_v35  ;;  %v4880_v12 = vld [vmem:[%s6616_s0 + $0x2a8] sm:$0xff]   ;;  %v1908_v15 = vadd.s32 4294967192, %v5454_v60 }
 0x150   :  { %v1648_v52 = vunpack.c.l.b16 %v1221_v32  ;;  %v1649_v45 = vunpack.c.h.b16 %v1221_v32  ;;  %v690_v51 = vsel %vm422_vm0, %v4583_v44, 0.0  ;;  %v687_v58 = vsel %vm422_vm0, %v4582_v47, 0.0  ;;  %v4832_v32 = vld [vmem:[%s6616_s0 + $0x128] sm:$0xff]  }
 0x151   :  { %v642_v0 = vsel %vm422_vm0, %v4551_v48, 0.0  ;;  %v4746_v27 = vunpack.c.l.bf16 %v4880_v12  ;;  %v4782_v44 = vunpack.c.l.bf16 %v4889_v17  ;;  %v4555_v47 = vunpack.c.h.bf16 %v4832_v32 }
 0x152   :  { %637 = vadd.xlane.f32.xlu1 %v636_v25  ;;  %v1981_v3 = vrot.slane %v1648_v52, %v5928_v11  ;;  %v1986_v19 = vrot.slane %v1649_v45, %v5931_v28  ;;  %v639_v52 = vsel %vm422_vm0, %v4550_v14, 0.0  ;;  %v4587_v45 = vunpack.c.h.bf16 %v4840_v16 }
 0x153   :  { %634 = vadd.xlane.f32.xlu0 %v633_v63  ;;  %v6027_v41 = vpop.xlane.xlu1 %799  ;;  %v6030_v54 = vpop.xlane.xlu0 %796  ;;  %v4747_v63 = vunpack.c.h.bf16 %v4880_v12  ;;  %v4554_v33 = vunpack.c.l.bf16 %v4832_v32  ;;  %v933_v35 = vsel %vm422_vm0, %v4746_v27, 0.0  ;;  %v1169_v14 = vmul.f32 0.0625, %v5946_v30 }
 0x154   :  { %v1982_v53 = vsel %vm1892_vm10, %v1981_v3, %v5941_v21  ;;  %v4586_v3 = vunpack.c.l.bf16 %v4840_v16  ;;  %v1168_v12 = vmul.f32 0.0625, %v5948_v34  ;;  %v987_v32 = vsel %vm422_vm0, %v4782_v44, 0.0  ;;  %v4833_v34 = vld [vmem:[%s6616_s0 + $0x130] sm:$0xff]  }
 0x155   :  { %v6039_v13 = vsel %vm1899_vm11, %v1986_v19, %v1982_v53  ;;  %v4881_v19 = vld [vmem:[%s6616_s0 + $0x2b0] sm:$0xff]   ;;  %v6084_v53 = vsub.s32 %v1908_v15, %v5461_v7  ;;  %v936_v1 = vsel %vm422_vm0, %v4747_v63, 0.0  ;;  %v4890_v15 = vld [vmem:[%s6616_s0 + $0x2f8] sm:$0xff]   ;;  %v6109_v30 = vsel %vm422_vm0, %v4555_v47, 0.0 }
 0x156   :  { %931 = vadd.xlane.f32.xlu1 %v930_v29  ;;  %v4783_v29 = vunpack.c.h.bf16 %v4889_v17  ;;  %v4750_v48 = vunpack.c.l.bf16 %v4881_v19  ;;  %v693_v8 = vsel %vm422_vm0, %v4586_v3, 0.0  ;;  %v4882_v63 = vld [vmem:[%s6616_s0 + $0x2b8] sm:$0xff]   ;;  %v4786_v47 = vunpack.c.l.bf16 %v4890_v15 }
 0x157   :  { %928 = vadd.xlane.f32.xlu0 %v927_v46  ;;  %v6041_v56 = vpop.xlane.xlu1 %901  ;;  %v6044_v43 = vpop.xlane.xlu0 %898  ;;  %v1915_v46 = vadd.s32 4294967184, %v5454_v60  ;;  %v4755_v10 = vunpack.c.h.bf16 %v4882_v63  ;;  %v1072_v6 = vmul.f32 0.0625, %v6019_v20  ;;  %v4754_v20 = vunpack.c.l.bf16 %v4882_v63  ;;  %v5048_v63 = vld [vmem:[#allocation2 + $0x4e4] ss:$16 sps:$4 sm:$0xff]  }
 0x158   :  { %v990_v17 = vsel %vm422_vm0, %v4783_v29, 0.0  ;;  %v6129_v44 = vsel %vm422_vm0, %v4750_v48, 0.0  ;;  %v1073_v48 = vmul.f32 0.0625, %v6016_v24  ;;  %v6165_v42 = vsel %vm422_vm0, %v4786_v47, 0.0  ;;  %3902 = vmatprep.subr.bf16.mxu0 %v5048_v63 }
 0x159   :  { %v6176_v5 = vsel %vm422_vm0, %v4755_v10, 0.0  ;;  %vm2816_vm9 = vcmask 1041409  }
 0x15a   :  { %691 = vadd.xlane.f32.xlu1 %v690_v51  ;;  %v1922_v51 = vadd.s32 4294967176, %v5454_v60  ;;  %v696_v60 = vsel %vm422_vm0, %v4587_v45, 0.0 }
 0x15b   :  { %688 = vadd.xlane.f32.xlu0 %v687_v58  ;;  %v6050_v21 = vpop.xlane.xlu1 %457 }
 0x15c   :  { %v6053_v50 = vpop.xlane.xlu0 %454  ;;  %v6118_v27 = vsub.s32 %v1922_v51, %v5461_v7 }
 0x15d   :  { %v1022_v18 = vmul.f32 0.0625, %v6053_v50 }
 0x15e   :  { %985 = vadd.xlane.f32.xlu1 %v984_v2  ;;  %v4751_v2 = vunpack.c.h.bf16 %v4881_v19 }
 0x15f   :  { %982 = vadd.xlane.f32.xlu0 %v981_v57  ;;  %v6070_v25 = vpop.xlane.xlu1 %559  ;;  %v4841_v57 = vld [vmem:[%s6616_s0 + $0x170] sm:$0xff]  }
 0x160   :  { %v6073_v40 = vpop.xlane.xlu0 %556  ;;  %v4591_v45 = vunpack.c.h.bf16 %v4841_v57  ;;  %v4590_v3 = vunpack.c.l.bf16 %v4841_v57  ;;  %v6126_v29 = vsel %vm422_vm0, %v4751_v2, 0.0  ;;  %v1153_v57 = vmul.f32 0.0625, %v5991_v4  ;;  %v4891_v4 = vld [vmem:[%s6616_s0 + $0x300] sm:$0xff]  }
 0x161   :  { %v1152_v2 = vmul.f32 0.0625, %v5993_v55  ;;  %v4791_v62 = vunpack.c.h.bf16 %v4891_v4  ;;  %v4790_v47 = vunpack.c.l.bf16 %v4891_v4 }
 0x162   :  { %643 = vadd.xlane.f32.xlu1 %v642_v0  ;;  %v6106_v0 = vsub.s32 %v1915_v46, %v5461_v7  ;;  %v4787_v46 = vunpack.c.h.bf16 %v4890_v15  ;;  %v4559_v7 = vunpack.c.h.bf16 %v4833_v34  ;;  %v6145_v15 = vsel %vm422_vm0, %v4591_v45, 0.0 }
 0x163   :  { %640 = vadd.xlane.f32.xlu0 %v639_v52  ;;  %v6087_v58 = vpop.xlane.xlu1 %751  ;;  %v6121_v52 = vsel %vm422_vm0, %v4554_v33, 0.0  ;;  %v4558_v33 = vunpack.c.l.bf16 %v4833_v34  ;;  %v6148_v34 = vsel %vm422_vm0, %v4590_v3, 0.0  ;;  %v6173_v39 = vpack.c.bf16 %v1153_v57, %v1152_v2 }
 0x164   :  { %v6096_v16 = vpop.xlane.xlu0 %748  ;;  %v6156_v24 = vsel %vm422_vm0, %v4787_v46, 0.0  ;;  %v6182_v57 = vsel %vm422_vm0, %v4754_v20, 0.0 }
 0x165   :  { %v6171_v46 = vsel %vm422_vm0, %v4558_v33, 0.0 }
 0x166   :  { %937 = vadd.xlane.f32.xlu1 %v936_v1  ;;  %v6131_v1 = vpack.c.bf16 %v1169_v14, %v1168_v12  ;;  %v1171_v14 = vmul.f32 0.0625, %v6041_v56  ;;  %v1170_v12 = vmul.f32 0.0625, %v6044_v43 }
 0x167   :  { %934 = vadd.xlane.f32.xlu0 %v933_v35  ;;  %v6123_v19 = vpop.xlane.xlu1 %853  ;;  %v4842_v35 = vld [vmem:[%s6616_s0 + $0x178] sm:$0xff]  }
 0x168   :  { %v6133_v51 = vpop.xlane.xlu0 %850  ;;  %v4595_v56 = vunpack.c.h.bf16 %v4842_v35  ;;  %v4594_v43 = vunpack.c.l.bf16 %v4842_v35  ;;  %v1778_v45 = vunpack.c.l.b16 %v6131_v1  ;;  %v1238_v35 = vpack.c.bf16 %v1073_v48, %v1072_v6 }
 0x169   :  { %v6178_v37 = vpack.c.bf16 %v1171_v14, %v1170_v12  ;;  %v1136_v48 = vmul.f32 0.0625, %v6030_v54 }
 0x16a   :  { %697 = vadd.xlane.f32.xlu1 %v696_v60  ;;  %v4834_v60 = vld [vmem:[%s6616_s0 + $0x138] sm:$0xff]   ;;  %v6185_v6 = vsel %vm422_vm0, %v4595_v56, 0.0  ;;  %v6188_v10 = vsel %vm422_vm0, %v4594_v43, 0.0  ;;  %v2622_v2 = vrot.slane %v1778_v45, %v5928_v11  ;;  %v1682_v4 = vunpack.c.l.b16 %v1238_v35 }
 0x16b   :  { %694 = vadd.xlane.f32.xlu0 %v693_v8  ;;  %v6153_v55 = vpop.xlane.xlu1 %511  ;;  %v6168_v8 = vsel %vm422_vm0, %v4559_v7, 0.0  ;;  %v4563_v36 = vunpack.c.h.bf16 %v4834_v60  ;;  %v4562_v26 = vunpack.c.l.bf16 %v4834_v60  ;;  %v1779_v7 = vunpack.c.h.b16 %v6131_v1 }
 0x16c   :  { %v6162_v3 = vpop.xlane.xlu0 %508  ;;  %v1762_v1 = vunpack.c.l.b16 %v6173_v39  ;;  %v6200_v56 = vsel %vm422_vm0, %v4791_v62, 0.0  ;;  %v1780_v43 = vunpack.c.l.b16 %v6178_v37  ;;  %v1683_v63 = vunpack.c.h.b16 %v1238_v35 }
 0x16d   :  { %v6208_v54 = vsel %vm422_vm0, %v4563_v36, 0.0  ;;  %v6211_v60 = vsel %vm422_vm0, %v4562_v26, 0.0  ;;  %v2627_v45 = vrot.slane %v1779_v7, %v5931_v28  ;;  %v1023_v36 = vmul.f32 0.0625, %v6050_v21 }
 0x16e   :  { %991 = vadd.xlane.f32.xlu1 %v990_v17  ;;  %v1137_v17 = vmul.f32 0.0625, %v6027_v41  ;;  %v6205_v41 = vsel %vm422_vm0, %v4790_v47, 0.0  ;;  %v1763_v35 = vunpack.c.h.b16 %v6173_v39  ;;  %v2543_v7 = vrot.slane %v1762_v1, %v5928_v11 }
 0x16f   :  { %988 = vadd.xlane.f32.xlu0 %v987_v32  ;;  %v614_v33 = vpop.xlane.xlu1 %613  ;;  %v6196_v32 = vld [vmem:[%s6616_s0 + $0x2c0] sm:$0xff]   ;;  %v1056_v21 = vmul.f32 0.0625, %v6073_v40  ;;  %v2154_v39 = vrot.slane %v1683_v63, %v6084_v53 }
 0x170   :  { %v1075_v14 = vmul.f32 0.0625, %v614_v33  ;;  %v611_v12 = vpop.xlane.xlu0 %610  ;;  %v1270_v47 = vpack.c.bf16 %v1137_v17, %v1136_v48  ;;  %v6241_v40 = vsel %vm1892_vm10, %v2543_v7, %v5923_v61  ;;  %v1154_v61 = vmul.f32 0.0625, %v6133_v51 }
 0x171   :  { %v1074_v20 = vmul.f32 0.0625, %v611_v12  ;;  %v4759_v12 = vunpack.c.h.bf16 %v6196_v32  ;;  %v1120_v51 = vmul.f32 0.0625, %v6096_v16 }
 0x172   :  { %649 = vadd.xlane.f32.xlu1 %v6109_v30  ;;  %v2623_v30 = vsel %vm1892_vm10, %v2622_v2, %v5873_v31  ;;  %v2632_v31 = vrot.slane %v1780_v43, %v6081_v49  ;;  %v1057_v2 = vmul.f32 0.0625, %v6070_v25  ;;  %v1213_v43 = vpack.c.bf16 %v1023_v36, %v1022_v18 }
 0x173   :  { %v1239_v33 = vpack.c.bf16 %v1075_v14, %v1074_v20  ;;  %646 = vadd.xlane.f32.xlu0 %v6121_v52  ;;  %v6215_v62 = vpop.xlane.xlu1 %805  ;;  %v2149_v52 = vrot.slane %v1682_v4, %v6081_v49  ;;  %v1781_v20 = vunpack.c.h.b16 %v6178_v37  ;;  %v2628_v50 = vsel %vm1899_vm11, %v2627_v45, %v2623_v30 }
 0x174   :  { %v6222_v26 = vpop.xlane.xlu0 %802  ;;  %v6237_v1 = vsel %vm422_vm0, %v4759_v12, 0.0  ;;  %v1746_v37 = vunpack.c.l.b16 %v1270_v47  ;;  %v1747_v4 = vunpack.c.h.b16 %v1270_v47  ;;  %v1230_v12 = vpack.c.bf16 %v1057_v2, %v1056_v21 }
 0x175   :  { %v1684_v17 = vunpack.c.l.b16 %v1239_v33  ;;  %v2637_v63 = vrot.slane %v1781_v20, %v6084_v53  ;;  %v1685_v30 = vunpack.c.h.b16 %v1239_v33  ;;  %v2633_v18 = vsel %vm1906_vm12, %v2632_v31, %v2628_v50 }
 0x176   :  { %943 = vadd.xlane.f32.xlu1 %v6126_v29  ;;  %v6244_v29 = vrot.slane %v1763_v35, %v5931_v28  ;;  %v1155_v47 = vmul.f32 0.0625, %v6123_v19  ;;  %v1632_v33 = vunpack.c.l.b16 %v1213_v43  ;;  %v1121_v19 = vmul.f32 0.0625, %v6087_v58 }
 0x177   :  { %940 = vadd.xlane.f32.xlu0 %v6129_v44  ;;  %v908_v48 = vpop.xlane.xlu1 %907  ;;  %v2150_v44 = vsel %vm1906_vm12, %v2149_v52, %v5957_v38  ;;  %v2159_v36 = vrot.slane %v1684_v17, %v6106_v0  ;;  %v2464_v38 = vrot.slane %v1746_v37, %v5928_v11  ;;  %v2469_v52 = vrot.slane %v1747_v4, %v5931_v28 }
 0x178   :  { %v1173_v25 = vmul.f32 0.0625, %v908_v48  ;;  %v905_v14 = vpop.xlane.xlu0 %904  ;;  %v1633_v2 = vunpack.c.h.b16 %v1213_v43  ;;  %v1666_v21 = vunpack.c.l.b16 %v1230_v12  ;;  %v2638_v50 = vsel %vm1913_vm13, %v2637_v63, %v2633_v18 }
 0x179   :  { %v1172_v45 = vmul.f32 0.0625, %v905_v14  ;;  %v1279_v17 = vpack.c.bf16 %v1155_v47, %v1154_v61  ;;  %v1041_v4 = vmul.f32 0.0625, %v6153_v55  ;;  %v1040_v43 = vmul.f32 0.0625, %v6162_v3 }
 0x17a   :  { %703 = vadd.xlane.f32.xlu1 %v6145_v15  ;;  %v2155_v15 = vsel %vm1913_vm13, %v2154_v39, %v2150_v44  ;;  %v1891_v39 = vrot.slane %v1632_v33, %v5928_v11  ;;  %v1262_v44 = vpack.c.bf16 %v1121_v19, %v1120_v51  ;;  %v2465_v18 = vsel %vm1892_vm10, %v2464_v38, %v5969_v59 }
 0x17b   :  { %v1288_v35 = vpack.c.bf16 %v1173_v25, %v1172_v45  ;;  %700 = vadd.xlane.f32.xlu0 %v6148_v34  ;;  %v6255_v7 = vpop.xlane.xlu1 %463  ;;  %v2164_v34 = vrot.slane %v1685_v30, %v6118_v27  ;;  %v2160_v16 = vsel %vm1920_vm14, %v2159_v36, %v2155_v15  ;;  %v1667_v45 = vunpack.c.h.b16 %v1230_v12 }
 0x17c   :  { %v6259_v14 = vpop.xlane.xlu0 %460  ;;  %v1898_v3 = vrot.slane %v1633_v2, %v5931_v28  ;;  %v1764_v61 = vunpack.c.l.b16 %v1279_v17  ;;  %v1222_v33 = vpack.c.bf16 %v1041_v4, %v1040_v43  ;;  %v1139_v59 = vmul.f32 0.0625, %v6215_v62 }
 0x17d   :  { %v1782_v20 = vunpack.c.l.b16 %v1288_v35  ;;  %v1783_v31 = vunpack.c.h.b16 %v1288_v35  ;;  %v2165_v47 = vsel %vm1927_vm15, %v2164_v34, %v2160_v16  ;;  %v1138_v38 = vmul.f32 0.0625, %v6222_v26 }
 0x17e   :  { %997 = vadd.xlane.f32.xlu1 %v6156_v24  ;;  %v1893_v19 = vsel %vm1892_vm10, %v1891_v39, %v5986_v9  ;;  %v2075_v51 = vrot.slane %v1667_v45, %v6084_v53  ;;  %v6654_v62 = vunpack.c.l.bf16 %v6196_v32  ;;  %v6304_v9 = vsel %vm1899_vm11, %v2469_v52, %v2465_v18 }
 0x17f   :  { %v2642_v48 = vrot.slane %v1782_v20, %v6106_v0  ;;  %v2647_v37 = vrot.slane %v1783_v31, %v6118_v27  ;;  %994 = vadd.xlane.f32.xlu0 %v6165_v42  ;;  %v566_v58 = vpop.xlane.xlu1 %565  ;;  %v2070_v42 = vrot.slane %v1666_v21, %v6081_v49  ;;  %v1730_v20 = vunpack.c.l.b16 %v1262_v44 }
 0x180   :  { %v1059_v25 = vmul.f32 0.0625, %v566_v58  ;;  %v563_v24 = vpop.xlane.xlu0 %562  ;;  %v1765_v31 = vunpack.c.h.b16 %v1279_v17  ;;  %v6301_v26 = vsel %vm422_vm0, %v6654_v62, 0.0  ;;  %v1731_v21 = vunpack.c.h.b16 %v1262_v44 }
 0x181   :  { %v1058_v63 = vmul.f32 0.0625, %v563_v24  ;;  %v2643_v30 = vsel %vm1920_vm14, %v2642_v48, %v2638_v50  ;;  %v2071_v2 = vsel %vm1906_vm12, %v2070_v42, %v6002_v23  ;;  %v2553_v34 = vrot.slane %v1764_v61, %v6081_v49 }
 0x182   :  { %655 = vadd.xlane.f32.xlu1 %v6168_v8  ;;  %v2648_v55 = vsel %vm1927_vm15, %v2647_v37, %v2643_v30  ;;  %v6309_v23 = vsel %vm1899_vm11, %v1898_v3, %v1893_v19  ;;  %v6312_v48 = vrot.slane %v1730_v20, %v5928_v11  ;;  %v2558_v52 = vrot.slane %v1765_v31, %v6084_v53 }
 0x183   :  { %v1231_v36 = vpack.c.bf16 %v1059_v25, %v1058_v63  ;;  %652 = vadd.xlane.f32.xlu0 %v6171_v46  ;;  %v758_v12 = vpop.xlane.xlu1 %757  ;;  %v2820_v35 = vsel %vm2816_vm9, %v2648_v55, %v2165_v47  ;;  %v2549_v46 = vsel %vm1899_vm11, %v6244_v29, %v6241_v40  ;;  %v1650_v29 = vunpack.c.l.b16 %v1222_v33 }
 0x184   :  { %v755_v15 = vpop.xlane.xlu0 %754  ;;  %v6286_v8 = vpack.c.b16 %v2820_v35, %v2820_v35  ;;  %v2076_v58 = vsel %vm1913_vm13, %v2075_v51, %v2071_v2  ;;  %v1651_v16 = vunpack.c.h.b16 %v1222_v33  ;;  %v1025_v39 = vmul.f32 0.0625, %v6255_v7 }
 0x185   :  { %v1668_v50 = vunpack.c.l.b16 %v1231_v36  ;;  %v1669_v4 = vunpack.c.h.b16 %v1231_v36  ;;  %v6320_v43 = vrot.slane %v1731_v21, %v5931_v28  ;;  %v2554_v25 = vsel %vm1906_vm12, %v2553_v34, %v2549_v46 }
 0x186   :  { %3893 = vmatprep.mubr.bf16.mxu1 %v6286_v8  ;;  %949 = vadd.xlane.f32.xlu1 %v6176_v5  ;;  %v1271_v5 = vpack.c.bf16 %v1139_v59, %v1138_v38  ;;  %v1991_v63 = vrot.slane %v1650_v29, %v6081_v49  ;;  %v1123_v7 = vmul.f32 0.0625, %v758_v12  ;;  %v1122_v42 = vmul.f32 0.0625, %v755_v15 }
 0x187   :  { %946 = vadd.xlane.f32.xlu0 %v6182_v57  ;;  %v860_v40 = vpop.xlane.xlu1 %859  ;;  %v1024_v57 = vmul.f32 0.0625, %v6259_v14  ;;  %v2080_v24 = vrot.slane %v1668_v50, %v6106_v0  ;;  %v1996_v3 = vrot.slane %v1651_v16, %v6084_v53  ;;  %v2085_v36 = vrot.slane %v1669_v4, %v6118_v27 }
 0x188   :  { %v1157_v17 = vmul.f32 0.0625, %v860_v40  ;;  %v857_v32 = vpop.xlane.xlu0 %856  ;;  %v1748_v30 = vunpack.c.l.b16 %v1271_v5  ;;  %v1749_v15 = vunpack.c.h.b16 %v1271_v5  ;;  %v1263_v31 = vpack.c.bf16 %v1123_v7, %v1122_v42 }
 0x189   :  { %v1156_v37 = vmul.f32 0.0625, %v857_v32  ;;  %v6327_v61 = vpack.c.bf16 %v1025_v39, %v1024_v57  ;;  %v2081_v38 = vsel %vm1920_vm14, %v2080_v24, %v2076_v58  ;;  %v4995_v32 = vld [vmem:[#allocation2 + $0x600] ss:$16 sps:$4 sm:$0xff]   ;;  %v5000_v39 = vld [vmem:[#allocation2 + $0xec] ss:$16 sps:$4 sm:$0xff]  }
 0x18a   :  { %709 = vadd.xlane.f32.xlu1 %v6185_v6  ;;  %v2474_v19 = vrot.slane %v1748_v30, %v6081_v49  ;;  %v1732_v57 = vunpack.c.l.b16 %v1263_v31  ;;  %v1733_v42 = vunpack.c.h.b16 %v1263_v31 }
 0x18b   :  { %v1280_v45 = vpack.c.bf16 %v1157_v17, %v1156_v37  ;;  %706 = vadd.xlane.f32.xlu0 %v6188_v10  ;;  %v518_v44 = vpop.xlane.xlu1 %517  ;;  %v2559_v10 = vsel %vm1913_vm13, %v2558_v52, %v2554_v25  ;;  %v1634_v21 = vunpack.c.l.b16 %v6327_v61  ;;  %v2479_v52 = vrot.slane %v1749_v15, %v6084_v53 }
 0x18c   :  { %v1043_v18 = vmul.f32 0.0625, %v518_v44  ;;  %v515_v14 = vpop.xlane.xlu0 %514  ;;  %v2475_v16 = vsel %vm1906_vm12, %v2474_v19, %v6304_v9  ;;  %v1635_v24 = vunpack.c.h.b16 %v6327_v61 }
 0x18d   :  { %v1766_v47 = vunpack.c.l.b16 %v1280_v45  ;;  %v1767_v6 = vunpack.c.h.b16 %v1280_v45  ;;  %v1042_v55 = vmul.f32 0.0625, %v515_v14  ;;  %v1905_v45 = vrot.slane %v1634_v21, %v6081_v49 }
 0x18e   :  { %1003 = vadd.xlane.f32.xlu1 %v6200_v56  ;;  %v1992_v56 = vsel %vm1906_vm12, %v1991_v63, %v6039_v13  ;;  %v2386_v14 = vsel %vm1892_vm10, %v6312_v48, %v6014_v22 }
 0x18f   :  { %v2563_v35 = vrot.slane %v1766_v47, %v6106_v0  ;;  %v2568_v12 = vrot.slane %v1767_v6, %v6118_v27  ;;  %v1223_v33 = vpack.c.bf16 %v1043_v18, %v1042_v55  ;;  %1000 = vadd.xlane.f32.xlu0 %v6205_v41  ;;  %v812_v59 = vpop.xlane.xlu1 %811  ;;  %v2086_v41 = vsel %vm1927_vm15, %v2085_v36, %v2081_v38 }
 0x190   :  { %v1141_v51 = vmul.f32 0.0625, %v812_v59  ;;  %v809_v20 = vpop.xlane.xlu0 %808  ;;  %v1997_v17 = vsel %vm1913_vm13, %v1996_v3, %v1992_v56  ;;  %v5242_v55 = vmov 0   ;;  %v2395_v3 = vrot.slane %v1732_v57, %v6081_v49 }
 0x191   :  { %v1652_v46 = vunpack.c.l.b16 %v1223_v33  ;;  %v1140_v2 = vmul.f32 0.0625, %v809_v20  ;;  %v2564_v62 = vsel %vm1920_vm14, %v2563_v35, %v2559_v10  ;;  %v1653_v34 = vunpack.c.h.b16 %v1223_v33 }
 0x192   :  { %661 = vadd.xlane.f32.xlu1 %v6208_v54  ;;  %v2569_v50 = vsel %vm1927_vm15, %v2568_v12, %v2564_v62  ;;  %v1912_v10 = vrot.slane %v1635_v24, %v6084_v53  ;;  %v1907_v12 = vsel %vm1906_vm12, %v1905_v45, %v6309_v23  ;;  %v2391_v19 = vsel %vm1899_vm11, %v6320_v43, %v2386_v14  ;;  %v6655_v24 = vld [vmem:[#allocation9_spill] sm:$0xff] }
 0x193   :  { %v2001_v40 = vrot.slane %v1652_v46, %v6106_v0  ;;  %v1272_v29 = vpack.c.bf16 %v1141_v51, %v1140_v2  ;;  %658 = vadd.xlane.f32.xlu0 %v6211_v60  ;;  %v470_v13 = vpop.xlane.xlu1 %469  ;;  %v2819_v5 = vsel %vm2816_vm9, %v2569_v50, %v2086_v41  ;;  %v2006_v44 = vrot.slane %v1653_v34, %v6118_v27 }
 0x194   :  { %v1027_v37 = vmul.f32 0.0625, %v470_v13  ;;  %v467_v58 = vpop.xlane.xlu0 %466  ;;  %v6349_v54 = vpack.c.b16 %v2819_v5, %v2819_v5  ;;  %v2400_v51 = vrot.slane %v1733_v42, %v6084_v53  ;;  %v2396_v46 = vsel %vm1906_vm12, %v2395_v3, %v2391_v19 }
 0x195   :  { %v1750_v4 = vunpack.c.l.b16 %v1272_v29  ;;  %v1751_v25 = vunpack.c.h.b16 %v1272_v29  ;;  %v1026_v60 = vmul.f32 0.0625, %v467_v58  ;;  %v2002_v63 = vsel %vm1920_vm14, %v2001_v40, %v1997_v17 }
 0x196   :  { %3894 = vmatmul.mubr.bf16.vlgmr.msra.gmra.mxu1 %v6349_v54  ;;  %955 = vadd.xlane.f32.xlu1 %v6237_v1  ;;  %v2480_v1 = vsel %vm1913_vm13, %v2479_v52, %v2475_v16  ;;  %v2007_v22 = vsel %vm1927_vm15, %v2006_v44, %v2002_v63  ;;  %v1914_v34 = vsel %vm1913_vm13, %v1912_v10, %v1907_v12 }
 0x197   :  { %v2484_v30 = vrot.slane %v1750_v4, %v6106_v0  ;;  %v2489_v9 = vrot.slane %v1751_v25, %v6118_v27  ;;  %v1215_v7 = vpack.c.bf16 %v1027_v37, %v1026_v60  ;;  %952 = vadd.xlane.f32.xlu0 %v6301_v26  ;;  %v764_v18 = vpop.xlane.xlu1 %763  ;;  %3958 = vmatpush1.bf16.msra.mxu1 %v4995_v32  ;;  %v5046_v60 = vld [vmem:[#allocation2 + $0x4e0] ss:$16 sps:$4 sm:$0xff]  }
 0x198   :  { %v1125_v47 = vmul.f32 0.0625, %v764_v18  ;;  %v761_v6 = vpop.xlane.xlu0 %760  ;;  %3975 = vmatprep.mubr.bf16.mxu1 %v5242_v55  ;;  %3984 = vmatprep.subr.bf16.mxu1 %v5000_v39  ;;  %v2401_v17 = vsel %vm1913_vm13, %v2400_v51, %v2396_v46  ;;  %v5003_v51 = vld [vmem:[#allocation2 + $0xcc] ss:$16 sps:$4 sm:$0xff]  }
 0x199   :  { %v1636_v61 = vunpack.c.l.b16 %v1215_v7  ;;  %v1124_v36 = vmul.f32 0.0625, %v761_v6  ;;  %v2485_v26 = vsel %vm1920_vm14, %v2484_v30, %v2480_v1  ;;  %v1637_v35 = vunpack.c.h.b16 %v1215_v7  ;;  %v6656_v7 = vld [vmem:[#allocation10_spill] sm:$0xff] }
 0x19a   :  { %v2490_v48 = vsel %vm1927_vm15, %v2489_v9, %v2485_v26  ;;  %v5054_v9 = vld [vmem:[#allocation2 + $0x4c4] ss:$16 sps:$4 sm:$0xff]  }
 0x19b   :  { %v1919_v33 = vrot.slane %v1636_v61, %v6106_v0  ;;  %v1264_v59 = vpack.c.bf16 %v1125_v47, %v1124_v36  ;;  %v716_v38 = vpop.xlane.xlu1 %715  ;;  %v2818_v15 = vsel %vm2816_vm9, %v2490_v48, %v2007_v22  ;;  %v1926_v21 = vrot.slane %v1637_v35, %v6118_v27  ;;  %v5052_v36 = vld [vmem:[#allocation2 + $0x4c0] ss:$16 sps:$4 sm:$0xff]   ;;  %v5060_v35 = vld [vmem:[#allocation2 + $0x4a4] ss:$16 sps:$4 sm:$0xff]  }
 0x19c   :  { %v1109_v20 = vmul.f32 0.0625, %v716_v38  ;;  %v713_v56 = vpop.xlane.xlu0 %712  ;;  %v6379_v31 = vpack.c.b16 %v2818_v15, %v2818_v15 }
 0x19d   :  { %v1734_v2 = vunpack.c.l.b16 %v1264_v59  ;;  %v1735_v62 = vunpack.c.h.b16 %v1264_v59  ;;  %v1108_v23 = vmul.f32 0.0625, %v713_v56  ;;  %v1921_v29 = vsel %vm1920_vm14, %v1919_v33, %v1914_v34  ;;  %v4998_v33 = vld [vmem:[#allocation2 + $0xe8] ss:$16 sps:$4 sm:$0xff]  }
 0x19e   :  { %3852 = vmatprep.mubr.bf16.mxu0 %v6379_v31  ;;  %v1928_v16 = vsel %vm1927_vm15, %v1926_v21, %v1921_v29 }
 0x19f   :  { %v2405_v41 = vrot.slane %v1734_v2, %v6106_v0  ;;  %v2410_v43 = vrot.slane %v1735_v62, %v6118_v27  ;;  %v1256_v50 = vpack.c.bf16 %v1109_v20, %v1108_v23  ;;  %v1010_v40 = vpop.xlane.xlu1 %1009  ;;  %v5058_v20 = vld [vmem:[#allocation2 + $0x4a0] ss:$16 sps:$4 sm:$0xff]   ;;  %v5066_v2 = vld [vmem:[#allocation2 + $0x484] ss:$16 sps:$4 sm:$0xff]   ;;  %v5001_v23 = vld [vmem:[#allocation2 + $0xc8] ss:$16 sps:$4 sm:$0xff]  }
 0x1a0   :  { %v1207_v13 = vmul.f32 0.0625, %v1010_v40  ;;  %v1007_v5 = vpop.xlane.xlu0 %1006 }
 0x1a1   :  { %v1718_v32 = vunpack.c.l.b16 %v1256_v50  ;;  %v1719_v52 = vunpack.c.h.b16 %v1256_v50  ;;  %v1206_v37 = vmul.f32 0.0625, %v1007_v5  ;;  %v2406_v58 = vsel %vm1920_vm14, %v2405_v41, %v2401_v17  ;;  %v5006_v41 = vld [vmem:[#allocation2 + $0xac] ss:$16 sps:$4 sm:$0xff]   ;;  %v5072_v5 = vld [vmem:[#allocation2 + $0x464] ss:$16 sps:$4 sm:$0xff]  }
 0x1a2   :  { %v2411_v39 = vsel %vm1927_vm15, %v2410_v43, %v2406_v58  ;;  %v5064_v43 = vld [vmem:[#allocation2 + $0x480] ss:$16 sps:$4 sm:$0xff]  }
 0x1a3   :  { %v1305_v57 = vpack.c.bf16 %v1207_v13, %v1206_v37  ;;  %v668_v4 = vpop.xlane.xlu1 %667  ;;  %v2817_v25 = vsel %vm2816_vm9, %v2411_v39, %v1928_v16  ;;  %v2327_v45 = vrot.slane %v1718_v32, %v6655_v24  ;;  %v2331_v18 = vrot.slane %v1719_v52, %v6656_v7  ;;  %v5004_v32 = vld [vmem:[#allocation2 + $0xa8] ss:$16 sps:$4 sm:$0xff]   ;;  %v5070_v58 = vld [vmem:[#allocation2 + $0x460] ss:$16 sps:$4 sm:$0xff]  }
 0x1a4   :  { %v1093_v44 = vmul.f32 0.0625, %v668_v4  ;;  %v665_v63 = vpop.xlane.xlu0 %664  ;;  %v6394_v30 = vpack.c.b16 %v2817_v25, %v2817_v25  ;;  %v5078_v25 = vld [vmem:[#allocation2 + $0x444] ss:$16 sps:$4 sm:$0xff]  }
 0x1a5   :  { %v1816_v14 = vunpack.c.l.b16 %v1305_v57  ;;  %v1817_v42 = vunpack.c.h.b16 %v1305_v57  ;;  %v1092_v47 = vmul.f32 0.0625, %v665_v63  ;;  %v2332_v22 = vsel %vm1829_vm1, %v2331_v18, %v2327_v45  ;;  %v5007_v18 = vld [vmem:[#allocation2 + $0x88] ss:$16 sps:$4 sm:$0xff]  }
 0x1a6   :  { %3853 = vmatmul.mubr.bf16.vlgmr.msra.gmra.mxu0 %v6394_v30 }
 0x1a7   :  { %v2810_v6 = vrot.slane %v1816_v14, %v6655_v24  ;;  %v2814_v1 = vrot.slane %v1817_v42, %v6656_v7  ;;  %v1248_v3 = vpack.c.bf16 %v1093_v44, %v1092_v47  ;;  %v962_v61 = vpop.xlane.xlu1 %961  ;;  %3903 = vmatpush1.bf16.msra.mxu0 %v5046_v60  ;;  %v6657_v14 = vld [vmem:[#allocation11_spill] sm:$0xff]  ;;  %v6658_v47 = vld [vmem:[#allocation12_spill] sm:$0xff] }
 0x1a8   :  { %v1191_v26 = vmul.f32 0.0625, %v962_v61  ;;  %v959_v10 = vpop.xlane.xlu0 %958  ;;  %3904 = vmatprep.subr.bf16.mxu0 %v5054_v9  ;;  %v5012_v61 = vld [vmem:[#allocation2 + $0x6c] ss:$16 sps:$4 sm:$0xff]  }
 0x1a9   :  { %v2815_v48 = vsel %vm1829_vm1, %v2814_v1, %v2810_v6  ;;  %v1190_v12 = vmul.f32 0.0625, %v959_v10  ;;  %v1702_v50 = vunpack.c.l.b16 %v1248_v3  ;;  %v1703_v40 = vunpack.c.h.b16 %v1248_v3 }
 0x1aa   :  { %v2823_v59 = vsel %vm2816_vm9, %v2815_v48, %v2332_v22  ;;  %v5084_v22 = vld [vmem:[#allocation2 + $0x424] ss:$16 sps:$4 sm:$0xff]  }
 0x1ab   :  { %v6403_v38 = vpack.c.bf16 %v1191_v26, %v1190_v12  ;;  %v620_v15 = vpop.xlane.xlu1 %619  ;;  %v6405_v19 = vpack.c.b16 %v2823_v59, %v2823_v59  ;;  %3905 = vmatpush1.bf16.msra.mxu0 %v5052_v36  ;;  %v2248_v16 = vrot.slane %v1702_v50, %v6655_v24  ;;  %v2252_v39 = vrot.slane %v1703_v40, %v6656_v7  ;;  %v5076_v36 = vld [vmem:[#allocation2 + $0x440] ss:$16 sps:$4 sm:$0xff]  }
 0x1ac   :  { %v1077_v56 = vmul.f32 0.0625, %v620_v15  ;;  %v617_v46 = vpop.xlane.xlu0 %616  ;;  %3906 = vmatprep.subr.bf16.mxu0 %v5060_v35 }
 0x1ad   :  { %v1076_v62 = vmul.f32 0.0625, %v617_v46  ;;  %4402 = vmatmul.mubr.msk.bf16.vlgmr.msra.gmra.mxu1 %vm422_vm0, %v6405_v19  ;;  %v1800_v63 = vunpack.c.l.b16 %v6403_v38  ;;  %v1801_v9 = vunpack.c.h.b16 %v6403_v38  ;;  %v2253_v26 = vsel %vm1829_vm1, %v2252_v39, %v2248_v16  ;;  %v5015_v46 = vld [vmem:[#allocation2 + $0x4c] ss:$16 sps:$4 sm:$0xff]  }
 0x1ae   :  { %3985 = vmatpush1.bf16.msra.mxu1 %v4998_v33  ;;  %4016 = vmatprep.mubr.bf16.mxu1 %v6379_v31  ;;  %v5009_v31 = vld [vmem:[#allocation2 + $0x8c] ss:$16 sps:$4 sm:$0xff]  }
 0x1af   :  { %v6410_v21 = vpack.c.bf16 %v1077_v56, %v1076_v62  ;;  %v674_v34 = vpop.xlane.xlu1 %673  ;;  %3986 = vmatprep.subr.bf16.mxu1 %v5003_v51  ;;  %3907 = vmatpush1.bf16.msra.mxu0 %v5058_v20  ;;  %v2731_v33 = vrot.slane %v1800_v63, %v6655_v24  ;;  %v2735_v59 = vrot.slane %v1801_v9, %v6656_v7  ;;  %v5010_v51 = vld [vmem:[#allocation2 + $0x68] ss:$16 sps:$4 sm:$0xff]  }
 0x1b0   :  { %v1095_v29 = vmul.f32 0.0625, %v674_v34  ;;  %v671_v13 = vpop.xlane.xlu0 %670  ;;  %3908 = vmatprep.subr.bf16.mxu0 %v5066_v2  ;;  %v5082_v2 = vld [vmem:[#allocation2 + $0x420] ss:$16 sps:$4 sm:$0xff]  }
 0x1b1   :  { %v1094_v17 = vmul.f32 0.0625, %v671_v13  ;;  %v1686_v38 = vunpack.c.l.b16 %v6410_v21  ;;  %v1687_v62 = vunpack.c.h.b16 %v6410_v21  ;;  %v5018_v21 = vld [vmem:[#allocation2 + $0x2c] ss:$16 sps:$4 sm:$0xff]  }
 0x1b2   :  { %3987 = vmatpush1.bf16.msra.mxu1 %v5001_v23 }
 0x1b3   :  { %v1249_v52 = vpack.c.bf16 %v1095_v29, %v1094_v17  ;;  %v914_v37 = vpop.xlane.xlu1 %913  ;;  %3988 = vmatprep.subr.bf16.mxu1 %v5006_v41  ;;  %3909 = vmatpush1.bf16.msra.mxu0 %v5064_v43  ;;  %v5090_v41 = vld [vmem:[#allocation2 + $0x404] ss:$16 sps:$4 sm:$0xff]   ;;  %v2736_v29 = vsel %vm1829_vm1, %v2735_v59, %v2731_v33  ;;  %v2169_v13 = vrot.slane %v1686_v38, %v6655_v24 }
 0x1b4   :  { %v1175_v57 = vmul.f32 0.0625, %v914_v37  ;;  %v911_v4 = vpop.xlane.xlu0 %910  ;;  %3910 = vmatprep.subr.bf16.mxu0 %v5072_v5  ;;  %v5013_v5 = vld [vmem:[#allocation2 + $0x48] ss:$16 sps:$4 sm:$0xff]  }
 0x1b5   :  { %v1704_v60 = vunpack.c.l.b16 %v1249_v52  ;;  %v1705_v45 = vunpack.c.h.b16 %v1249_v52  ;;  %v1174_v44 = vmul.f32 0.0625, %v911_v4 }
 0x1b6   :  { %3989 = vmatpush1.bf16.msra.mxu1 %v5004_v32 }
 0x1b7   :  { %v2257_v42 = vrot.slane %v1704_v60, %v6657_v14  ;;  %v2262_v6 = vrot.slane %v1705_v45, %v6658_v47  ;;  %v6418_v1 = vpack.c.bf16 %v1175_v57, %v1174_v44  ;;  %v968_v3 = vpop.xlane.xlu1 %967  ;;  %3990 = vmatprep.subr.bf16.mxu1 %v5009_v31  ;;  %3911 = vmatpush1.bf16.msra.mxu0 %v5070_v58  ;;  %v5088_v31 = vld [vmem:[#allocation2 + $0x400] ss:$16 sps:$4 sm:$0xff]  }
 0x1b8   :  { %v1193_v10 = vmul.f32 0.0625, %v968_v3  ;;  %v965_v35 = vpop.xlane.xlu0 %964  ;;  %3912 = vmatprep.subr.bf16.mxu0 %v5078_v25  ;;  %v2173_v58 = vrot.slane %v1687_v62, %v6656_v7  ;;  %v5096_v25 = vld [vmem:[#allocation2 + $0x5e4] ss:$16 sps:$4 sm:$0xff]   ;;  %v5024_v62 = vld [vmem:[#allocation2 + $0x1ec] ss:$16 sps:$4 sm:$0xff]  }
 0x1b9   :  { %v2258_v48 = vsel %vm1836_vm2, %v2257_v42, %v2253_v26  ;;  %v1192_v12 = vmul.f32 0.0625, %v965_v35  ;;  %v1784_v16 = vunpack.c.l.b16 %v6418_v1  ;;  %v1785_v39 = vunpack.c.h.b16 %v6418_v1 }
 0x1ba   :  { %v6426_v15 = vsel %vm1843_vm3, %v2262_v6, %v2258_v48  ;;  %3991 = vmatpush1.bf16.msra.mxu1 %v5007_v18  ;;  %v5016_v18 = vld [vmem:[#allocation2 + $0x28] ss:$16 sps:$4 sm:$0xff]   ;;  %v2174_v26 = vsel %vm1829_vm1, %v2173_v58, %v2169_v13  ;;  %v5027_v58 = vld [vmem:[#allocation2 + $0x1cc] ss:$16 sps:$4 sm:$0xff]  }
 0x1bb   :  { %v1298_v20 = vpack.c.bf16 %v1193_v10, %v1192_v12  ;;  %v626_v56 = vpop.xlane.xlu1 %625  ;;  %3992 = vmatprep.subr.bf16.mxu1 %v5012_v61  ;;  %3913 = vmatpush1.bf16.msra.mxu0 %v5076_v36  ;;  %v5021_v61 = vld [vmem:[#allocation2 + $0xc] ss:$16 sps:$4 sm:$0xff]   ;;  %v5094_v36 = vld [vmem:[#allocation2 + $0x5e0] ss:$16 sps:$4 sm:$0xff]   ;;  %v2652_v10 = vrot.slane %v1784_v16, %v6655_v24  ;;  %v2656_v35 = vrot.slane %v1785_v39, %v6656_v7  ;;  %v5102_v12 = vld [vmem:[#allocation2 + $0x5c4] ss:$16 sps:$4 sm:$0xff]  }
 0x1bc   :  { %v1079_v23 = vmul.f32 0.0625, %v626_v56  ;;  %v623_v34 = vpop.xlane.xlu0 %622  ;;  %3914 = vmatprep.subr.bf16.mxu0 %v5084_v22  ;;  %v5019_v56 = vld [vmem:[#allocation2 + $0x8] ss:$16 sps:$4 sm:$0xff]   ;;  %v5106_v16 = vld [vmem:[#allocation2 + $0x5a0] ss:$16 sps:$4 sm:$0xff]  }
 0x1bd   :  { %v1802_v43 = vunpack.c.l.b16 %v1298_v20  ;;  %v1803_v50 = vunpack.c.h.b16 %v1298_v20  ;;  %v1078_v40 = vmul.f32 0.0625, %v623_v34  ;;  %v2657_v34 = vsel %vm1829_vm1, %v2656_v35, %v2652_v10  ;;  %v5120_v10 = vld [vmem:[#allocation2 + $0x564] ss:$16 sps:$4 sm:$0xff]  }
 0x1be   :  { %3993 = vmatpush1.bf16.msra.mxu1 %v5010_v51  ;;  %vm6665_vm1 = vcmask 654912  }
 0x1bf   :  { %v2740_v17 = vrot.slane %v1802_v43, %v6657_v14  ;;  %v2745_v32 = vrot.slane %v1803_v50, %v6658_v47  ;;  %v1241_v52 = vpack.c.bf16 %v1079_v23, %v1078_v40  ;;  %v920_v37 = vpop.xlane.xlu1 %919  ;;  %3994 = vmatprep.subr.bf16.mxu1 %v5015_v46  ;;  %3915 = vmatpush1.bf16.msra.mxu0 %v5082_v2  ;;  %v5100_v23 = vld [vmem:[#allocation2 + $0x5c0] ss:$16 sps:$4 sm:$0xff]   ;;  %v5108_v50 = vld [vmem:[#allocation2 + $0x5a4] ss:$16 sps:$4 sm:$0xff]  }
 0x1c0   :  { %v1177_v57 = vmul.f32 0.0625, %v920_v37  ;;  %v917_v4 = vpop.xlane.xlu0 %916  ;;  %3916 = vmatprep.subr.bf16.mxu0 %v5090_v41 }
 0x1c1   :  { %v2741_v60 = vsel %vm1836_vm2, %v2740_v17, %v2736_v29  ;;  %v1688_v45 = vunpack.c.l.b16 %v1241_v52  ;;  %v1689_v44 = vunpack.c.h.b16 %v1241_v52  ;;  %v1176_v63 = vmul.f32 0.0625, %v917_v4  ;;  %v6659_v17 = vld [vmem:[#allocation13_spill] sm:$0xff]  ;;  %v6660_v52 = vld [vmem:[#allocation14_spill] sm:$0xff] }
 0x1c2   :  { %v6438_v9 = vsel %vm1843_vm3, %v2745_v32, %v2741_v60  ;;  %3995 = vmatpush1.bf16.msra.mxu1 %v5013_v5  ;;  %v5114_v4 = vld [vmem:[#allocation2 + $0x584] ss:$16 sps:$4 sm:$0xff]  }
 0x1c3   :  { %v2178_v42 = vrot.slane %v1688_v45, %v6657_v14  ;;  %v2183_v6 = vrot.slane %v1689_v44, %v6658_v47  ;;  %v1290_v3 = vpack.c.bf16 %v1177_v57, %v1176_v63  ;;  %v680_v1 = vpop.xlane.xlu1 %679  ;;  %3996 = vmatprep.subr.bf16.mxu1 %v5018_v21  ;;  %3917 = vmatpush1.bf16.msra.mxu0 %v5088_v31 }
 0x1c4   :  { %v1097_v22 = vmul.f32 0.0625, %v680_v1  ;;  %v677_v48 = vpop.xlane.xlu0 %676  ;;  %3918 = vmatprep.subr.bf16.mxu0 %v5096_v25 }
 0x1c5   :  { %v2179_v33 = vsel %vm1836_vm2, %v2178_v42, %v2174_v26  ;;  %v1786_v59 = vunpack.c.l.b16 %v1290_v3  ;;  %v1787_v38 = vunpack.c.h.b16 %v1290_v3  ;;  %v1096_v51 = vmul.f32 0.0625, %v677_v48 }
 0x1c6   :  { %v6447_v20 = vsel %vm1843_vm3, %v2183_v6, %v2179_v33  ;;  %3997 = vmatpush1.bf16.msra.mxu1 %v5016_v18  ;;  %v5025_v18 = vld [vmem:[#allocation2 + $0x1c8] ss:$16 sps:$4 sm:$0xff]  }
 0x1c7   :  { %v2661_v46 = vrot.slane %v1786_v59, %v6657_v14  ;;  %v2666_v24 = vrot.slane %v1787_v38, %v6658_v47  ;;  %v1250_v2 = vpack.c.bf16 %v1097_v22, %v1096_v51  ;;  %v974_v7 = vpop.xlane.xlu1 %973  ;;  %3998 = vmatprep.subr.bf16.mxu1 %v5021_v61  ;;  %3919 = vmatpush2.bf16.msra.mxu0 %v5094_v36  ;;  %v5022_v47 = vld [vmem:[#allocation2 + $0x1e8] ss:$16 sps:$4 sm:$0xff]   ;;  %v5030_v61 = vld [vmem:[#allocation2 + $0x1ac] ss:$16 sps:$4 sm:$0xff]   ;;  %v5112_v36 = vld [vmem:[#allocation2 + $0x580] ss:$16 sps:$4 sm:$0xff]  }
 0x1c8   :  { %v1195_v41 = vmul.f32 0.0625, %v974_v7  ;;  %v971_v43 = vpop.xlane.xlu0 %970  ;;  %3920 = vmatprep.subr.bf16.mxu0 %v5102_v12  ;;  %v5028_v59 = vld [vmem:[#allocation2 + $0x1a8] ss:$16 sps:$4 sm:$0xff]   ;;  %v5126_v7 = vld [vmem:[#allocation2 + $0x544] ss:$16 sps:$4 sm:$0xff]  }
 0x1c9   :  { %v2662_v40 = vsel %vm1836_vm2, %v2661_v46, %v2657_v34  ;;  %v1706_v29 = vunpack.c.l.b16 %v1250_v2  ;;  %v1707_v13 = vunpack.c.h.b16 %v1250_v2  ;;  %v1194_v5 = vmul.f32 0.0625, %v971_v43  ;;  %v5118_v2 = vld [vmem:[#allocation2 + $0x560] ss:$16 sps:$4 sm:$0xff]   ;;  %v5031_v43 = vld [vmem:[#allocation2 + $0x188] ss:$16 sps:$4 sm:$0xff]   ;;  %vm6666_vm2 = vmmov %vm6665_vm1 }
 0x1ca   :  { %v6454_v14 = vsel %vm1843_vm3, %v2666_v24, %v2662_v40  ;;  %3999 = vmatpush1.bf16.msra.mxu1 %v5019_v56  ;;  %v5033_v24 = vld [vmem:[#allocation2 + $0x18c] ss:$16 sps:$4 sm:$0xff]   ;;  %vm6667_vm3 = vmmov %vm6665_vm1 }
 0x1cb   :  { %v2267_v32 = vrot.slane %v1706_v29, %v6659_v17  ;;  %v2272_v37 = vrot.slane %v1707_v13, %v6660_v52  ;;  %v1299_v21 = vpack.c.bf16 %v1195_v41, %v1194_v5  ;;  %v632_v31 = vpop.xlane.xlu1 %631  ;;  %4000 = vmatprep.subr.bf16.mxu1 %v5024_v62  ;;  %3921 = vmatpush2.bf16.msra.mxu0 %v5100_v23  ;;  %v5036_v13 = vld [vmem:[#allocation2 + $0x16c] ss:$16 sps:$4 sm:$0xff]   ;;  %v5124_v5 = vld [vmem:[#allocation2 + $0x540] ss:$16 sps:$4 sm:$0xff]  }
 0x1cc   :  { %v1081_v39 = vmul.f32 0.0625, %v632_v31  ;;  %v629_v57 = vpop.xlane.xlu0 %628  ;;  %3922 = vmatprep.subr.bf16.mxu0 %v5108_v50  ;;  %v5130_v31 = vld [vmem:[#allocation2 + $0x520] ss:$16 sps:$4 sm:$0xff]  }
 0x1cd   :  { %v2268_v25 = vsel %vm1850_vm4, %v2267_v32, %v6426_v15  ;;  %v1804_v60 = vunpack.c.l.b16 %v1299_v21  ;;  %v1805_v45 = vunpack.c.h.b16 %v1299_v21  ;;  %v1080_v44 = vmul.f32 0.0625, %v629_v57  ;;  %v5034_v21 = vld [vmem:[#allocation2 + $0x168] ss:$16 sps:$4 sm:$0xff]  }
 0x1ce   :  { %v6461_v63 = vsel %vm1857_vm5, %v2272_v37, %v2268_v25  ;;  %4001 = vmatpush2.bf16.msra.mxu1 %v5022_v47 }
 0x1cf   :  { %v2750_v42 = vrot.slane %v1804_v60, %v6659_v17  ;;  %v2755_v6 = vrot.slane %v1805_v45, %v6660_v52  ;;  %v1242_v3 = vpack.c.bf16 %v1081_v39, %v1080_v44  ;;  %v926_v1 = vpop.xlane.xlu1 %925  ;;  %4002 = vmatprep.subr.bf16.mxu1 %v5027_v58  ;;  %3923 = vmatpush2.bf16.msra.mxu0 %v5106_v16  ;;  %v5138_v16 = vld [vmem:[#allocation2 + $0x504] ss:$16 sps:$4 sm:$0xff]   ;;  %v5037_v39 = vld [vmem:[#allocation2 + $0x148] ss:$16 sps:$4 sm:$0xff]   ;;  %v5144_v60 = vld [vmem:[#allocation2 + $0x2ec] ss:$16 sps:$4 sm:$0xff]  }
 0x1d0   :  { %v1179_v26 = vmul.f32 0.0625, %v926_v1  ;;  %v923_v15 = vpop.xlane.xlu0 %922  ;;  %3924 = vmatprep.subr.bf16.mxu0 %v5114_v4  ;;  %v5042_v4 = vld [vmem:[#allocation2 + $0x12c] ss:$16 sps:$4 sm:$0xff]   ;;  %v5040_v45 = vld [vmem:[#allocation2 + $0x128] ss:$16 sps:$4 sm:$0xff]  }
 0x1d1   :  { %v2751_v35 = vsel %vm1850_vm4, %v2750_v42, %v6438_v9  ;;  %v1690_v22 = vunpack.c.l.b16 %v1242_v3  ;;  %v1691_v48 = vunpack.c.h.b16 %v1242_v3  ;;  %v1178_v12 = vmul.f32 0.0625, %v923_v15  ;;  %v5051_v1 = vld [vmem:[#allocation2 + $0x4ec] ss:$16 sps:$4 sm:$0xff]  }
 0x1d2   :  { %v6468_v33 = vsel %vm1857_vm5, %v2755_v6, %v2751_v35  ;;  %4003 = vmatpush2.bf16.msra.mxu1 %v5025_v18  ;;  %v5045_v18 = vld [vmem:[#allocation2 + $0x10c] ss:$16 sps:$4 sm:$0xff]   ;;  %v5043_v6 = vld [vmem:[#allocation2 + $0x108] ss:$16 sps:$4 sm:$0xff]  }
 0x1d3   :  { %v2188_v38 = vrot.slane %v1690_v22, %v6659_v17  ;;  %v2193_v51 = vrot.slane %v1691_v48, %v6660_v52  ;;  %v1291_v56 = vpack.c.bf16 %v1179_v26, %v1178_v12  ;;  %v6472_v46 = vpop.xlane.xlu1 %685  ;;  %4004 = vmatprep.subr.bf16.mxu1 %v5030_v61  ;;  %3925 = vmatpush2.bf16.msra.mxu0 %v5112_v36  ;;  %v5049_v36 = vld [vmem:[#allocation2 + $0x4e8] ss:$16 sps:$4 sm:$0xff]   ;;  %v5057_v15 = vld [vmem:[#allocation2 + $0x4cc] ss:$16 sps:$4 sm:$0xff]  }
 0x1d4   :  { %v6474_v9 = vpop.xlane.xlu0 %682  ;;  %3926 = vmatprep.subr.bf16.mxu0 %v5120_v10  ;;  %v5055_v35 = vld [vmem:[#allocation2 + $0x4c8] ss:$16 sps:$4 sm:$0xff]   ;;  %v5063_v48 = vld [vmem:[#allocation2 + $0x4ac] ss:$16 sps:$4 sm:$0xff]  }
 0x1d5   :  { %v2189_v62 = vsel %vm1850_vm4, %v2188_v38, %v6447_v20  ;;  %v1788_v23 = vunpack.c.l.b16 %v1291_v56  ;;  %v1789_v34 = vunpack.c.h.b16 %v1291_v56  ;;  %v5132_v20 = vld [vmem:[#allocation2 + $0x524] ss:$16 sps:$4 sm:$0xff]   ;;  %v1099_v38 = vmul.f32 0.0625, %v6472_v46 }
 0x1d6   :  { %v6479_v41 = vsel %vm1857_vm5, %v2193_v51, %v2189_v62  ;;  %4005 = vmatpush2.bf16.msra.mxu1 %v5028_v59  ;;  %v5061_v59 = vld [vmem:[#allocation2 + $0x4a8] ss:$16 sps:$4 sm:$0xff]   ;;  %v1098_v51 = vmul.f32 0.0625, %v6474_v9 }
 0x1d7   :  { %v2671_v50 = vrot.slane %v1788_v23, %v6659_v17  ;;  %v2676_v40 = vrot.slane %v1789_v34, %v6660_v52  ;;  %v6483_v29 = vpop.xlane.xlu1 %979  ;;  %4006 = vmatprep.subr.bf16.mxu1 %v5033_v24  ;;  %3927 = vmatpush2.bf16.msra.mxu0 %v5118_v2  ;;  %v5039_v52 = vld [vmem:[#allocation2 + $0x14c] ss:$16 sps:$4 sm:$0xff]   ;;  %v5067_v34 = vld [vmem:[#allocation2 + $0x488] ss:$16 sps:$4 sm:$0xff]  }
 0x1d8   :  { %v977_v47 = vpop.xlane.xlu0 %976  ;;  %3928 = vmatprep.subr.bf16.mxu0 %v5126_v7  ;;  %v5069_v24 = vld [vmem:[#allocation2 + $0x48c] ss:$16 sps:$4 sm:$0xff]   ;;  %v1197_v2 = vmul.f32 0.0625, %v6483_v29  ;;  %v5073_v29 = vld [vmem:[#allocation2 + $0x468] ss:$16 sps:$4 sm:$0xff]  }
 0x1d9   :  { %v2672_v32 = vsel %vm1850_vm4, %v2671_v50, %v6454_v14  ;;  %v5136_v14 = vld [vmem:[#allocation2 + $0x500] ss:$16 sps:$4 sm:$0xff]   ;;  %v1196_v7 = vmul.f32 0.0625, %v977_v47  ;;  %vm6668_vm4 = vmmov %vm6665_vm1 }
 0x1da   :  { %v6488_v37 = vsel %vm1857_vm5, %v2676_v40, %v2672_v32  ;;  %4007 = vmatpush2.bf16.msra.mxu1 %v5031_v43  ;;  %v1251_v43 = vpack.c.bf16 %v1099_v38, %v1098_v51  ;;  %v5075_v40 = vld [vmem:[#allocation2 + $0x46c] ss:$16 sps:$4 sm:$0xff]  }
 0x1db   :  { %v638_v17 = vpop.xlane.xlu1 %637  ;;  %4008 = vmatprep.subr.bf16.mxu1 %v5036_v13  ;;  %3929 = vmatpush2.bf16.msra.mxu0 %v5124_v5  ;;  %v1300_v13 = vpack.c.bf16 %v1197_v2, %v1196_v7 }
 0x1dc   :  { %v635_v58 = vpop.xlane.xlu0 %634  ;;  %3930 = vmatprep.subr.bf16.mxu0 %v5132_v20  ;;  %v1083_v62 = vmul.f32 0.0625, %v638_v17  ;;  %v1708_v47 = vunpack.c.l.b16 %v1251_v43 }
 0x1de   :  { %4009 = vmatpush2.bf16.msra.mxu1 %v5034_v21 }
 0x1df   :  { %v932_v57 = vpop.xlane.xlu1 %931  ;;  %4010 = vmatprep.subr.bf16.mxu1 %v5039_v52  ;;  %3931 = vmatpush2.bf16.msra.mxu0 %v5130_v31  ;;  %v5081_v52 = vld [vmem:[#allocation2 + $0x44c] ss:$16 sps:$4 sm:$0xff]   ;;  %v1806_v31 = vunpack.c.l.b16 %v1300_v13 }
 0x1e0   :  { %v929_v25 = vpop.xlane.xlu0 %928  ;;  %3932 = vmatprep.subr.bf16.mxu0 %v5138_v16  ;;  %v1181_v5 = vmul.f32 0.0625, %v932_v57  ;;  %v5079_v57 = vld [vmem:[#allocation2 + $0x448] ss:$16 sps:$4 sm:$0xff]  }
 0x1e1   :  { %v1180_v9 = vmul.f32 0.0625, %v929_v25  ;;  %v6661_v25 = vld [vmem:[#allocation15_spill] sm:$0xff] }
 0x1e2   :  { %4011 = vmatpush2.bf16.msra.mxu1 %v5037_v39 }
 0x1e3   :  { %v692_v44 = vpop.xlane.xlu1 %691  ;;  %4012 = vmatprep.subr.bf16.mxu1 %v5042_v4  ;;  %3933 = vmatpush2.bf16.msra.mxu0 %v5136_v14  ;;  %v1292_v16 = vpack.c.bf16 %v1181_v5, %v1180_v9  ;;  %v1709_v4 = vunpack.c.h.b16 %v1251_v43 }
 0x1e4   :  { %v689_v42 = vpop.xlane.xlu0 %688  ;;  %4025 = vmatprep.subr.bf16.mxu0 %v5144_v60  ;;  %v1101_v32 = vmul.f32 0.0625, %v692_v44  ;;  %v1807_v44 = vunpack.c.h.b16 %v1300_v13  ;;  %v5093_v13 = vld [vmem:[#allocation2 + $0x40c] ss:$16 sps:$4 sm:$0xff]  }
 0x1e5   :  { %v1100_v21 = vmul.f32 0.0625, %v689_v42 }
 0x1e6   :  { %4013 = vmatpush2.bf16.msra.mxu1 %v5040_v45 }
 0x1e7   :  { %v986_v3 = vpop.xlane.xlu1 %985  ;;  %4014 = vmatprep.subr.bf16.mxu1 %v5045_v18  ;;  %v1252_v14 = vpack.c.bf16 %v1101_v32, %v1100_v21  ;;  %v2277_v18 = vrot.slane %v1708_v47, %v6661_v25  ;;  %v6663_v21 = vld [vmem:[#allocation17_spill] sm:$0xff] }
 0x1e8   :  { %v983_v61 = vpop.xlane.xlu0 %982  ;;  %v1199_v60 = vmul.f32 0.0625, %v986_v3 }
 0x1e9   :  { %v1198_v45 = vmul.f32 0.0625, %v983_v61  ;;  %v1710_v2 = vunpack.c.l.b16 %v1252_v14  ;;  %v1711_v5 = vunpack.c.h.b16 %v1252_v14 }
 0x1ea   :  { %4015 = vmatpush2.bf16.msra.mxu1 %v5043_v6 }
 0x1eb   :  { %v644_v26 = vpop.xlane.xlu1 %643  ;;  %4066 = vmatprep.subr.bf16.mxu1 %v5051_v1  ;;  %v1301_v7 = vpack.c.bf16 %v1199_v60, %v1198_v45 }
 0x1ec   :  { %v641_v10 = vpop.xlane.xlu0 %640  ;;  %v1085_v42 = vmul.f32 0.0625, %v644_v26  ;;  %v5085_v26 = vld [vmem:[#allocation2 + $0x428] ss:$16 sps:$4 sm:$0xff]  }
 0x1ed   :  { %4017 = vmatmul.mubr.bf16.vlgmr.msra.gmra.mxu1 %v6394_v30  ;;  %v1082_v30 = vmul.f32 0.0625, %v635_v58  ;;  %v1084_v6 = vmul.f32 0.0625, %v641_v10  ;;  %v2278_v10 = vsel %vm1864_vm6, %v2277_v18, %v6461_v63  ;;  %v1808_v47 = vunpack.c.l.b16 %v1301_v7  ;;  %v6664_v18 = vld [vmem:[#allocation18_spill] sm:$0xff] }
 0x1ee   :  { %4067 = vmatpush1.bf16.msra.mxu1 %v5049_v36  ;;  %v5087_v36 = vld [vmem:[#allocation2 + $0x42c] ss:$16 sps:$4 sm:$0xff]  }
 0x1ef   :  { %v938_v22 = vpop.xlane.xlu1 %937  ;;  %4068 = vmatprep.subr.bf16.mxu1 %v5057_v15  ;;  %v1243_v46 = vpack.c.bf16 %v1083_v62, %v1082_v30  ;;  %v2760_v15 = vrot.slane %v1806_v31, %v6661_v25  ;;  %v6662_v62 = vld [vmem:[#allocation16_spill] sm:$0xff]  ;;  %v1244_v43 = vpack.c.bf16 %v1085_v42, %v1084_v6  ;;  %v1809_v42 = vunpack.c.h.b16 %v1301_v7 }
 0x1f0   :  { %v935_v12 = vpop.xlane.xlu0 %934  ;;  %v1183_v3 = vmul.f32 0.0625, %v938_v22  ;;  %v2282_v30 = vrot.slane %v1709_v4, %v6662_v62 }
 0x1f1   :  { %v1692_v58 = vunpack.c.l.b16 %v1243_v46  ;;  %v1182_v61 = vmul.f32 0.0625, %v935_v12  ;;  %v2761_v22 = vsel %vm1864_vm6, %v2760_v15, %v6468_v33  ;;  %v5091_v33 = vld [vmem:[#allocation2 + $0x408] ss:$16 sps:$4 sm:$0xff]   ;;  %v1695_v15 = vunpack.c.h.b16 %v1244_v43 }
 0x1f2   :  { %4069 = vmatpush1.bf16.msra.mxu1 %v5055_v35  ;;  %v1693_v35 = vunpack.c.h.b16 %v1243_v46 }
 0x1f3   :  { %v698_v56 = vpop.xlane.xlu1 %697  ;;  %4070 = vmatprep.subr.bf16.mxu1 %v5063_v48  ;;  %v2198_v48 = vrot.slane %v1692_v58, %v6661_v25  ;;  %v1293_v9 = vpack.c.bf16 %v1183_v3, %v1182_v61  ;;  %v2283_v58 = vsel %vm1871_vm7, %v2282_v30, %v2278_v10 }
 0x1f4   :  { %v695_v23 = vpop.xlane.xlu0 %694  ;;  %v1103_v51 = vmul.f32 0.0625, %v698_v56  ;;  %v2203_v12 = vrot.slane %v1693_v35, %v6662_v62  ;;  %v1791_v56 = vunpack.c.h.b16 %v1292_v16 }
 0x1f5   :  { %v2199_v63 = vsel %vm1864_vm6, %v2198_v48, %v6479_v41  ;;  %v1792_v6 = vunpack.c.l.b16 %v1293_v9  ;;  %v5097_v48 = vld [vmem:[#allocation2 + $0x5e8] ss:$16 sps:$4 sm:$0xff]  }
 0x1f6   :  { %4071 = vmatpush1.bf16.msra.mxu1 %v5061_v59  ;;  %v1790_v59 = vunpack.c.l.b16 %v1292_v16  ;;  %v1694_v16 = vunpack.c.l.b16 %v1244_v43  ;;  %v2204_v14 = vsel %vm1871_vm7, %v2203_v12, %v2199_v63  ;;  %v2213_v12 = vrot.slane %v1695_v15, %v6664_v18 }
 0x1f7   :  { %v6494_v50 = vpop.xlane.xlu1 %991  ;;  %4072 = vmatprep.subr.bf16.mxu1 %v5069_v24  ;;  %v1102_v24 = vmul.f32 0.0625, %v695_v23  ;;  %v2691_v43 = vrot.slane %v1792_v6, %v6663_v21 }
 0x1f8   :  { %v989_v20 = vpop.xlane.xlu0 %988  ;;  %v2681_v23 = vrot.slane %v1790_v59, %v6661_v25  ;;  %v2208_v59 = vrot.slane %v1694_v16, %v6663_v21 }
 0x1f9   :  { %v1253_v32 = vpack.c.bf16 %v1103_v51, %v1102_v24  ;;  %v1200_v31 = vmul.f32 0.0625, %v989_v20  ;;  %v5105_v24 = vld [vmem:[#allocation2 + $0x5cc] ss:$16 sps:$4 sm:$0xff]  }
 0x1fa   :  { %4073 = vmatpush1.bf16.msra.mxu1 %v5067_v34  ;;  %v2765_v34 = vrot.slane %v1807_v44, %v6662_v62  ;;  %v2682_v25 = vsel %vm1864_vm6, %v2681_v23, %v6488_v37  ;;  %v2292_v44 = vrot.slane %v1711_v5, %v6664_v18  ;;  %v5103_v23 = vld [vmem:[#allocation2 + $0x5c8] ss:$16 sps:$4 sm:$0xff]  }
 0x1fb   :  { %v650_v17 = vpop.xlane.xlu1 %649  ;;  %4074 = vmatprep.subr.bf16.mxu1 %v5075_v40  ;;  %v1713_v7 = vunpack.c.h.b16 %v1253_v32 }
 0x1fc   :  { %v647_v39 = vpop.xlane.xlu0 %646  ;;  %v1087_v4 = vmul.f32 0.0625, %v650_v17  ;;  %v2766_v41 = vsel %vm1871_vm7, %v2765_v34, %v2761_v22  ;;  %v2775_v34 = vrot.slane %v1809_v42, %v6664_v18 }
 0x1fd   :  { %v1086_v60 = vmul.f32 0.0625, %v647_v39  ;;  %v2770_v39 = vrot.slane %v1808_v47, %v6663_v21 }
 0x1fe   :  { %4075 = vmatpush1.bf16.msra.mxu1 %v5073_v29  ;;  %v2287_v29 = vrot.slane %v1710_v2, %v6663_v21  ;;  %v1793_v2 = vunpack.c.h.b16 %v1293_v9  ;;  %v5111_v21 = vld [vmem:[#allocation2 + $0x5ac] ss:$16 sps:$4 sm:$0xff]  }
 0x1ff   :  { %v6497_v1 = vpop.xlane.xlu1 %943  ;;  %4076 = vmatprep.subr.bf16.mxu1 %v5081_v52  ;;  %v1201_v52 = vmul.f32 0.0625, %v6494_v50  ;;  %v2686_v50 = vrot.slane %v1791_v56, %v6662_v62  ;;  %v1245_v3 = vpack.c.bf16 %v1087_v4, %v1086_v60 }
 0x200   :  { %v6501_v38 = vpop.xlane.xlu0 %940  ;;  %v2288_v17 = vsel %vm1878_vm8, %v2287_v29, %v2283_v58  ;;  %v1185_v63 = vmul.f32 0.0625, %v6497_v1  ;;  %v2209_v29 = vsel %vm1878_vm8, %v2208_v59, %v2204_v14  ;;  %v2696_v47 = vrot.slane %v1793_v2, %v6664_v18 }
 0x201   :  { %v1302_v35 = vpack.c.bf16 %v1201_v52, %v1200_v31  ;;  %v2687_v30 = vsel %vm1871_vm7, %v2686_v50, %v2682_v25  ;;  %v2293_v22 = vsel %vm6665_vm1, %v2292_v44, %v2288_v17  ;;  %v1184_v5 = vmul.f32 0.0625, %v6501_v38  ;;  %v5117_v44 = vld [vmem:[#allocation2 + $0x58c] ss:$16 sps:$4 sm:$0xff]  }
 0x202   :  { %4077 = vmatpush1.bf16.msra.mxu1 %v5079_v57  ;;  %v5099_v57 = vld [vmem:[#allocation2 + $0x5ec] ss:$16 sps:$4 sm:$0xff]   ;;  %v2302_v52 = vrot.slane %v1713_v7, %v5931_v28  ;;  %v2692_v16 = vsel %vm1878_vm8, %v2691_v43, %v2687_v30  ;;  %v1697_v60 = vunpack.c.h.b16 %v1245_v3  ;;  %v2214_v14 = vsel %vm6667_vm3, %v2213_v12, %v2209_v29 }
 0x203   :  { %v704_v40 = vpop.xlane.xlu1 %703  ;;  %4078 = vmatprep.subr.bf16.mxu1 %v5087_v36  ;;  %v1712_v36 = vunpack.c.l.b16 %v1253_v32  ;;  %v1810_v56 = vunpack.c.l.b16 %v1302_v35  ;;  %v1811_v38 = vunpack.c.h.b16 %v1302_v35  ;;  %v1294_v50 = vpack.c.bf16 %v1185_v63, %v1184_v5  ;;  %v5123_v30 = vld [vmem:[#allocation2 + $0x56c] ss:$16 sps:$4 sm:$0xff]  }
 0x204   :  { %v701_v46 = vpop.xlane.xlu0 %700  ;;  %v1105_v37 = vmul.f32 0.0625, %v704_v40  ;;  %v2771_v40 = vsel %vm1878_vm8, %v2770_v39, %v2766_v41  ;;  %v5109_v41 = vld [vmem:[#allocation2 + $0x5a8] ss:$16 sps:$4 sm:$0xff]   ;;  %v6546_v42 = vsel %vm6668_vm4, %v2696_v47, %v2692_v16 }
 0x205   :  { %v1104_v61 = vmul.f32 0.0625, %v701_v46  ;;  %v1696_v46 = vunpack.c.l.b16 %v1245_v3  ;;  %v2776_v58 = vsel %vm6666_vm2, %v2775_v34, %v2771_v40  ;;  %v2780_v4 = vrot.slane %v1810_v56, %v5928_v11 }
 0x206   :  { %4079 = vmatpush1.bf16.msra.mxu1 %v5085_v26  ;;  %v2785_v15 = vrot.slane %v1811_v38, %v5931_v28  ;;  %v1794_v7 = vunpack.c.l.b16 %v1294_v50  ;;  %v1795_v34 = vunpack.c.h.b16 %v1294_v50 }
 0x207   :  { %v998_v45 = vpop.xlane.xlu1 %997  ;;  %4080 = vmatprep.subr.bf16.mxu1 %v5093_v13  ;;  %v2297_v13 = vrot.slane %v1712_v36, %v5928_v11  ;;  %v1254_v9 = vpack.c.bf16 %v1105_v37, %v1104_v61  ;;  %v2218_v25 = vrot.slane %v1696_v46, %v5928_v11  ;;  %v2781_v3 = vsel %vm1892_vm10, %v2780_v4, %v2776_v58  ;;  %v5129_v58 = vld [vmem:[#allocation2 + $0x54c] ss:$16 sps:$4 sm:$0xff]  }
 0x208   :  { %v995_v20 = vpop.xlane.xlu0 %994  ;;  %v1203_v26 = vmul.f32 0.0625, %v998_v45  ;;  %v2223_v37 = vrot.slane %v1697_v60, %v5931_v28  ;;  %v2786_v12 = vsel %vm1899_vm11, %v2785_v15, %v2781_v3  ;;  %v2701_v29 = vrot.slane %v1794_v7, %v5928_v11 }
 0x209   :  { %v1202_v10 = vmul.f32 0.0625, %v995_v20  ;;  %v2298_v1 = vsel %vm1892_vm10, %v2297_v13, %v2293_v22  ;;  %v1714_v20 = vunpack.c.l.b16 %v1254_v9  ;;  %v1715_v61 = vunpack.c.h.b16 %v1254_v9 }
 0x20a   :  { %4081 = vmatpush1.bf16.msra.mxu1 %v5091_v33  ;;  %v2303_v6 = vsel %vm1899_vm11, %v2302_v52, %v2298_v1  ;;  %v2219_v2 = vsel %vm1892_vm10, %v2218_v25, %v2214_v14  ;;  %v2706_v16 = vrot.slane %v1795_v34, %v5931_v28  ;;  %v2702_v15 = vsel %vm1892_vm10, %v2701_v29, %v6546_v42 }
 0x20b   :  { %v656_v51 = vpop.xlane.xlu1 %655  ;;  %4082 = vmatprep.subr.bf16.mxu1 %v5099_v57  ;;  %v6537_v31 = vpack.c.bf16 %v1203_v26, %v1202_v10  ;;  %v2307_v26 = vrot.slane %v1714_v20, %v6081_v49  ;;  %v2224_v63 = vsel %vm1899_vm11, %v2223_v37, %v2219_v2  ;;  %v2312_v5 = vrot.slane %v1715_v61, %v6084_v53  ;;  %v5127_v20 = vld [vmem:[#allocation2 + $0x548] ss:$16 sps:$4 sm:$0xff]  }
 0x20c   :  { %v653_v62 = vpop.xlane.xlu0 %652  ;;  %v1089_v45 = vmul.f32 0.0625, %v656_v51 }
 0x20d   :  { %v1088_v57 = vmul.f32 0.0625, %v653_v62  ;;  %v1812_v36 = vunpack.c.l.b16 %v6537_v31  ;;  %v1813_v43 = vunpack.c.h.b16 %v6537_v31  ;;  %v2308_v47 = vsel %vm1906_vm12, %v2307_v26, %v2303_v6 }
 0x20e   :  { %4083 = vmatpush2.bf16.msra.mxu1 %v5097_v48  ;;  %v2313_v28 = vsel %vm1913_vm13, %v2312_v5, %v2308_v47 }
 0x20f   :  { %v950_v32 = vpop.xlane.xlu1 %949  ;;  %4084 = vmatprep.subr.bf16.mxu1 %v5105_v24  ;;  %v6553_v51 = vpack.c.bf16 %v1089_v45, %v1088_v57  ;;  %v5115_v24 = vld [vmem:[#allocation2 + $0x588] ss:$16 sps:$4 sm:$0xff]   ;;  %v2790_v13 = vrot.slane %v1812_v36, %v6081_v49  ;;  %v2795_v38 = vrot.slane %v1813_v43, %v6084_v53  ;;  %v2707_v43 = vsel %vm1899_vm11, %v2706_v16, %v2702_v15  ;;  %v5147_v16 = vld [vmem:[#allocation2 + $0x2cc] ss:$16 sps:$4 sm:$0xff]  }
 0x210   :  { %v947_v33 = vpop.xlane.xlu0 %946  ;;  %v1187_v35 = vmul.f32 0.0625, %v950_v32 }
 0x211   :  { %v1186_v48 = vmul.f32 0.0625, %v947_v33  ;;  %v1698_v9 = vunpack.c.l.b16 %v6553_v51  ;;  %v2791_v1 = vsel %vm1906_vm12, %v2790_v13, %v2786_v12  ;;  %v1699_v14 = vunpack.c.h.b16 %v6553_v51 }
 0x212   :  { %4085 = vmatpush2.bf16.msra.mxu1 %v5103_v23  ;;  %v2796_v3 = vsel %vm1913_vm13, %v2795_v38, %v2791_v1  ;;  %v5148_v1 = vld [vmem:[#allocation2 + $0x2a8] ss:$16 sps:$4 sm:$0xff]   ;;  %v5153_v38 = vld [vmem:[#allocation2 + $0x28c] ss:$16 sps:$4 sm:$0xff]  }
 0x213   :  { %v710_v18 = vpop.xlane.xlu1 %709  ;;  %4086 = vmatprep.subr.bf16.mxu1 %v5111_v21  ;;  %v1295_v56 = vpack.c.bf16 %v1187_v35, %v1186_v48  ;;  %v5121_v21 = vld [vmem:[#allocation2 + $0x568] ss:$16 sps:$4 sm:$0xff]   ;;  %v2228_v25 = vrot.slane %v1698_v9, %v6081_v49  ;;  %v2233_v2 = vrot.slane %v1699_v14, %v6084_v53  ;;  %v5165_v14 = vld [vmem:[#allocation2 + $0x20c] ss:$16 sps:$4 sm:$0xff]  }
 0x214   :  { %v1107_v17 = vmul.f32 0.0625, %v710_v18  ;;  %v707_v39 = vpop.xlane.xlu0 %706 }
 0x215   :  { %v1106_v59 = vmul.f32 0.0625, %v707_v39  ;;  %v1796_v45 = vunpack.c.l.b16 %v1295_v56  ;;  %v5135_v39 = vld [vmem:[#allocation2 + $0x52c] ss:$16 sps:$4 sm:$0xff]   ;;  %v1797_v35 = vunpack.c.h.b16 %v1295_v56  ;;  %v2229_v42 = vsel %vm1906_vm12, %v2228_v25, %v2224_v63  ;;  %v5163_v25 = vld [vmem:[#allocation2 + $0x208] ss:$16 sps:$4 sm:$0xff]  }
 0x216   :  { %4087 = vmatpush2.bf16.msra.mxu1 %v5109_v41 }
 0x217   :  { %v1255_v10 = vpack.c.bf16 %v1107_v17, %v1106_v59  ;;  %v1004_v62 = vpop.xlane.xlu1 %1003  ;;  %4088 = vmatprep.subr.bf16.mxu1 %v5117_v44  ;;  %v2711_v37 = vrot.slane %v1796_v45, %v6081_v49  ;;  %v5133_v49 = vld [vmem:[#allocation2 + $0x528] ss:$16 sps:$4 sm:$0xff]   ;;  %v2716_v13 = vrot.slane %v1797_v35, %v6084_v53  ;;  %v5180_v35 = vld [vmem:[#allocation2 + $0x36c] ss:$16 sps:$4 sm:$0xff]  }
 0x218   :  { %v1205_v22 = vmul.f32 0.0625, %v1004_v62  ;;  %v1001_v40 = vpop.xlane.xlu0 %1000  ;;  %v5139_v53 = vld [vmem:[#allocation2 + $0x508] ss:$16 sps:$4 sm:$0xff]  }
 0x219   :  { %v1716_v23 = vunpack.c.l.b16 %v1255_v10  ;;  %v1204_v46 = vmul.f32 0.0625, %v1001_v40  ;;  %v1717_v32 = vunpack.c.h.b16 %v1255_v10  ;;  %v5141_v40 = vld [vmem:[#allocation2 + $0x50c] ss:$16 sps:$4 sm:$0xff]   ;;  %v2712_v12 = vsel %vm1906_vm12, %v2711_v37, %v2707_v43  ;;  %v5154_v45 = vld [vmem:[#allocation2 + $0x268] ss:$16 sps:$4 sm:$0xff]  }
 0x21a   :  { %4089 = vmatpush2.bf16.msra.mxu1 %v5115_v24  ;;  %v5183_v37 = vld [vmem:[#allocation2 + $0x34c] ss:$16 sps:$4 sm:$0xff]   ;;  %v5187_v43 = vld [vmem:[#allocation2 + $0x308] ss:$16 sps:$4 sm:$0xff]  }
 0x21b   :  { %v2317_v52 = vrot.slane %v1716_v23, %v6106_v0  ;;  %v1304_v31 = vpack.c.bf16 %v1205_v22, %v1204_v46  ;;  %v662_v33 = vpop.xlane.xlu1 %661  ;;  %4090 = vmatprep.subr.bf16.mxu1 %v5123_v30  ;;  %v2322_v50 = vrot.slane %v1717_v32, %v6118_v27  ;;  %v2234_v46 = vsel %vm1913_vm13, %v2233_v2, %v2229_v42  ;;  %v5186_v2 = vld [vmem:[#allocation2 + $0x32c] ss:$16 sps:$4 sm:$0xff]  }
 0x21c   :  { %v1091_v4 = vmul.f32 0.0625, %v662_v33  ;;  %v659_v60 = vpop.xlane.xlu0 %658 }
 0x21d   :  { %v1814_v57 = vunpack.c.l.b16 %v1304_v31  ;;  %v1815_v41 = vunpack.c.h.b16 %v1304_v31  ;;  %v1090_v11 = vmul.f32 0.0625, %v659_v60  ;;  %v2318_v17 = vsel %vm1920_vm14, %v2317_v52, %v2313_v28  ;;  %v5142_v31 = vld [vmem:[#allocation2 + $0x2e8] ss:$16 sps:$4 sm:$0xff]   ;;  %v5156_v60 = vld [vmem:[#allocation2 + $0x26c] ss:$16 sps:$4 sm:$0xff]  }
 0x21e   :  { %4091 = vmatpush2.bf16.msra.mxu1 %v5121_v21  ;;  %v2323_v26 = vsel %vm1927_vm15, %v2322_v50, %v2318_v17  ;;  %v2717_v21 = vsel %vm1913_vm13, %v2716_v13, %v2712_v12  ;;  %v5168_v50 = vld [vmem:[#allocation2 + $0x3ec] ss:$16 sps:$4 sm:$0xff]  }
 0x21f   :  { %v2800_v18 = vrot.slane %v1814_v57, %v6106_v0  ;;  %v2805_v44 = vrot.slane %v1815_v41, %v6118_v27  ;;  %v1247_v6 = vpack.c.bf16 %v1091_v4, %v1090_v11  ;;  %v956_v36 = vpop.xlane.xlu1 %955  ;;  %4092 = vmatprep.subr.bf16.mxu1 %v5129_v58  ;;  %v5151_v4 = vld [vmem:[#allocation2 + $0x288] ss:$16 sps:$4 sm:$0xff]   ;;  %v5159_v57 = vld [vmem:[#allocation2 + $0x24c] ss:$16 sps:$4 sm:$0xff]  }
 0x220   :  { %v1189_v48 = vmul.f32 0.0625, %v956_v36  ;;  %v953_v59 = vpop.xlane.xlu0 %952  ;;  %v5157_v41 = vld [vmem:[#allocation2 + $0x248] ss:$16 sps:$4 sm:$0xff]   ;;  %v5162_v11 = vld [vmem:[#allocation2 + $0x22c] ss:$16 sps:$4 sm:$0xff]  }
 0x221   :  { %v1700_v61 = vunpack.c.l.b16 %v1247_v6  ;;  %v1188_v51 = vmul.f32 0.0625, %v953_v59  ;;  %v2801_v24 = vsel %vm1920_vm14, %v2800_v18, %v2796_v3  ;;  %v1701_v7 = vunpack.c.h.b16 %v1247_v6  ;;  %v5171_v28 = vld [vmem:[#allocation2 + $0x3cc] ss:$16 sps:$4 sm:$0xff]   ;;  %v5169_v18 = vld [vmem:[#allocation2 + $0x3c8] ss:$16 sps:$4 sm:$0xff]  }
 0x222   :  { %4093 = vmatpush2.bf16.msra.mxu1 %v5127_v20  ;;  %v2806_v10 = vsel %vm1927_vm15, %v2805_v44, %v2801_v24  ;;  %v5166_v20 = vld [vmem:[#allocation2 + $0x3e8] ss:$16 sps:$4 sm:$0xff]   ;;  %v5174_v44 = vld [vmem:[#allocation2 + $0x3ac] ss:$16 sps:$4 sm:$0xff]  }
 0x223   :  { %v2238_v62 = vrot.slane %v1700_v61, %v6106_v0  ;;  %v1296_v30 = vpack.c.bf16 %v1189_v48, %v1188_v51  ;;  %v2822_v34 = vsel %vm2816_vm9, %v2806_v10, %v2323_v26  ;;  %4094 = vmatprep.subr.bf16.mxu1 %v5135_v39  ;;  %v2243_v63 = vrot.slane %v1701_v7, %v6118_v27  ;;  %v5172_v6 = vld [vmem:[#allocation2 + $0x3a8] ss:$16 sps:$4 sm:$0xff]   ;;  %v5177_v36 = vld [vmem:[#allocation2 + $0x38c] ss:$16 sps:$4 sm:$0xff]   ;;  %v1502_v7 = vld [vmem:[%s6618_s2] sm:$0xf] }
 0x224   :  { %v2829_v22 = vpack.c.b16 %v2822_v34, %v2822_v34  ;;  %v5175_v39 = vld [vmem:[#allocation2 + $0x388] ss:$16 sps:$4 sm:$0xff]   ;;  %s5244_s2 = smov [#allocation5]  }
 0x225   :  { %v1798_v56 = vunpack.c.l.b16 %v1296_v30  ;;  %v1799_v23 = vunpack.c.h.b16 %v1296_v30  ;;  %v2239_v5 = vsel %vm1920_vm14, %v2238_v62, %v2234_v46  ;;  %v5178_v59 = vld [vmem:[#allocation2 + $0x368] ss:$16 sps:$4 sm:$0xff]   ;;  %v5189_v62 = vld [vmem:[#allocation2 + $0x30c] ss:$16 sps:$4 sm:$0xff]   ;;  %s4197_s20 = sshll.u32 %s5244_s2, 4  ;;  %s4198_s20 = int_to_ptr.vmem [resolvable:$true] %s4197_s20 }
 0x226   :  { %3934 = vmatprep.mubr.bf16.mxu0 %v2829_v22  ;;  %4098 = vmatprep.mubr.bf16.mxu1 %v2829_v22  ;;  %v2244_v47 = vsel %vm1927_vm15, %v2243_v63, %v2239_v5  ;;  %v5181_v61 = vld [vmem:[#allocation2 + $0x348] ss:$16 sps:$4 sm:$0xff]   ;;  %v5192_v22 = vld [vmem:[#allocation2 + $0x60c] ss:$16 sps:$4 sm:$0xff]   ;;  %s5215_s21 = scalar_lea.vmem %s4198_s20, 128  ;;  %p5220_p6 = scmp.lt.s32.totalorder %s4198_s20, %s4198_s20 }
 0x227   :  { %v2721_v9 = vrot.slane %v1798_v56, %v6106_v0  ;;  %v2726_v32 = vrot.slane %v1799_v23, %v6118_v27  ;;  %4095 = vmatpush2.bf16.msra.mxu1 %v5133_v49  ;;  %v5145_v0 = vld [vmem:[#allocation2 + $0x2c8] ss:$16 sps:$4 sm:$0xff]   ;;  %v5150_v27 = vld [vmem:[#allocation2 + $0x2ac] ss:$16 sps:$4 sm:$0xff]   ;;  %p5216_p5 = scmp.ne.s32.totalorder %s4198_s20, %s5215_s21  ;;  %p5221_p7 = scmp.lt.s32.totalorder %s5215_s21, %s5215_s21 }
 0x228   :  { %4096 = vmatprep.subr.bf16.mxu1 %v5141_v40  ;;  %v6669_v51 = vld [vmem:[#allocation8_spill] sm:$0xff] }
 0x229   :  { %v2722_v29 = vsel %vm1920_vm14, %v2721_v9, %v2717_v21  ;;  %v1506_v24 = vsub.s32 0, %v6669_v51  ;;  %v1510_v26 = vsub.s32 1, %v6669_v51  ;;  %v5184_v10 = vld [vmem:[#allocation2 + $0x328] ss:$16 sps:$4 sm:$0xff]   ;;  %p5222_p8 = por %p5221_p7, %p5220_p6 }
 0x22a   :  { %v2727_v52 = vsel %vm1927_vm15, %v2726_v32, %v2722_v29  ;;  %v5190_v23 = vld [vmem:[#allocation2 + $0x608] ss:$16 sps:$4 sm:$0xff]  }
 0x22b   :  { %4097 = vmatpush2.bf16.msra.mxu1 %v5139_v53  ;;  %v2821_v33 = vsel %vm2816_vm9, %v2727_v52, %v2244_v47  ;;  %v1507_v42 = vrot.slane %v1502_v7, %v1506_v24  ;;  %v1511_v30 = vrot.slane %v1502_v7, %v1510_v26  ;;  %p5223_p9 = pnand %p5222_p8, %p5216_p5 }
 0x22c   :  { %v2828_v58 = vpack.c.b16 %v2821_v33, %v2821_v33 }
 0x22e   :  { %3935 = vmatmul.mubr.bf16.vlgmr.msra.gmra.mxu0 %v2828_v58  ;;  %4099 = vmatmul.mubr.bf16.vlgmr.msra.gmra.mxu1 %v2828_v58 }
 0x22f   :  { %4026 = vmatpush1.bf16.msra.mxu0 %v5142_v31  ;;  %4057 = vmatprep.mubr.bf16.mxu0 %v6286_v8  ;;  %v5160_v8 = vld [vmem:[#allocation2 + $0x228] ss:$16 sps:$4 sm:$0xff]  }
 0x230   :  { %4027 = vmatprep.subr.bf16.mxu0 %v5147_v16 }
 0x233   :  { %4028 = vmatpush1.bf16.msra.mxu0 %v5145_v0 }
 0x234   :  { %4029 = vmatprep.subr.bf16.mxu0 %v5150_v27 }
 0x237   :  { %4030 = vmatpush1.bf16.msra.mxu0 %v5148_v1 }
 0x238   :  { %4031 = vmatprep.subr.bf16.mxu0 %v5153_v38 }
 0x23b   :  { %4032 = vmatpush1.bf16.msra.mxu0 %v5151_v4 }
 0x23c   :  { %4033 = vmatprep.subr.bf16.mxu0 %v5156_v60  ;;  %v1518_v60 = vsub.s32 3, %v6669_v51 }
 0x23f   :  { %4034 = vmatpush1.bf16.msra.mxu0 %v5154_v45 }
 0x240   :  { %4035 = vmatprep.subr.bf16.mxu0 %v5159_v57 }
 0x243   :  { %4036 = vmatpush1.bf16.msra.mxu0 %v5157_v41 }
 0x244   :  { %4037 = vmatprep.subr.bf16.mxu0 %v5162_v11 }
 0x247   :  { %4038 = vmatpush1.bf16.msra.mxu0 %v5160_v8 }
 0x248   :  { %4039 = vmatprep.subr.bf16.mxu0 %v5165_v14 }
 0x24b   :  { %4040 = vmatpush1.bf16.msra.mxu0 %v5163_v25 }
 0x24c   :  { %4041 = vmatprep.subr.bf16.mxu0 %v5168_v50 }
 0x24f   :  { %4042 = vmatpush2.bf16.msra.mxu0 %v5166_v20 }
 0x250   :  { %4043 = vmatprep.subr.bf16.mxu0 %v5171_v28 }
 0x253   :  { %4044 = vmatpush2.bf16.msra.mxu0 %v5169_v18 }
 0x254   :  { %4045 = vmatprep.subr.bf16.mxu0 %v5174_v44 }
 0x256   :  { %v3895_v17 = vpop.f32.mrf.mxu1 }
 0x257   :  { %4046 = vmatpush2.bf16.msra.mxu0 %v5172_v6 }
 0x258   :  { %v3897_v15 = vpop.f32.mrf.mxu1  ;;  %4047 = vmatprep.subr.bf16.mxu0 %v5177_v36 }
 0x25a   :  { %v3899_v48 = vpop.f32.mrf.mxu1 }
 0x25b   :  { %4048 = vmatpush2.bf16.msra.mxu0 %v5175_v39 }
 0x25c   :  { %v3900_v3 = vpop.f32.mrf.mxu1  ;;  %4049 = vmatprep.subr.bf16.mxu0 %v5180_v35 }
 0x25f   :  { %4050 = vmatpush2.bf16.msra.mxu0 %v5178_v59 }
 0x260   :  { %4051 = vmatprep.subr.bf16.mxu0 %v5183_v37 }
 0x263   :  { %4052 = vmatpush2.bf16.msra.mxu0 %v5181_v61 }
 0x264   :  { %4053 = vmatprep.subr.bf16.mxu0 %v5186_v2 }
 0x266   :  { %v3854_v34 = vpop.f32.mrf.mxu0 }
 0x267   :  { %v3855_v49 = vadd.f32 %v3854_v34, %v1507_v42  ;;  %4054 = vmatpush2.bf16.msra.mxu0 %v5184_v10 }
 0x268   :  { %v3856_v13 = vpop.f32.mrf.mxu0  ;;  %4055 = vmatprep.subr.bf16.mxu0 %v5189_v62 }
 0x269   :  { %v3857_v40 = vadd.f32 %v3856_v13, %v1511_v30  ;;  %v3896_v12 = vadd.f32 %v3895_v17, %v3855_v49  ;;  %v5243_v49 = vmov 1983009808  }
 0x26a   :  { %v3858_v56 = vpop.f32.mrf.mxu0 }
 0x26b   :  { %4056 = vmatpush2.bf16.msra.mxu0 %v5187_v43  ;;  %v3898_v46 = vadd.f32 %v3897_v15, %v3857_v40  ;;  %v4175_v43 = vunpack.c.l.s4 %v5243_v49 }
 0x26c   :  { %v3859_v63 = vpop.f32.mrf.mxu0  ;;  %4121 = vmatprep.subr.bf16.mxu0 %v5192_v22 }
 0x26d   :  { %v3977_v5 = vpop.f32.mrf.mxu1  ;;  %v4176_v13 = vunpack.c.0.s8 %v4175_v43 }
 0x26e   :  { %4058 = vmatmul.mubr.bf16.vlgmr.msra.gmra.mxu0 %v6349_v54 }
 0x26f   :  { %4122 = vmatpush1.bf16.msra.mxu0 %v5190_v23  ;;  %v3979_v9 = vpop.f32.mrf.mxu1  ;;  %4139 = vmatprep.mubr.bf16.mxu0 %v5242_v55  ;;  %v1514_v55 = vsub.s32 2, %v6669_v51  ;;  %v4179_v40 = vsub.s32 %v4176_v13, %v6669_v51 }
 0x271   :  { %v3981_v32 = vpop.f32.mrf.mxu1  ;;  %v1515_v45 = vrot.slane %v1502_v7, %v1514_v55 }
 0x273   :  { %v3982_v53 = vpop.f32.mrf.mxu1 }
 0x276   :  { %4403 = vmatmul.mubr.msk.bf16.vlgmr.msra.gmra.mxu0 %vm422_vm0, %v6405_v19  ;;  %v1519_v19 = vrot.slane %v1502_v7, %v1518_v60  ;;  %vm4152_vm0 = vcmask 1041408  }
 0x2ad   :  { %v4018_v21 = vpop.f32.mrf.mxu1 }
 0x2ae   :  { %v4019_v41 = vadd.f32 %v4018_v21, %v1515_v45 }
 0x2af   :  { %v4020_v29 = vpop.f32.mrf.mxu1 }
 0x2b0   :  { %v4021_v14 = vadd.f32 %v4020_v29, %v1519_v19 }
 0x2b1   :  { %v4022_v47 = vpop.f32.mrf.mxu1 }
 0x2b3   :  { %v4023_v52 = vpop.f32.mrf.mxu1 }
 0x2ee   :  { %v3936_v31 = vpop.f32.mrf.mxu0  ;;  %v4100_v33 = vpop.f32.mrf.mxu1 }
 0x2ef   :  { %v3937_v58 = vadd.f32 %v3936_v31, %v3896_v12 }
 0x2f0   :  { %v3938_v16 = vpop.f32.mrf.mxu0  ;;  %v4102_v0 = vpop.f32.mrf.mxu1 }
 0x2f1   :  { %v3939_v27 = vadd.f32 %v3938_v16, %v3898_v46  ;;  %v3978_v25 = vadd.f32 %v3977_v5, %v3937_v58 }
 0x2f2   :  { %v3940_v54 = vpop.f32.mrf.mxu0  ;;  %v4104_v1 = vpop.f32.mrf.mxu1 }
 0x2f3   :  { %v3980_v11 = vadd.f32 %v3979_v9, %v3939_v27  ;;  %v4148_v6 = vmul.f32 %v3978_v25, %v3978_v25 }
 0x2f4   :  { %v3941_v38 = vpop.f32.mrf.mxu0  ;;  %v4105_v4 = vpop.f32.mrf.mxu1 }
 0x2f5   :  { %v4149_v28 = vmul.f32 %v3980_v11, %v3980_v11  ;;  %v4153_v59 = vsel %vm4152_vm0, %v4148_v6, 0.0 }
 0x2f7   :  { %v4154_v39 = vsel %vm4152_vm0, %v4149_v28, 0.0 }
 0x2f8   :  { %v4155_v61 = vadd.f32 %v4154_v39, %v4153_v59 }
 0x32e   :  { %v4059_v57 = vpop.f32.mrf.mxu0 }
 0x32f   :  { %v4060_v50 = vadd.f32 %v4059_v57, %v4019_v41 }
 0x330   :  { %v4061_v8 = vpop.f32.mrf.mxu0 }
 0x331   :  { %v4062_v18 = vadd.f32 %v4061_v8, %v4021_v14  ;;  %v4101_v36 = vadd.f32 %v4100_v33, %v4060_v50 }
 0x332   :  { %v4063_v20 = vpop.f32.mrf.mxu0 }
 0x333   :  { %v4103_v35 = vadd.f32 %v4102_v0, %v4062_v18 }
 0x334   :  { %v4064_v44 = vpop.f32.mrf.mxu0 }
 0x336   :  { %v4141_v17 = vpop.f32.mrf.mxu0 }
 0x337   :  { %v4142_v15 = vadd.f32 %v4141_v17, %v4101_v36 }
 0x338   :  { %v4143_v48 = vpop.f32.mrf.mxu0 }
 0x339   :  { %v4150_v3 = vmul.f32 %v4142_v15, %v4142_v15  ;;  %v4144_v37 = vadd.f32 %v4143_v48, %v4103_v35 }
 0x33a   :  { %v4145_v24 = vpop.f32.mrf.mxu0 }
 0x33b   :  { %v4156_v2 = vsel %vm4152_vm0, %v4150_v3, 0.0  ;;  %v4151_v7 = vmul.f32 %v4144_v37, %v4144_v37 }
 0x33c   :  { %v4157_v26 = vadd.f32 %v4156_v2, %v4155_v61  ;;  %v4146_v10 = vpop.f32.mrf.mxu0 }
 0x33d   :  { %v4158_v42 = vsel %vm4152_vm0, %v4151_v7, 0.0 }
 0x33e   :  { %v4159_v62 = vadd.f32 %v4158_v42, %v4157_v26 }
 0x340   :  { %4160 = vadd.xlane.f32.xlu0 %v4159_v62 }
 0x3c9   :  { %v4161_v30 = vpop.xlane.xlu0 %4160 }
 0x3ca   :  { %v4162_v34 = vmax.f32 %v4161_v30, 1e-24 }
 0x3cc   :  { %5193 = vrsqrt.f32 %v4162_v34 }
 0x3d9   :  { %v5194_v22 = vpop.eup %5193 }
 0x3da   :  { %v4164_v12 = vmul.f32 %v5194_v22, %v3978_v25  ;;  %v4165_v56 = vmul.f32 %v5194_v22, %v3980_v11  ;;  %v4166_v23 = vmul.f32 %v5194_v22, %v4142_v15  ;;  %v4167_v46 = vmul.f32 %v5194_v22, %v4144_v37 }
 0x3dc   :  { %v4172_v63 = vcombine.low %v4164_v12, %v4165_v56  ;;  %v4173_v5 = vcombine.low %v4166_v23, %v4167_v46 }
 0x3de   :  { %v4180_v9 = vrot.slane %v4172_v63, %v4179_v40  ;;  %v4187_v32 = vrot.slane %v4173_v5, %v4179_v40 }
 0x3e0   :  { %v4188_v53 = vcombine.low %v4180_v9, %v4187_v32 }
 0x3e2   :  { %4190 = vst [vmem:[#allocation5] sm:$0xff] %v4188_v53 }
 0x3e3   :  { %5226 = shalt.err (!%p5223_p9)
}
 0x3e4   :  { %4200 = dma.vmem_to_hbm [thread:$0]  %s4198_s20, 128, %s6619_s3, [#allocation4]  }
 0x3e5   :  { %5237 = dma.done.wait [#allocation4], 128  }
 0x3e6   :  { %5238 = vsyncadd [#allocation4], 4294967168 }
 0x3e7   :  { %4204 = vsyncpa [#allocation3], 1 }
 0x3e8   :  { %4205 = vsyncpa [#allocation4], 1 }

</bundles_post_ra>
